<compile_context>
chip_gen: v5e
topology: v5e:2x2
jax: 0.10.0
libtpu: 0.0.40
codegen_flags: <defaults>
</compile_context>

<pallas_src>
import functools

import jax
import jax.numpy as jnp
import numpy as np
from jax import lax
from jax.experimental import pallas as pl
from jax.experimental.pallas import tpu as pltpu

C1_OUT = 32
C2_OUT = 32
LRN_SIZE = 5
LRN_ALPHA = 1e-4
LRN_BETA = 0.75
LRN_K = 1.0


# ---------------------------------------------------------------------------
# Fused Pallas kernel: conv1 + ReLU + conv2 + bias + LocalResponseNorm
# ---------------------------------------------------------------------------
def fused_cnn_kernel(x_ref, w1_ref, b1_ref, w2_ref, b2_ref, mask_ref,
                     o_ref, h1_ref, *, Pp, Lp, slack, chunk, ipb):
    # x_ref   : (ipb, Lc, 32)  flat zero-padded canvases, pre-replicated to 32 lanes
    # w1_ref  : (9, 32)        conv1 weights, [tap, cout]
    # b1_ref  : (1, 32)
    # w2_ref  : (9, 32, 32)    conv2 weights, [tap, cin, cout]
    # b2_ref  : (1, 32)
    # mask_ref: (Lp, 32)       1 on interior pixels of the padded grid, 0 elsewhere
    # o_ref   : (ipb, Lp, 32)  output slab (padded-grid layout; wrapper crops)
    # h1_ref  : (Lc, 32)       VMEM scratch holding zero-padded h1 (reused per image)
    C = C1_OUT
    n_chunks = Lp // chunk
    # tap offsets into the guard-padded flat canvas, tap = a*3 + b.
    # With Pp % 8 == 0 and slack % 8 == 0 these sit on sublane phases {-1, 0, +1}.
    offs = [slack + (a - 1) * Pp + (b - 1) for a in range(3) for b in range(3)]

    # Loop-invariant small values, hoisted once (JAX does not CSE broadcasts).
    w1rows = [w1_ref[t:t + 1, :] for t in range(9)]          # 9 x (1, 32)
    b1v = b1_ref[...]
    b2v = b2_ref[...]

    # LRN banded 0/1 channel-window matrix, generated in-kernel (no DMA operand).
    ci = lax.broadcasted_iota(jnp.int32, (C2_OUT, C2_OUT), 0)
    cj = lax.broadcasted_iota(jnp.int32, (C2_OUT, C2_OUT), 1)
    band = (jnp.abs(ci - cj) <= (LRN_SIZE // 2)).astype(jnp.float32)

    # Guard rows of the h1 scratch: written once, never touched again.
    h1_ref[0:slack, :] = jnp.zeros((slack, C), jnp.float32)
    h1_ref[slack + Lp:slack + Lp + slack, :] = jnp.zeros((slack, C), jnp.float32)

    for img in range(ipb):        # static unroll over the images of this grid step
        # ---- pass 1: conv1 + bias + ReLU + pad-ring mask, row-chunked ----------
        @pl.loop(0, n_chunks)
        def _conv1(cidx):
            c = pl.multiple_of(cidx * chunk, 8)
            acc1 = x_ref[img, pl.ds(offs[0] + c, chunk), :] * w1rows[0]
            for t in range(1, 9):
                xs = x_ref[img, pl.ds(offs[t] + c, chunk), :]        # (chunk, 32)
                acc1 = acc1 + xs * w1rows[t]
            # zero the pad ring (and dead pitch columns) so h1's zero padding is exact
            h1c = jnp.maximum(acc1 + b1v, 0.0) * mask_ref[pl.ds(c, chunk), :]
            h1_ref[pl.ds(slack + c, chunk), :] = h1c

        # ---- pass 2: conv2 + bias + LRN(size=5), row-chunked --------------------
        @pl.loop(0, n_chunks)
        def _conv2(cidx):
            c = pl.multiple_of(cidx * chunk, 8)
            # 9 accumulating MXU dots, uninterrupted by VPU work (v7x: MRB accumulate)
            acc2 = jnp.dot(h1_ref[pl.ds(offs[0] + c, chunk), :], w2_ref[0],
                           preferred_element_type=jnp.float32)
            for t in range(1, 9):
                hs = h1_ref[pl.ds(offs[t] + c, chunk), :]            # (chunk, 32)
                acc2 = acc2 + jnp.dot(hs, w2_ref[t],
                                      preferred_element_type=jnp.float32)
            y = acc2 + b2v
            # windowed channel sum-of-squares via banded matmul (zero-padded window)
            s = jnp.dot(y * y, band, preferred_element_type=jnp.float32)
            d = LRN_K + (LRN_ALPHA / LRN_SIZE) * s                   # d >= 1
            o_ref[img, pl.ds(c, chunk), :] = y * jnp.exp(-LRN_BETA * jnp.log(d))


# ---------------------------------------------------------------------------
# Wrapper: layout plumbing only; all compute lives in the fused kernel
# ---------------------------------------------------------------------------
def cnn_model_forward(x_nchw, params):
    """x_nchw: (N, 1, H, W) float32 -> (N, 32, H, W) float32."""
    w1, b1, w2, b2 = params
    N, Cin, H, W = x_nchw.shape
    assert Cin == 1, "CNN_model.C1 has in_channels=1"

    Pp = ((W + 2 + 7) // 8) * 8           # 8-aligned canvas row pitch
    Lp = (H + 2) * Pp                     # padded-canvas rows per image (mult of 8)
    slack = Pp + 8                        # guard rows; >= Pp + 1 and 8-aligned
    Lc = Lp + 2 * slack

    # row chunk: largest k*Pp <= 128 with k | (H+2)  -> chunk | Lp and chunk % 8 == 0
    k = 1
    for d in range(1, max(1, 128 // Pp) + 1):
        if (H + 2) % d == 0:
            k = d
    chunk = k * Pp

    # flat zero-padded canvas, pre-replicated to the 32 output lanes (hoists the
    # per-tap lane-broadcast out of the kernel); Cin == 1 so no NCHW->NHWC needed.
    xp = jnp.pad(x_nchw[:, 0], ((0, 0), (1, 1), (1, Pp - W - 1)))     # (N, H+2, Pp)
    xflat = jnp.pad(xp.reshape(N, Lp), ((0, 0), (slack, slack)))      # (N, Lc)
    xcanvas = jnp.broadcast_to(xflat[:, :, None], (N, Lc, C1_OUT))    # (N, Lc, 32)

    # weights in tap-major matmul form, tap = a*3 + b
    w1m = jnp.transpose(w1, (2, 3, 1, 0)).reshape(9, C1_OUT)          # [tap, cout]
    w2m = jnp.transpose(w2, (2, 3, 1, 0)).reshape(9, C1_OUT, C2_OUT)  # [tap, cin, cout]

    # interior mask over the flat padded grid (pad ring + dead pitch columns -> 0)
    q = jnp.arange(Lp)
    row, col = q // Pp, q % Pp
    valid = ((row >= 1) & (row <= H) & (col >= 1) & (col <= W)).astype(jnp.float32)
    mask = jnp.broadcast_to(valid[:, None], (Lp, C1_OUT))             # (Lp, 32)

    # grid: one step per TensorCore-worth of images.  v7x (2 TCs) keeps a 2-way
    # "parallel" grid; single-TC v5e/v6e collapse the whole batch into one step.
    try:
        kind = jax.devices()[0].device_kind.lower()
    except Exception:
        kind = ""
    steps = 2 if ("v7" in kind and N % 2 == 0 and N >= 2) else 1
    ipb = N // steps

    kernel = functools.partial(fused_cnn_kernel, Pp=Pp, Lp=Lp, slack=slack,
                               chunk=chunk, ipb=ipb)
    out_flat = pl.pallas_call(
        kernel,
        out_shape=jax.ShapeDtypeStruct((N, Lp, C2_OUT), jnp.float32),
        grid=(steps,),
        in_specs=[
            pl.BlockSpec((ipb, Lc, C1_OUT), lambda n: (n, 0, 0)),      # x canvases
            pl.BlockSpec((9, C1_OUT), lambda n: (0, 0)),               # w1
            pl.BlockSpec((1, C1_OUT), lambda n: (0, 0)),               # b1
            pl.BlockSpec((9, C1_OUT, C2_OUT), lambda n: (0, 0, 0)),    # w2
            pl.BlockSpec((1, C2_OUT), lambda n: (0, 0)),               # b2
            pl.BlockSpec((Lp, C1_OUT), lambda n: (0, 0)),              # interior mask
        ],
        out_specs=pl.BlockSpec((ipb, Lp, C2_OUT), lambda n: (n, 0, 0)),
        scratch_shapes=[pltpu.VMEM((Lc, C1_OUT), jnp.float32)],        # zero-padded h1
        compiler_params=pltpu.CompilerParams(dimension_semantics=("parallel",)),
    )(xcanvas, w1m, b1.reshape(1, C1_OUT), w2m, b2.reshape(1, C2_OUT), mask)

    # crop the pad ring + dead pitch columns, back to NCHW at the API boundary
    out = out_flat.reshape(N, H + 2, Pp, C2_OUT)[:, 1:H + 1, 1:W + 1, :]
    return jnp.transpose(out, (0, 3, 1, 2))


# ---------------------------------------------------------------------------
# Pure-JAX reference (for correctness check)
# ---------------------------------------------------------------------------
def reference_forward(x_nchw, params):
    w1, b1, w2, b2 = params
    dn = ("NCHW", "OIHW", "NCHW")
    y = lax.conv_general_dilated(x_nchw, w1, (1, 1), "SAME", dimension_numbers=dn)
    y = jnp.maximum(y + b1[None, :, None, None], 0.0)
    y = lax.conv_general_dilated(y, w2, (1, 1), "SAME", dimension_numbers=dn)
    y = y + b2[None, :, None, None]
    C = y.shape[1]
    idx = jnp.arange(C)
    band = (jnp.abs(idx[:, None] - idx[None, :]) <= (LRN_SIZE // 2)).astype(y.dtype)
    s = jnp.einsum("nchw,cd->ndhw", y * y, band)
    denom = jnp.power(LRN_K + (LRN_ALPHA / LRN_SIZE) * s, LRN_BETA)
    return y / denom


# ---------------------------------------------------------------------------
if __name__ == "__main__":
    key = jax.random.PRNGKey(0)
    k_x, k_w1, k_b1, k_w2, k_b2 = jax.random.split(key, 5)

    # small shapes consistent with the module: batch=2, 1 input channel, 16x16
    x = jax.random.normal(k_x, (2, 1, 16, 16), dtype=jnp.float32)

    w1 = jax.random.normal(k_w1, (32, 1, 3, 3), dtype=jnp.float32) * 0.1
    b1 = jax.random.normal(k_b1, (32,), dtype=jnp.float32) * 0.1
    w2 = jax.random.normal(k_w2, (32, 32, 3, 3), dtype=jnp.float32) * 0.1
    b2 = jax.random.normal(k_b2, (32,), dtype=jnp.float32) * 0.1
    params = (w1, b1, w2, b2)

    out = jax.jit(cnn_model_forward)(x, params)
    out = jax.block_until_ready(out)

    ref = jax.block_until_ready(reference_forward(x, params))
    np.testing.assert_allclose(np.asarray(out), np.asarray(ref), rtol=1e-4, atol=1e-4)

    print("KERNEL_OK")
</pallas_src>

<mosaic_0001>
module attributes {stable_mosaic.version = 11 : i64} {
  func.func @fused_cnn_kernel(%arg0: i32, %arg1: memref<2x496x32xf32, #tpu.memory_space<vmem>>, %arg2: memref<9x32xf32, #tpu.memory_space<vmem>>, %arg3: memref<1x32xf32, #tpu.memory_space<vmem>>, %arg4: memref<9x32x32xf32, #tpu.memory_space<vmem>>, %arg5: memref<1x32xf32, #tpu.memory_space<vmem>>, %arg6: memref<432x32xf32, #tpu.memory_space<vmem>>, %arg7: memref<2x432x32xf32, #tpu.memory_space<vmem>>, %arg8: memref<496x32xf32, #tpu.memory_space<vmem>>) attributes {dimension_semantics = [#tpu.dimension_semantics<parallel>], iteration_bounds = array<i64: 1>, scalar_prefetch = 0 : i64, scratch_operands = 1 : i64, tpu.core_type = #tpu.core_type<tc>, window_params = [{transform_indices = @transform_0, window_bounds = array<i64: 2, 496, 32>}, {pipeline_mode = #tpu.pipeline_mode<synchronous>, transform_indices = @transform_1, window_bounds = array<i64: 9, 32>}, {pipeline_mode = #tpu.pipeline_mode<synchronous>, transform_indices = @transform_2, window_bounds = array<i64: 1, 32>}, {pipeline_mode = #tpu.pipeline_mode<synchronous>, transform_indices = @transform_3, window_bounds = array<i64: 9, 32, 32>}, {pipeline_mode = #tpu.pipeline_mode<synchronous>, transform_indices = @transform_4, window_bounds = array<i64: 1, 32>}, {pipeline_mode = #tpu.pipeline_mode<synchronous>, transform_indices = @transform_5, window_bounds = array<i64: 432, 32>}, {transform_indices = @transform_6, window_bounds = array<i64: 2, 432, 32>}]} {
    %c0 = arith.constant 0 : index
    %c0_0 = arith.constant 0 : index
    %0 = vector.load %arg2[%c0, %c0_0] : memref<9x32xf32, #tpu.memory_space<vmem>>, vector<1x32xf32>
    %c1 = arith.constant 1 : index
    %c0_1 = arith.constant 0 : index
    %1 = vector.load %arg2[%c1, %c0_1] : memref<9x32xf32, #tpu.memory_space<vmem>>, vector<1x32xf32>
    %c2 = arith.constant 2 : index
    %c0_2 = arith.constant 0 : index
    %2 = vector.load %arg2[%c2, %c0_2] : memref<9x32xf32, #tpu.memory_space<vmem>>, vector<1x32xf32>
    %c3 = arith.constant 3 : index
    %c0_3 = arith.constant 0 : index
    %3 = vector.load %arg2[%c3, %c0_3] : memref<9x32xf32, #tpu.memory_space<vmem>>, vector<1x32xf32>
    %c4 = arith.constant 4 : index
    %c0_4 = arith.constant 0 : index
    %4 = vector.load %arg2[%c4, %c0_4] : memref<9x32xf32, #tpu.memory_space<vmem>>, vector<1x32xf32>
    %c5 = arith.constant 5 : index
    %c0_5 = arith.constant 0 : index
    %5 = vector.load %arg2[%c5, %c0_5] : memref<9x32xf32, #tpu.memory_space<vmem>>, vector<1x32xf32>
    %c6 = arith.constant 6 : index
    %c0_6 = arith.constant 0 : index
    %6 = vector.load %arg2[%c6, %c0_6] : memref<9x32xf32, #tpu.memory_space<vmem>>, vector<1x32xf32>
    %c7 = arith.constant 7 : index
    %c0_7 = arith.constant 0 : index
    %7 = vector.load %arg2[%c7, %c0_7] : memref<9x32xf32, #tpu.memory_space<vmem>>, vector<1x32xf32>
    %c8 = arith.constant 8 : index
    %c0_8 = arith.constant 0 : index
    %8 = vector.load %arg2[%c8, %c0_8] : memref<9x32xf32, #tpu.memory_space<vmem>>, vector<1x32xf32>
    %c0_9 = arith.constant 0 : index
    %c0_10 = arith.constant 0 : index
    %9 = vector.load %arg3[%c0_9, %c0_10] : memref<1x32xf32, #tpu.memory_space<vmem>>, vector<1x32xf32>
    %c0_11 = arith.constant 0 : index
    %c0_12 = arith.constant 0 : index
    %10 = vector.load %arg5[%c0_11, %c0_12] : memref<1x32xf32, #tpu.memory_space<vmem>>, vector<1x32xf32>
    %11 = tpu.iota {dimensions = array<i32: 0>} : vector<32x32xi32>
    %12 = tpu.iota {dimensions = array<i32: 1>} : vector<32x32xi32>
    %13 = arith.subi %11, %12 : vector<32x32xi32>
    %14 = math.absi %13 : vector<32x32xi32>
    %c2_i32 = arith.constant 2 : i32
    %15 = vector.broadcast %c2_i32 : i32 to vector<32x32xi32>
    %16 = arith.cmpi sle, %14, %15 : vector<32x32xi32>
    %17 = arith.extui %16 : vector<32x32xi1> to vector<32x32xi32>
    %18 = arith.sitofp %17 : vector<32x32xi32> to vector<32x32xf32>
    %cst = arith.constant 0.000000e+00 : f32
    %19 = vector.broadcast %cst : f32 to vector<32x32xf32>
    %c0_13 = arith.constant 0 : index
    %c0_14 = arith.constant 0 : index
    %20 = vector.load %arg8[%c0_13, %c0_14] : memref<496x32xf32, #tpu.memory_space<vmem>>, vector<32x32xf32>
    tpu.vector_store %arg8[%c0_13, %c0_14], %19 {strides = array<i32>} : memref<496x32xf32, #tpu.memory_space<vmem>>, vector<32x32xf32>,
    %cst_15 = arith.constant 0.000000e+00 : f32
    %21 = vector.broadcast %cst_15 : f32 to vector<32x32xf32>
    %c464 = arith.constant 464 : index
    %c0_16 = arith.constant 0 : index
    %22 = vector.load %arg8[%c464, %c0_16] : memref<496x32xf32, #tpu.memory_space<vmem>>, vector<32x32xf32>
    tpu.vector_store %arg8[%c464, %c0_16], %21 {strides = array<i32>} : memref<496x32xf32, #tpu.memory_space<vmem>>, vector<32x32xf32>,
    %c0_i32 = arith.constant 0 : i32
    %c6_i32 = arith.constant 6 : i32
    %23 = arith.addi %c0_i32, %c6_i32 : i32
    %c1_i32 = arith.constant 1 : i32
    scf.for %arg9 = %c0_i32 to %23 step %c1_i32  : i32 {
      %c1_i32_30 = arith.constant 1 : i32
      %27 = arith.muli %arg9, %c1_i32_30 : i32
      %c0_i32_31 = arith.constant 0 : i32
      %28 = arith.addi %c0_i32_31, %27 : i32
      %c72_i32 = arith.constant 72 : i32
      %29 = arith.muli %28, %c72_i32 : i32
      %30 = tpu.assume_multiple %29, 8 : i32
      %c7_i32 = arith.constant 7 : i32
      %31 = arith.addi %c7_i32, %30 : i32
      %c0_32 = arith.constant 0 : index
      %32 = arith.index_cast %31 : i32 to index
      %c0_33 = arith.constant 0 : index
      %33 = vector.load %arg1[%c0_32, %32, %c0_33] : memref<2x496x32xf32, #tpu.memory_space<vmem>>, vector<1x72x32xf32>
      %34 = vector.shape_cast %33 : vector<1x72x32xf32> to vector<72x32xf32>
      %35 = vector.broadcast %0 : vector<1x32xf32> to vector<72x32xf32>
      %36 = arith.mulf %34, %35 : vector<72x32xf32>
      %c8_i32 = arith.constant 8 : i32
      %37 = arith.addi %c8_i32, %30 : i32
      %c0_34 = arith.constant 0 : index
      %38 = arith.index_cast %37 : i32 to index
      %c0_35 = arith.constant 0 : index
      %39 = vector.load %arg1[%c0_34, %38, %c0_35] : memref<2x496x32xf32, #tpu.memory_space<vmem>>, vector<1x72x32xf32>
      %40 = vector.shape_cast %39 : vector<1x72x32xf32> to vector<72x32xf32>
      %41 = vector.broadcast %1 : vector<1x32xf32> to vector<72x32xf32>
      %42 = arith.mulf %40, %41 : vector<72x32xf32>
      %43 = arith.addf %36, %42 : vector<72x32xf32>
      %c9_i32 = arith.constant 9 : i32
      %44 = arith.addi %c9_i32, %30 : i32
      %c0_36 = arith.constant 0 : index
      %45 = arith.index_cast %44 : i32 to index
      %c0_37 = arith.constant 0 : index
      %46 = vector.load %arg1[%c0_36, %45, %c0_37] : memref<2x496x32xf32, #tpu.memory_space<vmem>>, vector<1x72x32xf32>
      %47 = vector.shape_cast %46 : vector<1x72x32xf32> to vector<72x32xf32>
      %48 = vector.broadcast %2 : vector<1x32xf32> to vector<72x32xf32>
      %49 = arith.mulf %47, %48 : vector<72x32xf32>
      %50 = arith.addf %43, %49 : vector<72x32xf32>
      %c31_i32 = arith.constant 31 : i32
      %51 = arith.addi %c31_i32, %30 : i32
      %c0_38 = arith.constant 0 : index
      %52 = arith.index_cast %51 : i32 to index
      %c0_39 = arith.constant 0 : index
      %53 = vector.load %arg1[%c0_38, %52, %c0_39] : memref<2x496x32xf32, #tpu.memory_space<vmem>>, vector<1x72x32xf32>
      %54 = vector.shape_cast %53 : vector<1x72x32xf32> to vector<72x32xf32>
      %55 = vector.broadcast %3 : vector<1x32xf32> to vector<72x32xf32>
      %56 = arith.mulf %54, %55 : vector<72x32xf32>
      %57 = arith.addf %50, %56 : vector<72x32xf32>
      %c32_i32 = arith.constant 32 : i32
      %58 = arith.addi %c32_i32, %30 : i32
      %c0_40 = arith.constant 0 : index
      %59 = arith.index_cast %58 : i32 to index
      %c0_41 = arith.constant 0 : index
      %60 = vector.load %arg1[%c0_40, %59, %c0_41] : memref<2x496x32xf32, #tpu.memory_space<vmem>>, vector<1x72x32xf32>
      %61 = vector.shape_cast %60 : vector<1x72x32xf32> to vector<72x32xf32>
      %62 = vector.broadcast %4 : vector<1x32xf32> to vector<72x32xf32>
      %63 = arith.mulf %61, %62 : vector<72x32xf32>
      %64 = arith.addf %57, %63 : vector<72x32xf32>
      %c33_i32 = arith.constant 33 : i32
      %65 = arith.addi %c33_i32, %30 : i32
      %c0_42 = arith.constant 0 : index
      %66 = arith.index_cast %65 : i32 to index
      %c0_43 = arith.constant 0 : index
      %67 = vector.load %arg1[%c0_42, %66, %c0_43] : memref<2x496x32xf32, #tpu.memory_space<vmem>>, vector<1x72x32xf32>
      %68 = vector.shape_cast %67 : vector<1x72x32xf32> to vector<72x32xf32>
      %69 = vector.broadcast %5 : vector<1x32xf32> to vector<72x32xf32>
      %70 = arith.mulf %68, %69 : vector<72x32xf32>
      %71 = arith.addf %64, %70 : vector<72x32xf32>
      %c55_i32 = arith.constant 55 : i32
      %72 = arith.addi %c55_i32, %30 : i32
      %c0_44 = arith.constant 0 : index
      %73 = arith.index_cast %72 : i32 to index
      %c0_45 = arith.constant 0 : index
      %74 = vector.load %arg1[%c0_44, %73, %c0_45] : memref<2x496x32xf32, #tpu.memory_space<vmem>>, vector<1x72x32xf32>
      %75 = vector.shape_cast %74 : vector<1x72x32xf32> to vector<72x32xf32>
      %76 = vector.broadcast %6 : vector<1x32xf32> to vector<72x32xf32>
      %77 = arith.mulf %75, %76 : vector<72x32xf32>
      %78 = arith.addf %71, %77 : vector<72x32xf32>
      %c56_i32 = arith.constant 56 : i32
      %79 = arith.addi %c56_i32, %30 : i32
      %c0_46 = arith.constant 0 : index
      %80 = arith.index_cast %79 : i32 to index
      %c0_47 = arith.constant 0 : index
      %81 = vector.load %arg1[%c0_46, %80, %c0_47] : memref<2x496x32xf32, #tpu.memory_space<vmem>>, vector<1x72x32xf32>
      %82 = vector.shape_cast %81 : vector<1x72x32xf32> to vector<72x32xf32>
      %83 = vector.broadcast %7 : vector<1x32xf32> to vector<72x32xf32>
      %84 = arith.mulf %82, %83 : vector<72x32xf32>
      %85 = arith.addf %78, %84 : vector<72x32xf32>
      %c57_i32 = arith.constant 57 : i32
      %86 = arith.addi %c57_i32, %30 : i32
      %c0_48 = arith.constant 0 : index
      %87 = arith.index_cast %86 : i32 to index
      %c0_49 = arith.constant 0 : index
      %88 = vector.load %arg1[%c0_48, %87, %c0_49] : memref<2x496x32xf32, #tpu.memory_space<vmem>>, vector<1x72x32xf32>
      %89 = vector.shape_cast %88 : vector<1x72x32xf32> to vector<72x32xf32>
      %90 = vector.broadcast %8 : vector<1x32xf32> to vector<72x32xf32>
      %91 = arith.mulf %89, %90 : vector<72x32xf32>
      %92 = arith.addf %85, %91 : vector<72x32xf32>
      %93 = vector.broadcast %9 : vector<1x32xf32> to vector<72x32xf32>
      %94 = arith.addf %92, %93 : vector<72x32xf32>
      %cst_50 = arith.constant 0.000000e+00 : f32
      %95 = vector.broadcast %cst_50 : f32 to vector<72x32xf32>
      %96 = arith.maximumf %94, %95 : vector<72x32xf32>
      %97 = arith.index_cast %30 : i32 to index
      %c0_51 = arith.constant 0 : index
      %98 = vector.load %arg6[%97, %c0_51] : memref<432x32xf32, #tpu.memory_space<vmem>>, vector<72x32xf32>
      %99 = arith.mulf %96, %98 : vector<72x32xf32>
      %c32_i32_52 = arith.constant 32 : i32
      %100 = arith.addi %c32_i32_52, %30 : i32
      %101 = arith.index_cast %100 : i32 to index
      %c0_53 = arith.constant 0 : index
      %102 = vector.load %arg8[%101, %c0_53] : memref<496x32xf32, #tpu.memory_space<vmem>>, vector<72x32xf32>
      tpu.vector_store %arg8[%101, %c0_53], %99 {strides = array<i32>} : memref<496x32xf32, #tpu.memory_space<vmem>>, vector<72x32xf32>,
    }
    %c6_i32_17 = arith.constant 6 : i32
    %c0_i32_18 = arith.constant 0 : i32
    %c6_i32_19 = arith.constant 6 : i32
    %24 = arith.addi %c0_i32_18, %c6_i32_19 : i32
    %c1_i32_20 = arith.constant 1 : i32
    scf.for %arg9 = %c0_i32_18 to %24 step %c1_i32_20  : i32 {
      %c1_i32_30 = arith.constant 1 : i32
      %27 = arith.muli %arg9, %c1_i32_30 : i32
      %c0_i32_31 = arith.constant 0 : i32
      %28 = arith.addi %c0_i32_31, %27 : i32
      %c72_i32 = arith.constant 72 : i32
      %29 = arith.muli %28, %c72_i32 : i32
      %30 = tpu.assume_multiple %29, 8 : i32
      %c7_i32 = arith.constant 7 : i32
      %31 = arith.addi %c7_i32, %30 : i32
      %32 = arith.index_cast %31 : i32 to index
      %c0_32 = arith.constant 0 : index
      %33 = vector.load %arg8[%32, %c0_32] : memref<496x32xf32, #tpu.memory_space<vmem>>, vector<72x32xf32>
      %c0_33 = arith.constant 0 : index
      %c0_34 = arith.constant 0 : index
      %c0_35 = arith.constant 0 : index
      %34 = vector.load %arg4[%c0_33, %c0_34, %c0_35] : memref<9x32x32xf32, #tpu.memory_space<vmem>>, vector<1x32x32xf32>
      %35 = vector.shape_cast %34 : vector<1x32x32xf32> to vector<32x32xf32>
      %cst_36 = arith.constant dense<0.000000e+00> : vector<72x32xf32>
      %36 = tpu.matmul %33, %35, %cst_36 {dimension_numbers = #tpu.dot_dimension_numbers<[1], [0], [0], [1], [0, 0, 1, 1], [], []>} : vector<72x32xf32>, vector<32x32xf32>, vector<72x32xf32> -> vector<72x32xf32>
      %c8_i32 = arith.constant 8 : i32
      %37 = arith.addi %c8_i32, %30 : i32
      %38 = arith.index_cast %37 : i32 to index
      %c0_37 = arith.constant 0 : index
      %39 = vector.load %arg8[%38, %c0_37] : memref<496x32xf32, #tpu.memory_space<vmem>>, vector<72x32xf32>
      %c1_38 = arith.constant 1 : index
      %c0_39 = arith.constant 0 : index
      %c0_40 = arith.constant 0 : index
      %40 = vector.load %arg4[%c1_38, %c0_39, %c0_40] : memref<9x32x32xf32, #tpu.memory_space<vmem>>, vector<1x32x32xf32>
      %41 = vector.shape_cast %40 : vector<1x32x32xf32> to vector<32x32xf32>
      %cst_41 = arith.constant dense<0.000000e+00> : vector<72x32xf32>
      %42 = tpu.matmul %39, %41, %cst_41 {dimension_numbers = #tpu.dot_dimension_numbers<[1], [0], [0], [1], [0, 0, 1, 1], [], []>} : vector<72x32xf32>, vector<32x32xf32>, vector<72x32xf32> -> vector<72x32xf32>
      %43 = arith.addf %36, %42 : vector<72x32xf32>
      %c9_i32 = arith.constant 9 : i32
      %44 = arith.addi %c9_i32, %30 : i32
      %45 = arith.index_cast %44 : i32 to index
      %c0_42 = arith.constant 0 : index
      %46 = vector.load %arg8[%45, %c0_42] : memref<496x32xf32, #tpu.memory_space<vmem>>, vector<72x32xf32>
      %c2_43 = arith.constant 2 : index
      %c0_44 = arith.constant 0 : index
      %c0_45 = arith.constant 0 : index
      %47 = vector.load %arg4[%c2_43, %c0_44, %c0_45] : memref<9x32x32xf32, #tpu.memory_space<vmem>>, vector<1x32x32xf32>
      %48 = vector.shape_cast %47 : vector<1x32x32xf32> to vector<32x32xf32>
      %cst_46 = arith.constant dense<0.000000e+00> : vector<72x32xf32>
      %49 = tpu.matmul %46, %48, %cst_46 {dimension_numbers = #tpu.dot_dimension_numbers<[1], [0], [0], [1], [0, 0, 1, 1], [], []>} : vector<72x32xf32>, vector<32x32xf32>, vector<72x32xf32> -> vector<72x32xf32>
      %50 = arith.addf %43, %49 : vector<72x32xf32>
      %c31_i32 = arith.constant 31 : i32
      %51 = arith.addi %c31_i32, %30 : i32
      %52 = arith.index_cast %51 : i32 to index
      %c0_47 = arith.constant 0 : index
      %53 = vector.load %arg8[%52, %c0_47] : memref<496x32xf32, #tpu.memory_space<vmem>>, vector<72x32xf32>
      %c3_48 = arith.constant 3 : index
      %c0_49 = arith.constant 0 : index
      %c0_50 = arith.constant 0 : index
      %54 = vector.load %arg4[%c3_48, %c0_49, %c0_50] : memref<9x32x32xf32, #tpu.memory_space<vmem>>, vector<1x32x32xf32>
      %55 = vector.shape_cast %54 : vector<1x32x32xf32> to vector<32x32xf32>
      %cst_51 = arith.constant dense<0.000000e+00> : vector<72x32xf32>
      %56 = tpu.matmul %53, %55, %cst_51 {dimension_numbers = #tpu.dot_dimension_numbers<[1], [0], [0], [1], [0, 0, 1, 1], [], []>} : vector<72x32xf32>, vector<32x32xf32>, vector<72x32xf32> -> vector<72x32xf32>
      %57 = arith.addf %50, %56 : vector<72x32xf32>
      %c32_i32 = arith.constant 32 : i32
      %58 = arith.addi %c32_i32, %30 : i32
      %59 = arith.index_cast %58 : i32 to index
      %c0_52 = arith.constant 0 : index
      %60 = vector.load %arg8[%59, %c0_52] : memref<496x32xf32, #tpu.memory_space<vmem>>, vector<72x32xf32>
      %c4_53 = arith.constant 4 : index
      %c0_54 = arith.constant 0 : index
      %c0_55 = arith.constant 0 : index
      %61 = vector.load %arg4[%c4_53, %c0_54, %c0_55] : memref<9x32x32xf32, #tpu.memory_space<vmem>>, vector<1x32x32xf32>
      %62 = vector.shape_cast %61 : vector<1x32x32xf32> to vector<32x32xf32>
      %cst_56 = arith.constant dense<0.000000e+00> : vector<72x32xf32>
      %63 = tpu.matmul %60, %62, %cst_56 {dimension_numbers = #tpu.dot_dimension_numbers<[1], [0], [0], [1], [0, 0, 1, 1], [], []>} : vector<72x32xf32>, vector<32x32xf32>, vector<72x32xf32> -> vector<72x32xf32>
      %64 = arith.addf %57, %63 : vector<72x32xf32>
      %c33_i32 = arith.constant 33 : i32
      %65 = arith.addi %c33_i32, %30 : i32
      %66 = arith.index_cast %65 : i32 to index
      %c0_57 = arith.constant 0 : index
      %67 = vector.load %arg8[%66, %c0_57] : memref<496x32xf32, #tpu.memory_space<vmem>>, vector<72x32xf32>
      %c5_58 = arith.constant 5 : index
      %c0_59 = arith.constant 0 : index
      %c0_60 = arith.constant 0 : index
      %68 = vector.load %arg4[%c5_58, %c0_59, %c0_60] : memref<9x32x32xf32, #tpu.memory_space<vmem>>, vector<1x32x32xf32>
      %69 = vector.shape_cast %68 : vector<1x32x32xf32> to vector<32x32xf32>
      %cst_61 = arith.constant dense<0.000000e+00> : vector<72x32xf32>
      %70 = tpu.matmul %67, %69, %cst_61 {dimension_numbers = #tpu.dot_dimension_numbers<[1], [0], [0], [1], [0, 0, 1, 1], [], []>} : vector<72x32xf32>, vector<32x32xf32>, vector<72x32xf32> -> vector<72x32xf32>
      %71 = arith.addf %64, %70 : vector<72x32xf32>
      %c55_i32 = arith.constant 55 : i32
      %72 = arith.addi %c55_i32, %30 : i32
      %73 = arith.index_cast %72 : i32 to index
      %c0_62 = arith.constant 0 : index
      %74 = vector.load %arg8[%73, %c0_62] : memref<496x32xf32, #tpu.memory_space<vmem>>, vector<72x32xf32>
      %c6_63 = arith.constant 6 : index
      %c0_64 = arith.constant 0 : index
      %c0_65 = arith.constant 0 : index
      %75 = vector.load %arg4[%c6_63, %c0_64, %c0_65] : memref<9x32x32xf32, #tpu.memory_space<vmem>>, vector<1x32x32xf32>
      %76 = vector.shape_cast %75 : vector<1x32x32xf32> to vector<32x32xf32>
      %cst_66 = arith.constant dense<0.000000e+00> : vector<72x32xf32>
      %77 = tpu.matmul %74, %76, %cst_66 {dimension_numbers = #tpu.dot_dimension_numbers<[1], [0], [0], [1], [0, 0, 1, 1], [], []>} : vector<72x32xf32>, vector<32x32xf32>, vector<72x32xf32> -> vector<72x32xf32>
      %78 = arith.addf %71, %77 : vector<72x32xf32>
      %c56_i32 = arith.constant 56 : i32
      %79 = arith.addi %c56_i32, %30 : i32
      %80 = arith.index_cast %79 : i32 to index
      %c0_67 = arith.constant 0 : index
      %81 = vector.load %arg8[%80, %c0_67] : memref<496x32xf32, #tpu.memory_space<vmem>>, vector<72x32xf32>
      %c7_68 = arith.constant 7 : index
      %c0_69 = arith.constant 0 : index
      %c0_70 = arith.constant 0 : index
      %82 = vector.load %arg4[%c7_68, %c0_69, %c0_70] : memref<9x32x32xf32, #tpu.memory_space<vmem>>, vector<1x32x32xf32>
      %83 = vector.shape_cast %82 : vector<1x32x32xf32> to vector<32x32xf32>
      %cst_71 = arith.constant dense<0.000000e+00> : vector<72x32xf32>
      %84 = tpu.matmul %81, %83, %cst_71 {dimension_numbers = #tpu.dot_dimension_numbers<[1], [0], [0], [1], [0, 0, 1, 1], [], []>} : vector<72x32xf32>, vector<32x32xf32>, vector<72x32xf32> -> vector<72x32xf32>
      %85 = arith.addf %78, %84 : vector<72x32xf32>
      %c57_i32 = arith.constant 57 : i32
      %86 = arith.addi %c57_i32, %30 : i32
      %87 = arith.index_cast %86 : i32 to index
      %c0_72 = arith.constant 0 : index
      %88 = vector.load %arg8[%87, %c0_72] : memref<496x32xf32, #tpu.memory_space<vmem>>, vector<72x32xf32>
      %c8_73 = arith.constant 8 : index
      %c0_74 = arith.constant 0 : index
      %c0_75 = arith.constant 0 : index
      %89 = vector.load %arg4[%c8_73, %c0_74, %c0_75] : memref<9x32x32xf32, #tpu.memory_space<vmem>>, vector<1x32x32xf32>
      %90 = vector.shape_cast %89 : vector<1x32x32xf32> to vector<32x32xf32>
      %cst_76 = arith.constant dense<0.000000e+00> : vector<72x32xf32>
      %91 = tpu.matmul %88, %90, %cst_76 {dimension_numbers = #tpu.dot_dimension_numbers<[1], [0], [0], [1], [0, 0, 1, 1], [], []>} : vector<72x32xf32>, vector<32x32xf32>, vector<72x32xf32> -> vector<72x32xf32>
      %92 = arith.addf %85, %91 : vector<72x32xf32>
      %93 = vector.broadcast %10 : vector<1x32xf32> to vector<72x32xf32>
      %94 = arith.addf %92, %93 : vector<72x32xf32>
      %95 = arith.mulf %94, %94 : vector<72x32xf32>
      %cst_77 = arith.constant dense<0.000000e+00> : vector<72x32xf32>
      %96 = tpu.matmul %95, %18, %cst_77 {dimension_numbers = #tpu.dot_dimension_numbers<[1], [0], [0], [1], [0, 0, 1, 1], [], []>} : vector<72x32xf32>, vector<32x32xf32>, vector<72x32xf32> -> vector<72x32xf32>
      %cst_78 = arith.constant 2.000000e-05 : f32
      %97 = vector.broadcast %cst_78 : f32 to vector<72x32xf32>
      %98 = arith.mulf %97, %96 : vector<72x32xf32>
      %cst_79 = arith.constant 1.000000e+00 : f32
      %99 = vector.broadcast %cst_79 : f32 to vector<72x32xf32>
      %100 = arith.addf %99, %98 : vector<72x32xf32>
      %101 = math.log %100 : vector<72x32xf32>
      %cst_80 = arith.constant -7.500000e-01 : f32
      %102 = vector.broadcast %cst_80 : f32 to vector<72x32xf32>
      %103 = arith.mulf %102, %101 : vector<72x32xf32>
      %104 = math.exp %103 : vector<72x32xf32>
      %105 = arith.mulf %94, %104 : vector<72x32xf32>
      %c0_81 = arith.constant 0 : index
      %106 = arith.index_cast %30 : i32 to index
      %c0_82 = arith.constant 0 : index
      %107 = vector.load %arg7[%c0_81, %106, %c0_82] : memref<2x432x32xf32, #tpu.memory_space<vmem>>, vector<1x72x32xf32>
      %108 = vector.shape_cast %107 : vector<1x72x32xf32> to vector<72x32xf32>
      %109 = vector.shape_cast %105 : vector<72x32xf32> to vector<1x72x32xf32>
      tpu.vector_store %arg7[%c0_81, %106, %c0_82], %109 {strides = array<i32>} : memref<2x432x32xf32, #tpu.memory_space<vmem>>, vector<1x72x32xf32>,
    }
    %c6_i32_21 = arith.constant 6 : i32
    %c0_i32_22 = arith.constant 0 : i32
    %c6_i32_23 = arith.constant 6 : i32
    %25 = arith.addi %c0_i32_22, %c6_i32_23 : i32
    %c1_i32_24 = arith.constant 1 : i32
    scf.for %arg9 = %c0_i32_22 to %25 step %c1_i32_24  : i32 {
      %c1_i32_30 = arith.constant 1 : i32
      %27 = arith.muli %arg9, %c1_i32_30 : i32
      %c0_i32_31 = arith.constant 0 : i32
      %28 = arith.addi %c0_i32_31, %27 : i32
      %c72_i32 = arith.constant 72 : i32
      %29 = arith.muli %28, %c72_i32 : i32
      %30 = tpu.assume_multiple %29, 8 : i32
      %c7_i32 = arith.constant 7 : i32
      %31 = arith.addi %c7_i32, %30 : i32
      %c1_32 = arith.constant 1 : index
      %32 = arith.index_cast %31 : i32 to index
      %c0_33 = arith.constant 0 : index
      %33 = vector.load %arg1[%c1_32, %32, %c0_33] : memref<2x496x32xf32, #tpu.memory_space<vmem>>, vector<1x72x32xf32>
      %34 = vector.shape_cast %33 : vector<1x72x32xf32> to vector<72x32xf32>
      %35 = vector.broadcast %0 : vector<1x32xf32> to vector<72x32xf32>
      %36 = arith.mulf %34, %35 : vector<72x32xf32>
      %c8_i32 = arith.constant 8 : i32
      %37 = arith.addi %c8_i32, %30 : i32
      %c1_34 = arith.constant 1 : index
      %38 = arith.index_cast %37 : i32 to index
      %c0_35 = arith.constant 0 : index
      %39 = vector.load %arg1[%c1_34, %38, %c0_35] : memref<2x496x32xf32, #tpu.memory_space<vmem>>, vector<1x72x32xf32>
      %40 = vector.shape_cast %39 : vector<1x72x32xf32> to vector<72x32xf32>
      %41 = vector.broadcast %1 : vector<1x32xf32> to vector<72x32xf32>
      %42 = arith.mulf %40, %41 : vector<72x32xf32>
      %43 = arith.addf %36, %42 : vector<72x32xf32>
      %c9_i32 = arith.constant 9 : i32
      %44 = arith.addi %c9_i32, %30 : i32
      %c1_36 = arith.constant 1 : index
      %45 = arith.index_cast %44 : i32 to index
      %c0_37 = arith.constant 0 : index
      %46 = vector.load %arg1[%c1_36, %45, %c0_37] : memref<2x496x32xf32, #tpu.memory_space<vmem>>, vector<1x72x32xf32>
      %47 = vector.shape_cast %46 : vector<1x72x32xf32> to vector<72x32xf32>
      %48 = vector.broadcast %2 : vector<1x32xf32> to vector<72x32xf32>
      %49 = arith.mulf %47, %48 : vector<72x32xf32>
      %50 = arith.addf %43, %49 : vector<72x32xf32>
      %c31_i32 = arith.constant 31 : i32
      %51 = arith.addi %c31_i32, %30 : i32
      %c1_38 = arith.constant 1 : index
      %52 = arith.index_cast %51 : i32 to index
      %c0_39 = arith.constant 0 : index
      %53 = vector.load %arg1[%c1_38, %52, %c0_39] : memref<2x496x32xf32, #tpu.memory_space<vmem>>, vector<1x72x32xf32>
      %54 = vector.shape_cast %53 : vector<1x72x32xf32> to vector<72x32xf32>
      %55 = vector.broadcast %3 : vector<1x32xf32> to vector<72x32xf32>
      %56 = arith.mulf %54, %55 : vector<72x32xf32>
      %57 = arith.addf %50, %56 : vector<72x32xf32>
      %c32_i32 = arith.constant 32 : i32
      %58 = arith.addi %c32_i32, %30 : i32
      %c1_40 = arith.constant 1 : index
      %59 = arith.index_cast %58 : i32 to index
      %c0_41 = arith.constant 0 : index
      %60 = vector.load %arg1[%c1_40, %59, %c0_41] : memref<2x496x32xf32, #tpu.memory_space<vmem>>, vector<1x72x32xf32>
      %61 = vector.shape_cast %60 : vector<1x72x32xf32> to vector<72x32xf32>
      %62 = vector.broadcast %4 : vector<1x32xf32> to vector<72x32xf32>
      %63 = arith.mulf %61, %62 : vector<72x32xf32>
      %64 = arith.addf %57, %63 : vector<72x32xf32>
      %c33_i32 = arith.constant 33 : i32
      %65 = arith.addi %c33_i32, %30 : i32
      %c1_42 = arith.constant 1 : index
      %66 = arith.index_cast %65 : i32 to index
      %c0_43 = arith.constant 0 : index
      %67 = vector.load %arg1[%c1_42, %66, %c0_43] : memref<2x496x32xf32, #tpu.memory_space<vmem>>, vector<1x72x32xf32>
      %68 = vector.shape_cast %67 : vector<1x72x32xf32> to vector<72x32xf32>
      %69 = vector.broadcast %5 : vector<1x32xf32> to vector<72x32xf32>
      %70 = arith.mulf %68, %69 : vector<72x32xf32>
      %71 = arith.addf %64, %70 : vector<72x32xf32>
      %c55_i32 = arith.constant 55 : i32
      %72 = arith.addi %c55_i32, %30 : i32
      %c1_44 = arith.constant 1 : index
      %73 = arith.index_cast %72 : i32 to index
      %c0_45 = arith.constant 0 : index
      %74 = vector.load %arg1[%c1_44, %73, %c0_45] : memref<2x496x32xf32, #tpu.memory_space<vmem>>, vector<1x72x32xf32>
      %75 = vector.shape_cast %74 : vector<1x72x32xf32> to vector<72x32xf32>
      %76 = vector.broadcast %6 : vector<1x32xf32> to vector<72x32xf32>
      %77 = arith.mulf %75, %76 : vector<72x32xf32>
      %78 = arith.addf %71, %77 : vector<72x32xf32>
      %c56_i32 = arith.constant 56 : i32
      %79 = arith.addi %c56_i32, %30 : i32
      %c1_46 = arith.constant 1 : index
      %80 = arith.index_cast %79 : i32 to index
      %c0_47 = arith.constant 0 : index
      %81 = vector.load %arg1[%c1_46, %80, %c0_47] : memref<2x496x32xf32, #tpu.memory_space<vmem>>, vector<1x72x32xf32>
      %82 = vector.shape_cast %81 : vector<1x72x32xf32> to vector<72x32xf32>
      %83 = vector.broadcast %7 : vector<1x32xf32> to vector<72x32xf32>
      %84 = arith.mulf %82, %83 : vector<72x32xf32>
      %85 = arith.addf %78, %84 : vector<72x32xf32>
      %c57_i32 = arith.constant 57 : i32
      %86 = arith.addi %c57_i32, %30 : i32
      %c1_48 = arith.constant 1 : index
      %87 = arith.index_cast %86 : i32 to index
      %c0_49 = arith.constant 0 : index
      %88 = vector.load %arg1[%c1_48, %87, %c0_49] : memref<2x496x32xf32, #tpu.memory_space<vmem>>, vector<1x72x32xf32>
      %89 = vector.shape_cast %88 : vector<1x72x32xf32> to vector<72x32xf32>
      %90 = vector.broadcast %8 : vector<1x32xf32> to vector<72x32xf32>
      %91 = arith.mulf %89, %90 : vector<72x32xf32>
      %92 = arith.addf %85, %91 : vector<72x32xf32>
      %93 = vector.broadcast %9 : vector<1x32xf32> to vector<72x32xf32>
      %94 = arith.addf %92, %93 : vector<72x32xf32>
      %cst_50 = arith.constant 0.000000e+00 : f32
      %95 = vector.broadcast %cst_50 : f32 to vector<72x32xf32>
      %96 = arith.maximumf %94, %95 : vector<72x32xf32>
      %97 = arith.index_cast %30 : i32 to index
      %c0_51 = arith.constant 0 : index
      %98 = vector.load %arg6[%97, %c0_51] : memref<432x32xf32, #tpu.memory_space<vmem>>, vector<72x32xf32>
      %99 = arith.mulf %96, %98 : vector<72x32xf32>
      %c32_i32_52 = arith.constant 32 : i32
      %100 = arith.addi %c32_i32_52, %30 : i32
      %101 = arith.index_cast %100 : i32 to index
      %c0_53 = arith.constant 0 : index
      %102 = vector.load %arg8[%101, %c0_53] : memref<496x32xf32, #tpu.memory_space<vmem>>, vector<72x32xf32>
      tpu.vector_store %arg8[%101, %c0_53], %99 {strides = array<i32>} : memref<496x32xf32, #tpu.memory_space<vmem>>, vector<72x32xf32>,
    }
    %c6_i32_25 = arith.constant 6 : i32
    %c0_i32_26 = arith.constant 0 : i32
    %c6_i32_27 = arith.constant 6 : i32
    %26 = arith.addi %c0_i32_26, %c6_i32_27 : i32
    %c1_i32_28 = arith.constant 1 : i32
    scf.for %arg9 = %c0_i32_26 to %26 step %c1_i32_28  : i32 {
      %c1_i32_30 = arith.constant 1 : i32
      %27 = arith.muli %arg9, %c1_i32_30 : i32
      %c0_i32_31 = arith.constant 0 : i32
      %28 = arith.addi %c0_i32_31, %27 : i32
      %c72_i32 = arith.constant 72 : i32
      %29 = arith.muli %28, %c72_i32 : i32
      %30 = tpu.assume_multiple %29, 8 : i32
      %c7_i32 = arith.constant 7 : i32
      %31 = arith.addi %c7_i32, %30 : i32
      %32 = arith.index_cast %31 : i32 to index
      %c0_32 = arith.constant 0 : index
      %33 = vector.load %arg8[%32, %c0_32] : memref<496x32xf32, #tpu.memory_space<vmem>>, vector<72x32xf32>
      %c0_33 = arith.constant 0 : index
      %c0_34 = arith.constant 0 : index
      %c0_35 = arith.constant 0 : index
      %34 = vector.load %arg4[%c0_33, %c0_34, %c0_35] : memref<9x32x32xf32, #tpu.memory_space<vmem>>, vector<1x32x32xf32>
      %35 = vector.shape_cast %34 : vector<1x32x32xf32> to vector<32x32xf32>
      %cst_36 = arith.constant dense<0.000000e+00> : vector<72x32xf32>
      %36 = tpu.matmul %33, %35, %cst_36 {dimension_numbers = #tpu.dot_dimension_numbers<[1], [0], [0], [1], [0, 0, 1, 1], [], []>} : vector<72x32xf32>, vector<32x32xf32>, vector<72x32xf32> -> vector<72x32xf32>
      %c8_i32 = arith.constant 8 : i32
      %37 = arith.addi %c8_i32, %30 : i32
      %38 = arith.index_cast %37 : i32 to index
      %c0_37 = arith.constant 0 : index
      %39 = vector.load %arg8[%38, %c0_37] : memref<496x32xf32, #tpu.memory_space<vmem>>, vector<72x32xf32>
      %c1_38 = arith.constant 1 : index
      %c0_39 = arith.constant 0 : index
      %c0_40 = arith.constant 0 : index
      %40 = vector.load %arg4[%c1_38, %c0_39, %c0_40] : memref<9x32x32xf32, #tpu.memory_space<vmem>>, vector<1x32x32xf32>
      %41 = vector.shape_cast %40 : vector<1x32x32xf32> to vector<32x32xf32>
      %cst_41 = arith.constant dense<0.000000e+00> : vector<72x32xf32>
      %42 = tpu.matmul %39, %41, %cst_41 {dimension_numbers = #tpu.dot_dimension_numbers<[1], [0], [0], [1], [0, 0, 1, 1], [], []>} : vector<72x32xf32>, vector<32x32xf32>, vector<72x32xf32> -> vector<72x32xf32>
      %43 = arith.addf %36, %42 : vector<72x32xf32>
      %c9_i32 = arith.constant 9 : i32
      %44 = arith.addi %c9_i32, %30 : i32
      %45 = arith.index_cast %44 : i32 to index
      %c0_42 = arith.constant 0 : index
      %46 = vector.load %arg8[%45, %c0_42] : memref<496x32xf32, #tpu.memory_space<vmem>>, vector<72x32xf32>
      %c2_43 = arith.constant 2 : index
      %c0_44 = arith.constant 0 : index
      %c0_45 = arith.constant 0 : index
      %47 = vector.load %arg4[%c2_43, %c0_44, %c0_45] : memref<9x32x32xf32, #tpu.memory_space<vmem>>, vector<1x32x32xf32>
      %48 = vector.shape_cast %47 : vector<1x32x32xf32> to vector<32x32xf32>
      %cst_46 = arith.constant dense<0.000000e+00> : vector<72x32xf32>
      %49 = tpu.matmul %46, %48, %cst_46 {dimension_numbers = #tpu.dot_dimension_numbers<[1], [0], [0], [1], [0, 0, 1, 1], [], []>} : vector<72x32xf32>, vector<32x32xf32>, vector<72x32xf32> -> vector<72x32xf32>
      %50 = arith.addf %43, %49 : vector<72x32xf32>
      %c31_i32 = arith.constant 31 : i32
      %51 = arith.addi %c31_i32, %30 : i32
      %52 = arith.index_cast %51 : i32 to index
      %c0_47 = arith.constant 0 : index
      %53 = vector.load %arg8[%52, %c0_47] : memref<496x32xf32, #tpu.memory_space<vmem>>, vector<72x32xf32>
      %c3_48 = arith.constant 3 : index
      %c0_49 = arith.constant 0 : index
      %c0_50 = arith.constant 0 : index
      %54 = vector.load %arg4[%c3_48, %c0_49, %c0_50] : memref<9x32x32xf32, #tpu.memory_space<vmem>>, vector<1x32x32xf32>
      %55 = vector.shape_cast %54 : vector<1x32x32xf32> to vector<32x32xf32>
      %cst_51 = arith.constant dense<0.000000e+00> : vector<72x32xf32>
      %56 = tpu.matmul %53, %55, %cst_51 {dimension_numbers = #tpu.dot_dimension_numbers<[1], [0], [0], [1], [0, 0, 1, 1], [], []>} : vector<72x32xf32>, vector<32x32xf32>, vector<72x32xf32> -> vector<72x32xf32>
      %57 = arith.addf %50, %56 : vector<72x32xf32>
      %c32_i32 = arith.constant 32 : i32
      %58 = arith.addi %c32_i32, %30 : i32
      %59 = arith.index_cast %58 : i32 to index
      %c0_52 = arith.constant 0 : index
      %60 = vector.load %arg8[%59, %c0_52] : memref<496x32xf32, #tpu.memory_space<vmem>>, vector<72x32xf32>
      %c4_53 = arith.constant 4 : index
      %c0_54 = arith.constant 0 : index
      %c0_55 = arith.constant 0 : index
      %61 = vector.load %arg4[%c4_53, %c0_54, %c0_55] : memref<9x32x32xf32, #tpu.memory_space<vmem>>, vector<1x32x32xf32>
      %62 = vector.shape_cast %61 : vector<1x32x32xf32> to vector<32x32xf32>
      %cst_56 = arith.constant dense<0.000000e+00> : vector<72x32xf32>
      %63 = tpu.matmul %60, %62, %cst_56 {dimension_numbers = #tpu.dot_dimension_numbers<[1], [0], [0], [1], [0, 0, 1, 1], [], []>} : vector<72x32xf32>, vector<32x32xf32>, vector<72x32xf32> -> vector<72x32xf32>
      %64 = arith.addf %57, %63 : vector<72x32xf32>
      %c33_i32 = arith.constant 33 : i32
      %65 = arith.addi %c33_i32, %30 : i32
      %66 = arith.index_cast %65 : i32 to index
      %c0_57 = arith.constant 0 : index
      %67 = vector.load %arg8[%66, %c0_57] : memref<496x32xf32, #tpu.memory_space<vmem>>, vector<72x32xf32>
      %c5_58 = arith.constant 5 : index
      %c0_59 = arith.constant 0 : index
      %c0_60 = arith.constant 0 : index
      %68 = vector.load %arg4[%c5_58, %c0_59, %c0_60] : memref<9x32x32xf32, #tpu.memory_space<vmem>>, vector<1x32x32xf32>
      %69 = vector.shape_cast %68 : vector<1x32x32xf32> to vector<32x32xf32>
      %cst_61 = arith.constant dense<0.000000e+00> : vector<72x32xf32>
      %70 = tpu.matmul %67, %69, %cst_61 {dimension_numbers = #tpu.dot_dimension_numbers<[1], [0], [0], [1], [0, 0, 1, 1], [], []>} : vector<72x32xf32>, vector<32x32xf32>, vector<72x32xf32> -> vector<72x32xf32>
      %71 = arith.addf %64, %70 : vector<72x32xf32>
      %c55_i32 = arith.constant 55 : i32
      %72 = arith.addi %c55_i32, %30 : i32
      %73 = arith.index_cast %72 : i32 to index
      %c0_62 = arith.constant 0 : index
      %74 = vector.load %arg8[%73, %c0_62] : memref<496x32xf32, #tpu.memory_space<vmem>>, vector<72x32xf32>
      %c6_63 = arith.constant 6 : index
      %c0_64 = arith.constant 0 : index
      %c0_65 = arith.constant 0 : index
      %75 = vector.load %arg4[%c6_63, %c0_64, %c0_65] : memref<9x32x32xf32, #tpu.memory_space<vmem>>, vector<1x32x32xf32>
      %76 = vector.shape_cast %75 : vector<1x32x32xf32> to vector<32x32xf32>
      %cst_66 = arith.constant dense<0.000000e+00> : vector<72x32xf32>
      %77 = tpu.matmul %74, %76, %cst_66 {dimension_numbers = #tpu.dot_dimension_numbers<[1], [0], [0], [1], [0, 0, 1, 1], [], []>} : vector<72x32xf32>, vector<32x32xf32>, vector<72x32xf32> -> vector<72x32xf32>
      %78 = arith.addf %71, %77 : vector<72x32xf32>
      %c56_i32 = arith.constant 56 : i32
      %79 = arith.addi %c56_i32, %30 : i32
      %80 = arith.index_cast %79 : i32 to index
      %c0_67 = arith.constant 0 : index
      %81 = vector.load %arg8[%80, %c0_67] : memref<496x32xf32, #tpu.memory_space<vmem>>, vector<72x32xf32>
      %c7_68 = arith.constant 7 : index
      %c0_69 = arith.constant 0 : index
      %c0_70 = arith.constant 0 : index
      %82 = vector.load %arg4[%c7_68, %c0_69, %c0_70] : memref<9x32x32xf32, #tpu.memory_space<vmem>>, vector<1x32x32xf32>
      %83 = vector.shape_cast %82 : vector<1x32x32xf32> to vector<32x32xf32>
      %cst_71 = arith.constant dense<0.000000e+00> : vector<72x32xf32>
      %84 = tpu.matmul %81, %83, %cst_71 {dimension_numbers = #tpu.dot_dimension_numbers<[1], [0], [0], [1], [0, 0, 1, 1], [], []>} : vector<72x32xf32>, vector<32x32xf32>, vector<72x32xf32> -> vector<72x32xf32>
      %85 = arith.addf %78, %84 : vector<72x32xf32>
      %c57_i32 = arith.constant 57 : i32
      %86 = arith.addi %c57_i32, %30 : i32
      %87 = arith.index_cast %86 : i32 to index
      %c0_72 = arith.constant 0 : index
      %88 = vector.load %arg8[%87, %c0_72] : memref<496x32xf32, #tpu.memory_space<vmem>>, vector<72x32xf32>
      %c8_73 = arith.constant 8 : index
      %c0_74 = arith.constant 0 : index
      %c0_75 = arith.constant 0 : index
      %89 = vector.load %arg4[%c8_73, %c0_74, %c0_75] : memref<9x32x32xf32, #tpu.memory_space<vmem>>, vector<1x32x32xf32>
      %90 = vector.shape_cast %89 : vector<1x32x32xf32> to vector<32x32xf32>
      %cst_76 = arith.constant dense<0.000000e+00> : vector<72x32xf32>
      %91 = tpu.matmul %88, %90, %cst_76 {dimension_numbers = #tpu.dot_dimension_numbers<[1], [0], [0], [1], [0, 0, 1, 1], [], []>} : vector<72x32xf32>, vector<32x32xf32>, vector<72x32xf32> -> vector<72x32xf32>
      %92 = arith.addf %85, %91 : vector<72x32xf32>
      %93 = vector.broadcast %10 : vector<1x32xf32> to vector<72x32xf32>
      %94 = arith.addf %92, %93 : vector<72x32xf32>
      %95 = arith.mulf %94, %94 : vector<72x32xf32>
      %cst_77 = arith.constant dense<0.000000e+00> : vector<72x32xf32>
      %96 = tpu.matmul %95, %18, %cst_77 {dimension_numbers = #tpu.dot_dimension_numbers<[1], [0], [0], [1], [0, 0, 1, 1], [], []>} : vector<72x32xf32>, vector<32x32xf32>, vector<72x32xf32> -> vector<72x32xf32>
      %cst_78 = arith.constant 2.000000e-05 : f32
      %97 = vector.broadcast %cst_78 : f32 to vector<72x32xf32>
      %98 = arith.mulf %97, %96 : vector<72x32xf32>
      %cst_79 = arith.constant 1.000000e+00 : f32
      %99 = vector.broadcast %cst_79 : f32 to vector<72x32xf32>
      %100 = arith.addf %99, %98 : vector<72x32xf32>
      %101 = math.log %100 : vector<72x32xf32>
      %cst_80 = arith.constant -7.500000e-01 : f32
      %102 = vector.broadcast %cst_80 : f32 to vector<72x32xf32>
      %103 = arith.mulf %102, %101 : vector<72x32xf32>
      %104 = math.exp %103 : vector<72x32xf32>
      %105 = arith.mulf %94, %104 : vector<72x32xf32>
      %c1_81 = arith.constant 1 : index
      %106 = arith.index_cast %30 : i32 to index
      %c0_82 = arith.constant 0 : index
      %107 = vector.load %arg7[%c1_81, %106, %c0_82] : memref<2x432x32xf32, #tpu.memory_space<vmem>>, vector<1x72x32xf32>
      %108 = vector.shape_cast %107 : vector<1x72x32xf32> to vector<72x32xf32>
      %109 = vector.shape_cast %105 : vector<72x32xf32> to vector<1x72x32xf32>
      tpu.vector_store %arg7[%c1_81, %106, %c0_82], %109 {strides = array<i32>} : memref<2x432x32xf32, #tpu.memory_space<vmem>>, vector<1x72x32xf32>,
    }
    %c6_i32_29 = arith.constant 6 : i32
    return
  }
  func.func @transform_0(%arg0: i32) -> (i32, i32, i32) {
    %c0_i32 = arith.constant 0 : i32
    %c0_i32_0 = arith.constant 0 : i32
    %c0_i32_1 = arith.constant 0 : i32
    return %arg0, %c0_i32, %c0_i32_0 : i32, i32, i32
  }
  func.func @transform_1(%arg0: i32) -> (i32, i32) {
    %c0_i32 = arith.constant 0 : i32
    %c0_i32_0 = arith.constant 0 : i32
    %c0_i32_1 = arith.constant 0 : i32
    return %c0_i32, %c0_i32_0 : i32, i32
  }
  func.func @transform_2(%arg0: i32) -> (i32, i32) {
    %c0_i32 = arith.constant 0 : i32
    %c0_i32_0 = arith.constant 0 : i32
    %c0_i32_1 = arith.constant 0 : i32
    return %c0_i32, %c0_i32_0 : i32, i32
  }
  func.func @transform_3(%arg0: i32) -> (i32, i32, i32) {
    %c0_i32 = arith.constant 0 : i32
    %c0_i32_0 = arith.constant 0 : i32
    %c0_i32_1 = arith.constant 0 : i32
    %c0_i32_2 = arith.constant 0 : i32
    return %c0_i32, %c0_i32_0, %c0_i32_1 : i32, i32, i32
  }
  func.func @transform_4(%arg0: i32) -> (i32, i32) {
    %c0_i32 = arith.constant 0 : i32
    %c0_i32_0 = arith.constant 0 : i32
    %c0_i32_1 = arith.constant 0 : i32
    return %c0_i32, %c0_i32_0 : i32, i32
  }
  func.func @transform_5(%arg0: i32) -> (i32, i32) {
    %c0_i32 = arith.constant 0 : i32
    %c0_i32_0 = arith.constant 0 : i32
    %c0_i32_1 = arith.constant 0 : i32
    return %c0_i32, %c0_i32_0 : i32, i32
  }
  func.func @transform_6(%arg0: i32) -> (i32, i32, i32) {
    %c0_i32 = arith.constant 0 : i32
    %c0_i32_0 = arith.constant 0 : i32
    %c0_i32_1 = arith.constant 0 : i32
    return %arg0, %c0_i32, %c0_i32_0 : i32, i32, i32
  }
}

</mosaic_0001>

<bundles_post_ra>
// kernel: cnn_model_forward.1
= control target key start
LH: loop header
LB: loop body
LE: loop exit
PB: predicated region body
PF: predicated region fallthrough
CT: control target
= control target key end

     0   :  { %v34_v0 = vlaneseq  ;;  %vm69_vm0 = vcmask 261120   ;;  %v3685_v14 = vmov 0.0   ;;  %s5185_s0 = inlined_call_operand.vmem [shape: f32[2,496,32], index: 0, kind: input, shape index: {}]   ;;  %s5186_s1 = inlined_call_operand.vmem [shape: f32[9,32], index: 1, kind: input, shape index: {}]   ;;  %s5187_s3 = inlined_call_operand.vmem [shape: f32[9,32,32], index: 3, kind: input, shape index: {}]   ;;  %s5188_s5 = inlined_call_operand.vmem [shape: f32[432,32], index: 5, kind: input, shape index: {}]   ;;  %s5189_s6 = inlined_call_operand.vmem [shape: f32[2,432,32], index: 6, kind: output, shape index: {}]   ;;  %s5190_s2 = inlined_call_operand.vmem [shape: f32[1,32], index: 2, kind: input, shape index: {}]   ;;  %s5191_s4 = inlined_call_operand.vmem [shape: f32[1,32], index: 4, kind: input, shape index: {}]  }
   0x1   :  { %v3726_v1 = vld [vmem:[%s5186_s1] sm:$0x1]  ;;  %v3731_v2 = vld [vmem:[%s5186_s1 + $0x1] sm:$0x1]  ;;  %v3736_v3 = vld [vmem:[%s5186_s1 + $0x2] sm:$0x1] }
   0x2   :  { %5192 = vst [vmem:[#allocation3_spill] sm:$0xff] %v3726_v1  ;;  %v3741_v4 = vld [vmem:[%s5186_s1 + $0x3] sm:$0x1]  ;;  %v3746_v5 = vld [vmem:[%s5186_s1 + $0x4] sm:$0x1]  ;;  %v35_v12 = vshrl.u32 %v34_v0, 7 }
   0x3   :  { %5193 = vst [vmem:[#allocation4_spill] sm:$0xff] %v3731_v2  ;;  %v3751_v6 = vld [vmem:[%s5186_s1 + $0x5] sm:$0x1]  ;;  %v3756_v7 = vld [vmem:[%s5186_s1 + $0x6] sm:$0x1]  ;;  %v40_v13 = vand.u32 127, %v34_v0 }
   0x4   :  { %5194 = vst [vmem:[#allocation5_spill] sm:$0xff] %v3736_v3  ;;  %v3761_v8 = vld [vmem:[%s5186_s1 + $0x7] sm:$0x1]  ;;  %v3766_v9 = vld [vmem:[%s5186_s1 + $0x8] sm:$0x1]  ;;  %v36_v15 = vadd.s32 8, %v35_v12 }
   0x5   :  { %5195 = vst [vmem:[#allocation6_spill] sm:$0xff] %v3741_v4  ;;  %v3771_v10 = vld [vmem:[%s5190_s2] sm:$0x1]  ;;  %v37_v16 = vadd.s32 16, %v35_v12  ;;  %v38_v17 = vadd.s32 24, %v35_v12  ;;  %v41_v18 = vsub.s32 %v35_v12, %v40_v13  ;;  %s3798_s1 = smov 0  }
   0x6   :  { %5196 = vst [vmem:[#allocation7_spill] sm:$0xff] %v3746_v5  ;;  %v3776_v11 = vld [vmem:[%s5191_s4] sm:$0x1]  ;;  %v42_v19 = vsub.s32 %v36_v15, %v40_v13 }
   0x7   :  { %5197 = vst [vmem:[#allocation8_spill] sm:$0xff] %v3751_v6  ;;  %v43_v20 = vsub.s32 %v37_v16, %v40_v13  ;;  %v44_v21 = vsub.s32 %v38_v17, %v40_v13  ;;  %vm45_vm1 = vcmp.lt.s32.totalorder %v41_v18, 0  ;;  %v46_v22 = vsub.s32 0, %v41_v18 }
   0x8   :  { %5198 = vst [vmem:[#allocation9_spill] sm:$0xff] %v3756_v7  ;;  %vm48_vm2 = vcmp.lt.s32.totalorder %v42_v19, 0  ;;  %v49_v23 = vsub.s32 0, %v42_v19 }
   0x9   :  { %5199 = vst [vmem:[#allocation10_spill] sm:$0xff] %v3761_v8  ;;  %vm51_vm3 = vcmp.lt.s32.totalorder %v43_v20, 0  ;;  %v52_v24 = vsub.s32 0, %v43_v20  ;;  %v3784_v25 = vsel %vm45_vm1, %v46_v22, %v41_v18  ;;  %vm54_vm4 = vcmp.lt.s32.totalorder %v44_v21, 0 }
   0xa   :  { %70 = vst.msk [vmem:[#allocation2] sm:$0xff] %vm69_vm0, %v3685_v14  ;;  %v55_v26 = vsub.s32 0, %v44_v21  ;;  %v3787_v27 = vsel %vm48_vm2, %v49_v23, %v42_v19  ;;  %vm57_vm5 = vcmp.le.s32.totalorder %v3784_v25, 2 }
   0xb   :  { %71 = vst.msk [vmem:[#allocation2 + $0x8] sm:$0xff] %vm69_vm0, %v3685_v14  ;;  %v3789_v28 = vsel %vm51_vm3, %v52_v24, %v43_v20  ;;  %vm58_vm6 = vcmp.le.s32.totalorder %v3787_v27, 2 }
   0xc   :  { %72 = vst.msk [vmem:[#allocation2 + $0x10] sm:$0xff] %vm69_vm0, %v3685_v14  ;;  %v3793_v29 = vsel %vm54_vm4, %v55_v26, %v44_v21  ;;  %vm59_vm7 = vcmp.le.s32.totalorder %v3789_v28, 2 }
   0xd   :  { %73 = vst.msk [vmem:[#allocation2 + $0x18] sm:$0xff] %vm69_vm0, %v3685_v14  ;;  %vm60_vm8 = vcmp.le.s32.totalorder %v3793_v29, 2 }
   0xe   :  { %74 = vst.msk [vmem:[#allocation2 + $0x1d0] sm:$0xff] %vm69_vm0, %v3685_v14 }
   0xf   :  { %75 = vst.msk [vmem:[#allocation2 + $0x1d8] sm:$0xff] %vm69_vm0, %v3685_v14 }
  0x10   :  { %76 = vst.msk [vmem:[#allocation2 + $0x1e0] sm:$0xff] %vm69_vm0, %v3685_v14 }
  0x11   :  { %77 = vst.msk [vmem:[#allocation2 + $0x1e8] sm:$0xff] %vm69_vm0, %v3685_v14 }
  0x12 LB: > { %s3804_s2 = smul.u32 72, %s3671_s1  ;;  %v5200_v1 = vld [vmem:[#allocation3_spill] sm:$0xff]  ;;  %v5201_v2 = vld [vmem:[#allocation4_spill] sm:$0xff]  ;;  %v5202_v3 = vld [vmem:[#allocation5_spill] sm:$0xff]  ;;  %v3845_v46 = vperm.slane %v3766_v9, 0  ;;  %v3854_v51 = vperm.slane %v3771_v10, 0  ;;  %s3671_s1 = sphi %s3798_s1, %s83_s1  }
  0x13   : > { %v3807_v30 = vperm.slane %v5200_v1, 0  ;;  %v3810_v31 = vperm.slane %v5201_v2, 0  ;;  %v3813_v32 = vperm.slane %v5202_v3, 0  ;;  %v5203_v4 = vld [vmem:[#allocation6_spill] sm:$0xff]  ;;  %v5204_v5 = vld [vmem:[#allocation7_spill] sm:$0xff]  ;;  %v5205_v6 = vld [vmem:[#allocation8_spill] sm:$0xff] }
  0x14   : > { %v3816_v33 = vperm.slane %v5203_v4, 0  ;;  %v3819_v34 = vperm.slane %v5204_v5, 0  ;;  %s3825_s20 = scalar_lea.vmem %s5185_s0, %s3804_s2  ;;  %v3828_v35 = vperm.slane %v5205_v6, 0  ;;  %v5206_v7 = vld [vmem:[#allocation9_spill] sm:$0xff]  ;;  %v5207_v8 = vld [vmem:[#allocation10_spill] sm:$0xff]  ;;  %s3960_s23 = scalar_lea.vmem %s5188_s5, %s3804_s2 }
  0x15   : > { %v3831_v36 = vperm.slane %v5206_v7, 0  ;;  %v2927_v37 = vld [vmem:[%s3825_s20 + $0x7] sm:$0xff]  ;;  %v3837_v40 = vperm.slane %v5207_v8, 0  ;;  %v2954_v44 = vld [vmem:[%s3825_s20 + $0x1f] sm:$0xff]  ;;  %v3851_v50 = vld [vmem:[%s3825_s20 + $0x37] sm:$0xff]  ;;  %s3993_s24 = scalar_lea.vmem [#allocation2], %s3804_s2 }
  0x16   : > { %v2936_v38 = vld [vmem:[%s3825_s20 + $0x8] sm:$0xff]  ;;  %v97_v41 = vmul.f32 %v2927_v37, %v3807_v30  ;;  %v2963_v45 = vld [vmem:[%s3825_s20 + $0x20] sm:$0xff]  ;;  %v178_v47 = vmul.f32 %v2954_v44, %v3816_v33  ;;  %v3860_v55 = vld [vmem:[%s3825_s20 + $0x38] sm:$0xff]  ;;  %v100_v58 = vmul.f32 %v2954_v44, %v3807_v30  ;;  %v181_v2 = vmul.f32 %v3851_v50, %v3816_v33  ;;  %s83_s1 = sadd.s32 1, %s3671_s1  }
  0x17   : > { %v2945_v39 = vld [vmem:[%s3825_s20 + $0x9] sm:$0xff]  ;;  %v118_v42 = vmul.f32 %v2936_v38, %v3810_v31  ;;  %v208_v48 = vmul.f32 %v2963_v45, %v3819_v34  ;;  %v2972_v49 = vld [vmem:[%s3825_s20 + $0x21] sm:$0xff]  ;;  %v268_v54 = vmul.f32 %v3851_v50, %v3831_v36  ;;  %v3867_v59 = vmul.f32 %v3860_v55, %v3837_v40  ;;  %v3870_v60 = vld [vmem:[%s3825_s20 + $0x39] sm:$0xff]  ;;  %p80_p0 = scmp.ge.s32.totalorder %s83_s1, 6  }
  0x18   : > { %v148_v43 = vmul.f32 %v2945_v39, %v3813_v32  ;;  %v238_v53 = vmul.f32 %v2972_v49, %v3828_v35  ;;  %v2928_v56 = vld [vmem:[%s3825_s20 + $0xf] sm:$0xff]  ;;  %v121_v0 = vmul.f32 %v2963_v45, %v3810_v31  ;;  %v3878_v13 = vmul.f32 %v3870_v60, %v3845_v46  ;;  %v2955_v15 = vld [vmem:[%s3825_s20 + $0x27] sm:$0xff]  ;;  %v3889_v23 = vld [vmem:[%s3825_s20 + $0x3f] sm:$0xff]  ;;  %s4091_s25 = smov (%p80_p0), 0  }
  0x19   : > { %v127_v52 = vadd.f32 %v118_v42, %v97_v41  ;;  %v2937_v57 = vld [vmem:[%s3825_s20 + $0x10] sm:$0xff]  ;;  %v98_v61 = vmul.f32 %v2928_v56, %v3807_v30  ;;  %v2964_v16 = vld [vmem:[%s3825_s20 + $0x28] sm:$0xff]  ;;  %v151_v18 = vmul.f32 %v2972_v49, %v3813_v32  ;;  %v179_v20 = vmul.f32 %v2955_v15, %v3816_v33  ;;  %v3895_v38 = vld [vmem:[%s3825_s20 + $0x40] sm:$0xff] }
  0x1a   : > { %v119_v62 = vmul.f32 %v2937_v57, %v3810_v31  ;;  %v2946_v63 = vld [vmem:[%s3825_s20 + $0x11] sm:$0xff]  ;;  %v2973_v17 = vld [vmem:[%s3825_s20 + $0x29] sm:$0xff]  ;;  %v209_v21 = vmul.f32 %v2964_v16, %v3819_v34  ;;  %v269_v37 = vmul.f32 %v3889_v23, %v3831_v36  ;;  %v2947_v42 = vld [vmem:[%s3825_s20 + $0x19] sm:$0xff]  ;;  %v299_v45 = vmul.f32 %v3895_v38, %v3837_v40 }
  0x1b   : > { %v157_v12 = vadd.f32 %v148_v43, %v127_v52  ;;  %v149_v14 = vmul.f32 %v2946_v63, %v3813_v32  ;;  %v239_v22 = vmul.f32 %v2973_v17, %v3828_v35  ;;  %v2929_v24 = vld [vmem:[%s3825_s20 + $0x17] sm:$0xff]  ;;  %v130_v43 = vadd.f32 %v121_v0, %v100_v58  ;;  %v3903_v49 = vld [vmem:[%s3825_s20 + $0x41] sm:$0xff]  ;;  %v2956_v56 = vld [vmem:[%s3825_s20 + $0x2f] sm:$0xff] }
  0x1c   : > { %v128_v19 = vadd.f32 %v119_v62, %v98_v61  ;;  %v99_v39 = vmul.f32 %v2929_v24, %v3807_v30  ;;  %v2938_v41 = vld [vmem:[%s3825_s20 + $0x18] sm:$0xff]  ;;  %v150_v52 = vmul.f32 %v2947_v42, %v3813_v32  ;;  %v2965_v57 = vld [vmem:[%s3825_s20 + $0x30] sm:$0xff]  ;;  %v329_v62 = vmul.f32 %v3903_v49, %v3845_v46 }
  0x1d   : > { %v187_v26 = vadd.f32 %v178_v47, %v157_v12  ;;  %v120_v47 = vmul.f32 %v2938_v41, %v3810_v31  ;;  %v180_v58 = vmul.f32 %v2956_v56, %v3816_v33  ;;  %v210_v63 = vmul.f32 %v2965_v57, %v3819_v34  ;;  %v2974_v0 = vld [vmem:[%s3825_s20 + $0x31] sm:$0xff]  ;;  %v3915_v12 = vld [vmem:[%s3825_s20 + $0x47] sm:$0xff] }
  0x1e   : > { %v158_v44 = vadd.f32 %v149_v14, %v128_v19  ;;  %v240_v24 = vmul.f32 %v2974_v0, %v3828_v35  ;;  %v270_v41 = vmul.f32 %v3915_v12, %v3831_v36  ;;  %v160_v1 = vadd.f32 %v151_v18, %v130_v43  ;;  %v3951_v8 = vld [vmem:[%s3825_s20 + $0x51] sm:$0xff] }
  0x1f   : > { %v217_v61 = vadd.f32 %v208_v48, %v187_v26  ;;  %v129_v19 = vadd.f32 %v120_v47, %v99_v39  ;;  %v3921_v48 = vld [vmem:[%s3825_s20 + $0x48] sm:$0xff]  ;;  %v211_v3 = vmul.f32 %v3860_v55, %v3819_v34  ;;  %v241_v18 = vmul.f32 %v3870_v60, %v3828_v35 }
  0x20   : > { %v188_v14 = vadd.f32 %v179_v20, %v158_v44  ;;  %v3924_v26 = vld [vmem:[%s3825_s20 + $0x49] sm:$0xff]  ;;  %v300_v44 = vmul.f32 %v3921_v48, %v3837_v40  ;;  %v190_v4 = vadd.f32 %v181_v2, %v160_v1  ;;  %v122_v5 = vmul.f32 %v2964_v16, %v3810_v31 }
  0x21   : > { %v247_v42 = vadd.f32 %v238_v53, %v217_v61  ;;  %v159_v39 = vadd.f32 %v150_v52, %v129_v19  ;;  %v330_v53 = vmul.f32 %v3924_v26, %v3845_v46  ;;  %v3935_v47 = vld [vmem:[%s3825_s20 + $0x4f] sm:$0xff]  ;;  %v101_v19 = vmul.f32 %v2955_v15, %v3807_v30 }
  0x22   : > { %v218_v20 = vadd.f32 %v209_v21, %v188_v14  ;;  %v271_v43 = vmul.f32 %v3935_v47, %v3831_v36  ;;  %v3942_v14 = vld [vmem:[%s3825_s20 + $0x50] sm:$0xff]  ;;  %v220_v7 = vadd.f32 %v211_v3, %v190_v4  ;;  %v152_v2 = vmul.f32 %v2973_v17, %v3813_v32 }
  0x23   : > { %v277_v61 = vadd.f32 %v268_v54, %v247_v42  ;;  %v189_v52 = vadd.f32 %v180_v58, %v159_v39  ;;  %v301_v1 = vmul.f32 %v3942_v14, %v3837_v40  ;;  %v182_v58 = vmul.f32 %v3889_v23, %v3816_v33  ;;  %v368_v39 = vld [vmem:[%s3960_s23] sm:$0xff] }
  0x24   : > { %v248_v21 = vadd.f32 %v239_v22, %v218_v20  ;;  %v131_v22 = vadd.f32 %v122_v5, %v101_v19  ;;  %v250_v3 = vadd.f32 %v241_v18, %v220_v7  ;;  %v331_v4 = vmul.f32 %v3951_v8, %v3845_v46 }
  0x25   : > { %v307_v6 = vadd.f32 %v3867_v59, %v277_v61  ;;  %v219_v42 = vadd.f32 %v210_v63, %v189_v52  ;;  %v212_v59 = vmul.f32 %v3895_v38, %v3819_v34  ;;  %v102_v20 = vmul.f32 %v2956_v56, %v3807_v30 }
  0x26   : > { %v278_v54 = vadd.f32 %v269_v37, %v248_v21  ;;  %v161_v17 = vadd.f32 %v152_v2, %v131_v22  ;;  %v242_v37 = vmul.f32 %v3903_v49, %v3828_v35  ;;  %v280_v63 = vadd.f32 %v271_v43, %v250_v3  ;;  %v369_v22 = vld [vmem:[%s3960_s23 + $0x8] sm:$0xff] }
  0x27   : > { %v337_v15 = vadd.f32 %v3878_v13, %v307_v6  ;;  %v249_v5 = vadd.f32 %v240_v24, %v219_v42  ;;  %v3969_v6 = vld [vmem:[%s3825_s20 + $0x57] sm:$0xff]  ;;  %v123_v18 = vmul.f32 %v2965_v57, %v3810_v31  ;;  %v153_v19 = vmul.f32 %v2974_v0, %v3813_v32 }
  0x28   : > { %v308_v16 = vadd.f32 %v299_v45, %v278_v54  ;;  %v272_v7 = vmul.f32 %v3969_v6, %v3831_v36  ;;  %v191_v24 = vadd.f32 %v182_v58, %v161_v17  ;;  %v310_v52 = vadd.f32 %v301_v1, %v280_v63  ;;  %v3982_v42 = vld [vmem:[%s3825_s20 + $0x58] sm:$0xff] }
  0x29   : > { %v349_v13 = vadd.f32 %v3854_v51, %v337_v15  ;;  %v279_v45 = vadd.f32 %v270_v41, %v249_v5  ;;  %v183_v43 = vmul.f32 %v3915_v12, %v3816_v33  ;;  %v302_v1 = vmul.f32 %v3982_v42, %v3837_v40 }
  0x2a   : > { %v338_v61 = vadd.f32 %v329_v62, %v308_v16  ;;  %v221_v56 = vadd.f32 %v212_v59, %v191_v24  ;;  %v132_v62 = vadd.f32 %v123_v18, %v102_v20  ;;  %v340_v57 = vadd.f32 %v331_v4, %v310_v52  ;;  %v370_v20 = vld [vmem:[%s3960_s23 + $0x10] sm:$0xff] }
  0x2b   : > { %v358_v21 = vmax.f32 %v349_v13, 0.0  ;;  %v309_v54 = vadd.f32 %v300_v44, %v279_v45  ;;  %v213_v0 = vmul.f32 %v3921_v48, %v3819_v34  ;;  %v3990_v44 = vld [vmem:[%s3825_s20 + $0x59] sm:$0xff]  ;;  %v243_v5 = vmul.f32 %v3924_v26, %v3828_v35 }
  0x2c   : > { %v350_v2 = vadd.f32 %v3854_v51, %v338_v61  ;;  %v251_v3 = vadd.f32 %v242_v37, %v221_v56  ;;  %v162_v59 = vadd.f32 %v153_v19, %v132_v62  ;;  %v352_v4 = vadd.f32 %v3854_v51, %v340_v57  ;;  %v371_v37 = vld [vmem:[%s3960_s23 + $0x18] sm:$0xff] }
  0x2d   : > { %v377_v41 = vmul.f32 %v368_v39, %v358_v21  ;;  %v339_v15 = vadd.f32 %v330_v53, %v309_v54  ;;  %v332_v16 = vmul.f32 %v3990_v44, %v3845_v46  ;;  %v2986_v61 = vld [vmem:[%s3825_s20 + $0x5f] sm:$0xff]  ;;  %v103_v45 = vmul.f32 %v3851_v50, %v3807_v30 }
  0x2e   : > { %v359_v58 = vmax.f32 %v350_v2, 0.0  ;;  %v281_v13 = vadd.f32 %v272_v7, %v251_v3  ;;  %v192_v63 = vadd.f32 %v183_v43, %v162_v59  ;;  %v361_v39 = vmax.f32 %v352_v4, 0.0  ;;  %v2995_v2 = vld [vmem:[%s3825_s20 + $0x60] sm:$0xff] }
  0x2f   : > { %3008 = vst.msk [vmem:[%s3993_s24 + $0x20] sm:$0xff] %vm69_vm0, %v377_v41  ;;  %v351_v17 = vadd.f32 %v3854_v51, %v339_v15  ;;  %v124_v24 = vmul.f32 %v3860_v55, %v3810_v31  ;;  %v154_v18 = vmul.f32 %v3870_v60, %v3813_v32  ;;  %v273_v19 = vmul.f32 %v2986_v61, %v3831_v36  ;;  %v3004_v41 = vld [vmem:[%s3825_s20 + $0x61] sm:$0xff] }
  0x30   : > { %v378_v53 = vmul.f32 %v369_v22, %v359_v58  ;;  %v311_v52 = vadd.f32 %v302_v1, %v281_v13  ;;  %v222_v7 = vadd.f32 %v213_v0, %v192_v63  ;;  %v380_v43 = vmul.f32 %v371_v37, %v361_v39  ;;  %v2987_v15 = vld [vmem:[%s3825_s20 + $0x67] sm:$0xff] }
  0x31   : > { %v360_v21 = vmax.f32 %v351_v17, 0.0  ;;  %v133_v50 = vadd.f32 %v124_v24, %v103_v45  ;;  %v184_v54 = vmul.f32 %v3935_v47, %v3816_v33  ;;  %v303_v60 = vmul.f32 %v2995_v2, %v3837_v40  ;;  %v372_v4 = vld [vmem:[%s3960_s23 + $0x20] sm:$0xff]  ;;  %v3005_v39 = vld [vmem:[%s3825_s20 + $0x69] sm:$0xff] }
  0x32   : > { %3009 = vst.msk [vmem:[%s3993_s24 + $0x28] sm:$0xff] %vm69_vm0, %v378_v53  ;;  %v341_v56 = vadd.f32 %v332_v16, %v311_v52  ;;  %v252_v62 = vadd.f32 %v243_v5, %v222_v7  ;;  %v333_v22 = vmul.f32 %v3004_v41, %v3845_v46  ;;  %v214_v1 = vmul.f32 %v3942_v14, %v3819_v34  ;;  %v2996_v53 = vld [vmem:[%s3825_s20 + $0x68] sm:$0xff] }
  0x33   : > { %v379_v55 = vmul.f32 %v370_v20, %v360_v21  ;;  %3011 = vst.msk [vmem:[%s3993_s24 + $0x38] sm:$0xff] %vm69_vm0, %v380_v43  ;;  %v163_v57 = vadd.f32 %v154_v18, %v133_v50  ;;  %v104_v0 = vmul.f32 %v3889_v23, %v3807_v30  ;;  %v125_v3 = vmul.f32 %v3895_v38, %v3810_v31  ;;  %v2988_v24 = vld [vmem:[%s3825_s20 + $0x6f] sm:$0xff] }
  0x34   : > { %v353_v47 = vadd.f32 %v3854_v51, %v341_v56  ;;  %v282_v58 = vadd.f32 %v273_v19, %v252_v62  ;;  %v155_v59 = vmul.f32 %v3903_v49, %v3813_v32  ;;  %v244_v14 = vmul.f32 %v3951_v8, %v3828_v35  ;;  %v2997_v19 = vld [vmem:[%s3825_s20 + $0x70] sm:$0xff]  ;;  %v373_v50 = vld [vmem:[%s3960_s23 + $0x28] sm:$0xff] }
  0x35   : > { %3010 = vst.msk [vmem:[%s3993_s24 + $0x30] sm:$0xff] %vm69_vm0, %v379_v55  ;;  %v193_v16 = vadd.f32 %v184_v54, %v163_v57  ;;  %v134_v17 = vadd.f32 %v125_v3, %v104_v0  ;;  %v185_v37 = vmul.f32 %v3969_v6, %v3816_v33  ;;  %v274_v38 = vmul.f32 %v2987_v15, %v3831_v36 }
  0x36   : > { %v362_v23 = vmax.f32 %v353_v47, 0.0  ;;  %v312_v5 = vadd.f32 %v303_v60, %v282_v58  ;;  %v215_v49 = vmul.f32 %v3982_v42, %v3819_v34  ;;  %v105_v63 = vmul.f32 %v3915_v12, %v3807_v30 }
  0x37   : > { %v223_v13 = vadd.f32 %v214_v1, %v193_v16  ;;  %v164_v45 = vadd.f32 %v155_v59, %v134_v17  ;;  %v126_v18 = vmul.f32 %v3921_v48, %v3810_v31  ;;  %v304_v21 = vmul.f32 %v2996_v53, %v3837_v40  ;;  %v3006_v1 = vld [vmem:[%s3825_s20 + $0x71] sm:$0xff] }
  0x38   : > { %v381_v20 = vmul.f32 %v372_v4, %v362_v23  ;;  %v342_v8 = vadd.f32 %v333_v22, %v312_v5  ;;  %v245_v52 = vmul.f32 %v3990_v44, %v3828_v35  ;;  %v156_v42 = vmul.f32 %v3924_v26, %v3813_v32  ;;  %v2998_v59 = vld [vmem:[%s3825_s20 + $0x78] sm:$0xff]  ;;  %v374_v53 = vld [vmem:[%s3960_s23 + $0x30] sm:$0xff] }
  0x39   : > { %v253_v6 = vadd.f32 %v244_v14, %v223_v13  ;;  %v194_v7 = vadd.f32 %v185_v37, %v164_v45  ;;  %v135_v43 = vadd.f32 %v126_v18, %v105_v63  ;;  %v186_v48 = vmul.f32 %v2986_v61, %v3816_v33  ;;  %v2989_v61 = vld [vmem:[%s3825_s20 + $0x77] sm:$0xff] }
  0x3a   : > { %3012 = vst.msk [vmem:[%s3993_s24 + $0x40] sm:$0xff] %vm69_vm0, %v381_v20  ;;  %v354_v12 = vadd.f32 %v3854_v51, %v342_v8  ;;  %v334_v55 = vmul.f32 %v3005_v39, %v3845_v46  ;;  %v275_v44 = vmul.f32 %v2988_v24, %v3831_v36  ;;  %v216_v60 = vmul.f32 %v2995_v2, %v3819_v34  ;;  %v3007_v5 = vld [vmem:[%s3825_s20 + $0x79] sm:$0xff] }
  0x3b   : > { %v283_v54 = vadd.f32 %v274_v38, %v253_v6  ;;  %v224_v56 = vadd.f32 %v215_v49, %v194_v7  ;;  %v165_v62 = vadd.f32 %v156_v42, %v135_v43  ;;  %v305_v57 = vmul.f32 %v2997_v19, %v3837_v40  ;;  %v375_v45 = vld [vmem:[%s3960_s23 + $0x38] sm:$0xff] }
  0x3c   : > { %v363_v26 = vmax.f32 %v354_v12, 0.0  ;;  %v246_v15 = vmul.f32 %v3004_v41, %v3828_v35  ;;  %v335_v16 = vmul.f32 %v3006_v1, %v3845_v46  ;;  %v276_v14 = vmul.f32 %v2989_v61, %v3831_v36 }
  0x3d   : > { %v313_v22 = vadd.f32 %v304_v21, %v283_v54  ;;  %v254_v47 = vadd.f32 %v245_v52, %v224_v56  ;;  %v195_v58 = vadd.f32 %v186_v48, %v165_v62  ;;  %v306_v41 = vmul.f32 %v2998_v59, %v3837_v40  ;;  %v376_v52 = vld [vmem:[%s3960_s23 + $0x40] sm:$0xff] }
  0x3e   : > { %v382_v0 = vmul.f32 %v373_v50, %v363_v26  ;;  %v336_v63 = vmul.f32 %v3007_v5, %v3845_v46 }
  0x3f   : > { %v343_v3 = vadd.f32 %v334_v55, %v313_v22  ;;  %v284_v4 = vadd.f32 %v275_v44, %v254_v47  ;;  %v225_v2 = vadd.f32 %v216_v60, %v195_v58 }
  0x40   : > { %3013 = vst.msk [vmem:[%s3993_s24 + $0x48] sm:$0xff] %vm69_vm0, %v382_v0 }
  0x41   : > { %v355_v23 = vadd.f32 %v3854_v51, %v343_v3  ;;  %v314_v17 = vadd.f32 %v305_v57, %v284_v4  ;;  %v255_v37 = vadd.f32 %v246_v15, %v225_v2 }
  0x43   : > { %v364_v13 = vmax.f32 %v355_v23, 0.0  ;;  %v344_v38 = vadd.f32 %v335_v16, %v314_v17  ;;  %v285_v49 = vadd.f32 %v276_v14, %v255_v37 }
  0x45   : > { %v383_v20 = vmul.f32 %v374_v53, %v364_v13  ;;  %v356_v8 = vadd.f32 %v3854_v51, %v344_v38  ;;  %v315_v39 = vadd.f32 %v306_v41, %v285_v49 }
  0x47   : > { %3014 = vst.msk [vmem:[%s3993_s24 + $0x50] sm:$0xff] %vm69_vm0, %v383_v20  ;;  %v365_v24 = vmax.f32 %v356_v8, 0.0  ;;  %v345_v18 = vadd.f32 %v336_v63, %v315_v39 }
  0x49   : > { %v384_v6 = vmul.f32 %v375_v45, %v365_v24  ;;  %v357_v21 = vadd.f32 %v3854_v51, %v345_v18 }
  0x4b   : > { %3015 = vst.msk [vmem:[%s3993_s24 + $0x58] sm:$0xff] %vm69_vm0, %v384_v6  ;;  %v366_v42 = vmax.f32 %v357_v21, 0.0  ;;  %82 = sbr.rel (!%p80_p0) target bundleno = 18 (0x12), region = 130 }
  0x4d   : > { %v385_v12 = vmul.f32 %v376_v52, %v366_v42 }
  0x4f   : > { %3016 = vst.msk [vmem:[%s3993_s24 + $0x60] sm:$0xff] %vm69_vm0, %v385_v12 }
  0x50 LB: > { %v3038_v7 = vld [vmem:[%s5187_s3 + $0x38] sm:$0xff]  ;;  %v3037_v43 = vld [vmem:[%s5187_s3 + $0x30] sm:$0xff]  ;;  %v3036_v10 = vld [vmem:[%s5187_s3 + $0x28] sm:$0xff]  ;;  %s402_s14 = smul.u32 72, %s3675_s25  ;;  %s401_s25 = sadd.s32 1, %s3675_s25   ;;  %s3675_s25 = sphi %s4091_s25, %s401_s25  }
  0x51   : > { %v417_v19 = vld [vmem:[%s5187_s3 + $0x18] sm:$0xff]  ;;  %3530 = vmatpush.msra.mxu2 %v3038_v7  ;;  %v416_v9 = vld [vmem:[%s5187_s3 + $0x10] sm:$0xff]  ;;  %473 = vmatpush.msra.mxu0 %v3038_v7  ;;  %v415_v48 = vld [vmem:[%s5187_s3 + $0x8] sm:$0xff]  ;;  %p398_p1 = scmp.ge.s32.totalorder %s401_s25, 6  }
  0x52   : > { %3534 = vmatpush.msra.mxu3 %v417_v19  ;;  %544 = vmatpush.msra.mxu1 %v417_v19  ;;  %v3035_v50 = vld [vmem:[%s5187_s3 + $0x20] sm:$0xff]  ;;  %s4123_s1 = scalar_lea.vmem [#allocation2], %s402_s14  ;;  %v3069_v26 = vld [vmem:[%s5187_s3 + $0x58] sm:$0xff]  ;;  %v3068_v57 = vld [vmem:[%s5187_s3 + $0x50] sm:$0xff]  ;;  %s4476_s27 = scalar_lea.vmem %s5189_s6, %s402_s14 }
  0x53   : > { %3531 = vmatpush.msra.mxu2 %v3037_v43  ;;  %474 = vmatpush.msra.mxu0 %v3037_v43  ;;  %v414_v54 = vld [vmem:[%s5187_s3] sm:$0xff]  ;;  %v3091_v60 = vld [vmem:[%s5187_s3 + $0x78] sm:$0xff]  ;;  %v3090_v1 = vld [vmem:[%s5187_s3 + $0x70] sm:$0xff]  ;;  %s4508_s14 = smov (%p398_p1), 0  }
  0x54   : > { %3535 = vmatpush.msra.mxu3 %v416_v9  ;;  %545 = vmatpush.msra.mxu1 %v416_v9  ;;  %v3113_v22 = vld [vmem:[%s5187_s3 + $0x98] sm:$0xff]  ;;  %v3112_v61 = vld [vmem:[%s5187_s3 + $0x90] sm:$0xff]  ;;  %v3067_v0 = vld [vmem:[%s5187_s3 + $0x48] sm:$0xff] }
  0x55   : > { %3532 = vmatpush.msra.mxu2 %v3036_v10  ;;  %475 = vmatpush.msra.mxu0 %v3036_v10  ;;  %v3089_v47 = vld [vmem:[%s5187_s3 + $0x68] sm:$0xff]  ;;  %v3135_v3 = vld [vmem:[%s5187_s3 + $0xb8] sm:$0xff]  ;;  %v3066_v4 = vld [vmem:[%s5187_s3 + $0x40] sm:$0xff] }
  0x56   : > { %3536 = vmatpush.msra.mxu3 %v415_v48  ;;  %v4126_v55 = vld [vmem:[%s4123_s1 + $0x30] sm:$0xff]  ;;  %546 = vmatpush.msra.mxu1 %v415_v48  ;;  %v3026_v56 = vld [vmem:[%s4123_s1 + $0x8] sm:$0xff]  ;;  %v4164_v58 = vld [vmem:[%s4123_s1 + $0x38] sm:$0xff] }
  0x57   : > { %v4129_v44 = vld [vmem:[%s4123_s1 + $0x2f] sm:$0xff]  ;;  %3533 = vmatpush.msra.mxu2 %v3035_v50  ;;  %v3017_v62 = vld [vmem:[%s4123_s1 + $0x7] sm:$0xff]  ;;  %476 = vmatpush.msra.mxu0 %v3035_v50  ;;  %v4167_v15 = vld [vmem:[%s4123_s1 + $0x37] sm:$0xff] }
  0x58   : > { %3537 = vmatpush.msra.mxu3 %v414_v54  ;;  %3044 = vmatmul.msk.f32.vlgmr.msra.gmra.mxu2 %vm69_vm0, %v4126_v55  ;;  %v3111_v59 = vld [vmem:[%s5187_s3 + $0x88] sm:$0xff]  ;;  %v3027_v16 = vld [vmem:[%s4123_s1 + $0x10] sm:$0xff]  ;;  %v3088_v2 = vld [vmem:[%s5187_s3 + $0x60] sm:$0xff] }
  0x59   : > { %3053 = vmatmul.msk.f32.vlgmr.msra.gmra.mxu3 %vm69_vm0, %v4129_v44  ;;  %631 = vmatpush.msrb.mxu2 %v3069_v26  ;;  %v3018_v14 = vld [vmem:[%s4123_s1 + $0xf] sm:$0xff]  ;;  %v3110_v23 = vld [vmem:[%s5187_s3 + $0x80] sm:$0xff]  ;;  %v3157_v5 = vld [vmem:[%s5187_s3 + $0xd8] sm:$0xff] }
  0x5a   : > { %547 = vmatpush.msra.mxu1 %v414_v54  ;;  %3039 = vmatmul.msk.f32.vlgmr.msra.gmra.mxu0 %vm69_vm0, %v3026_v56  ;;  %v3179_v53 = vld [vmem:[%s5187_s3 + $0xf8] sm:$0xff]  ;;  %v3134_v17 = vld [vmem:[%s5187_s3 + $0xb0] sm:$0xff]  ;;  %v3133_v41 = vld [vmem:[%s5187_s3 + $0xa8] sm:$0xff] }
  0x5b   : > { %3048 = vmatmul.msk.f32.vlgmr.msra.gmra.mxu1 %vm69_vm0, %v3017_v62  ;;  %727 = vmatpush.msrb.mxu3 %v3091_v60  ;;  %v3201_v37 = vld [vmem:[%s5187_s3 + $0x118] sm:$0xff]  ;;  %v4208_v13 = vld [vmem:[%s4123_s1 + $0x40] sm:$0xff]  ;;  %v3156_v8 = vld [vmem:[%s5187_s3 + $0xd0] sm:$0xff] }
  0x5c   : > { %823 = vmatpush.msrb.mxu0 %v3113_v22  ;;  %632 = vmatpush.msrb.mxu2 %v3068_v57  ;;  %v4211_v38 = vld [vmem:[%s4123_s1 + $0x3f] sm:$0xff]  ;;  %v3019_v20 = vld [vmem:[%s4123_s1 + $0x17] sm:$0xff]  ;;  %v4231_v45 = vld [vmem:[%s4123_s1 + $0x48] sm:$0xff] }
  0x5d   : > { %728 = vmatpush.msrb.mxu3 %v3090_v1  ;;  %919 = vmatpush.msrb.mxu1 %v3135_v3  ;;  %v3132_v49 = vld [vmem:[%s5187_s3 + $0xa0] sm:$0xff]  ;;  %v3028_v63 = vld [vmem:[%s4123_s1 + $0x18] sm:$0xff]  ;;  %v3178_v39 = vld [vmem:[%s5187_s3 + $0xf0] sm:$0xff] }
  0x5e   : > { %824 = vmatpush.msrb.mxu0 %v3112_v61  ;;  %633 = vmatpush.msrb.mxu2 %v3067_v0  ;;  %v4234_v24 = vld [vmem:[%s4123_s1 + $0x47] sm:$0xff]  ;;  %v3020_v6 = vld [vmem:[%s4123_s1 + $0x1f] sm:$0xff]  ;;  %v3200_v21 = vld [vmem:[%s5187_s3 + $0x110] sm:$0xff] }
  0x5f   : > { %729 = vmatpush.msrb.mxu3 %v3089_v47  ;;  %920 = vmatpush.msrb.mxu1 %v3134_v17  ;;  %v3029_v18 = vld [vmem:[%s4123_s1 + $0x20] sm:$0xff]  ;;  %v3057_v52 = vld [vmem:[%s4123_s1 + $0x9] sm:$0xff]  ;;  %v3058_v43 = vld [vmem:[%s4123_s1 + $0x11] sm:$0xff] }
  0x60   : > { %3045 = vmatmul.msk.f32.gmra.mxu2 %vm69_vm0, %v4164_v58  ;;  %825 = vmatpush.msrb.mxu0 %v3111_v59  ;;  %v3030_v42 = vld [vmem:[%s4123_s1 + $0x28] sm:$0xff]  ;;  %v3059_v48 = vld [vmem:[%s4123_s1 + $0x19] sm:$0xff]  ;;  %v3125_v26 = vld [vmem:[%s4123_s1 + $0x31] sm:$0xff] }
  0x61   : > { %3054 = vmatmul.msk.f32.gmra.mxu3 %vm69_vm0, %v4167_v15  ;;  %634 = vmatpush.msrb.mxu2 %v3066_v4  ;;  %v3021_v12 = vld [vmem:[%s4123_s1 + $0x27] sm:$0xff]  ;;  %v3126_v56 = vld [vmem:[%s4123_s1 + $0x39] sm:$0xff]  ;;  %v3085_v60 = vld [vmem:[%s4123_s1 + $0x4f] sm:$0xff] }
  0x62   : > { %3040 = vmatmul.msk.f32.gmra.mxu0 %vm69_vm0, %v3027_v16  ;;  %730 = vmatpush.msrb.mxu3 %v3088_v2  ;;  %v3155_v7 = vld [vmem:[%s5187_s3 + $0xc8] sm:$0xff]  ;;  %v3154_v54 = vld [vmem:[%s5187_s3 + $0xc0] sm:$0xff]  ;;  %v3086_v57 = vld [vmem:[%s4123_s1 + $0x57] sm:$0xff] }
  0x63   : > { %3049 = vmatmul.msk.f32.gmra.mxu1 %vm69_vm0, %v3018_v14  ;;  %826 = vmatpush.msrb.mxu0 %v3110_v23  ;;  %v3177_v19 = vld [vmem:[%s5187_s3 + $0xe8] sm:$0xff]  ;;  %v3198_v62 = vld [vmem:[%s5187_s3 + $0x100] sm:$0xff]  ;;  %v3107_v1 = vld [vmem:[%s4123_s1 + $0x50] sm:$0xff] }
  0x64   : > { %1015 = vmatpush.msra.mxu2 %v3157_v5  ;;  %1111 = vmatpush.msra.mxu3 %v3179_v53  ;;  %v3123_v9 = vld [vmem:[%s4123_s1 + $0x21] sm:$0xff]  ;;  %v3124_v50 = vld [vmem:[%s4123_s1 + $0x29] sm:$0xff]  ;;  %v3129_v61 = vld [vmem:[%s4123_s1 + $0x51] sm:$0xff] }
  0x65   : > { %1207 = vmatpush.msra.mxu0 %v3201_v37  ;;  %921 = vmatpush.msrb.mxu1 %v3133_v41  ;;  %v3199_v10 = vld [vmem:[%s5187_s3 + $0x108] sm:$0xff]  ;;  %v3087_v0 = vld [vmem:[%s4123_s1 + $0x5f] sm:$0xff]  ;;  %v3686_v37 = vmov 1.0  }
  0x66   : > { %1016 = vmatpush.msra.mxu2 %v3156_v8  ;;  %1112 = vmatpush.msra.mxu3 %v3178_v39  ;;  %v3128_v22 = vld [vmem:[%s4123_s1 + $0x49] sm:$0xff]  ;;  %v3108_v47 = vld [vmem:[%s4123_s1 + $0x58] sm:$0xff]  ;;  %v3109_v59 = vld [vmem:[%s4123_s1 + $0x60] sm:$0xff] }
  0x67   : > { %922 = vmatpush.msrb.mxu1 %v3132_v49  ;;  %1208 = vmatpush.msra.mxu0 %v3200_v21  ;;  %v3130_v3 = vld [vmem:[%s4123_s1 + $0x59] sm:$0xff]  ;;  %v3131_v4 = vld [vmem:[%s4123_s1 + $0x61] sm:$0xff] }
  0x68   : > { %3046 = vmatmul.msk.f32.gmra.mxu2 %vm69_vm0, %v4208_v13  ;;  %1113 = vmatpush.msra.mxu3 %v3177_v19  ;;  %v3151_v49 = vld [vmem:[%s4123_s1 + $0x67] sm:$0xff] }
  0x69   : > { %3055 = vmatmul.msk.f32.gmra.mxu3 %vm69_vm0, %v4211_v38  ;;  %1017 = vmatpush.msra.mxu2 %v3155_v7 }
  0x6a   : > { %3041 = vmatmul.msk.f32.gmra.mxu0 %vm69_vm0, %v3028_v63  ;;  %3211 = vmatpush.msk.msra.mxu1 %vm60_vm8, %v3686_v37  ;;  %v3173_v63 = vld [vmem:[%s4123_s1 + $0x68] sm:$0xff] }
  0x6b   : > { %3050 = vmatmul.msk.f32.gmra.mxu1 %vm69_vm0, %v3019_v20  ;;  %1209 = vmatpush.msra.mxu0 %v3199_v10  ;;  %v3175_v10 = vld [vmem:[%s4123_s1 + $0x78] sm:$0xff] }
  0x6c   : > { %1018 = vmatpush.msra.mxu2 %v3154_v54  ;;  %3212 = vmatpush.msk.msra.mxu1 %vm59_vm7, %v3686_v37  ;;  %v3196_v54 = vld [vmem:[%s4123_s1 + $0x71] sm:$0xff] }
  0x6d   : > { %1210 = vmatpush.msra.mxu0 %v3198_v62 }
  0x6e   : > { %3213 = vmatpush.msk.msra.mxu1 %vm58_vm6, %v3686_v37 }
  0x70   : > { %3047 = vmatmul.msk.f32.gmra.mxu2 %vm69_vm0, %v4231_v45  ;;  %3214 = vmatpush.msk.msra.mxu1 %vm57_vm5, %v3686_v37 }
  0x71   : > { %3056 = vmatmul.msk.f32.gmra.mxu3 %vm69_vm0, %v4234_v24 }
  0x72   : > { %3042 = vmatmul.msk.f32.gmra.mxu0 %vm69_vm0, %v3029_v18 }
  0x73   : > { %3051 = vmatmul.msk.f32.gmra.mxu1 %vm69_vm0, %v3020_v6 }
  0x78   : > { %3070 = vmatmul.msk.f32.vlgmr.msrb.gmra.mxu2 %vm69_vm0, %v3057_v52  ;;  %v3195_v52 = vld [vmem:[%s4123_s1 + $0x69] sm:$0xff] }
  0x79   : > { %3092 = vmatmul.msk.f32.vlgmr.msrb.gmra.mxu3 %vm69_vm0, %v3020_v6  ;;  %v3174_v6 = vld [vmem:[%s4123_s1 + $0x70] sm:$0xff] }
  0x7a   : > { %3043 = vmatmul.msk.f32.gmra.mxu0 %vm69_vm0, %v3030_v42 }
  0x7b   : > { %3052 = vmatmul.msk.f32.gmra.mxu1 %vm69_vm0, %v3021_v12 }
  0x80   : > { %3071 = vmatmul.msk.f32.gmra.mxu2 %vm69_vm0, %v3058_v43 }
  0x81   : > { %3093 = vmatmul.msk.f32.gmra.mxu3 %vm69_vm0, %v3021_v12 }
  0x82   : > { %3114 = vmatmul.msk.f32.vlgmr.msrb.gmra.mxu0 %vm69_vm0, %v3029_v18  ;;  %v3152_v18 = vld [vmem:[%s4123_s1 + $0x6f] sm:$0xff] }
  0x83   : > { %3136 = vmatmul.msk.f32.vlgmr.msrb.gmra.mxu1 %vm69_vm0, %v3123_v9 }
  0x88   : > { %3072 = vmatmul.msk.f32.gmra.mxu2 %vm69_vm0, %v3059_v48 }
  0x89   : > { %3094 = vmatmul.msk.f32.gmra.mxu3 %vm69_vm0, %v4129_v44  ;;  %v3176_v44 = vld [vmem:[%s5187_s3 + $0xe0] sm:$0xff] }
  0x8a   : > { %3115 = vmatmul.msk.f32.gmra.mxu0 %vm69_vm0, %v3030_v42  ;;  %1114 = vmatpush.msra.mxu3 %v3176_v44 }
  0x8b   : > { %3137 = vmatmul.msk.f32.gmra.mxu1 %vm69_vm0, %v3124_v50 }
  0x90   : > { %3073 = vmatmul.msk.f32.gmra.mxu2 %vm69_vm0, %v3123_v9  ;;  %v3153_v9 = vld [vmem:[%s4123_s1 + $0x77] sm:$0xff] }
  0x91   : > { %3095 = vmatmul.msk.f32.gmra.mxu3 %vm69_vm0, %v4167_v15 }
  0x92   : > { %3116 = vmatmul.msk.f32.gmra.mxu0 %vm69_vm0, %v4126_v55  ;;  %v3127_v55 = vld [vmem:[%s4123_s1 + $0x41] sm:$0xff] }
  0x93   : > { %3138 = vmatmul.msk.f32.gmra.mxu1 %vm69_vm0, %v3125_v26 }
  0x98   : > { %3074 = vmatmul.msk.f32.gmra.mxu2 %vm69_vm0, %v3124_v50 }
  0x99   : > { %3096 = vmatmul.msk.f32.gmra.mxu3 %vm69_vm0, %v4211_v38 }
  0x9a   : > { %3117 = vmatmul.msk.f32.gmra.mxu0 %vm69_vm0, %v4164_v58 }
  0x9b   : > { %3139 = vmatmul.msk.f32.gmra.mxu1 %vm69_vm0, %v3126_v56 }
  0xa0   : > { %3075 = vmatmul.msk.f32.gmra.mxu2 %vm69_vm0, %v3125_v26 }
  0xa1   : > { %3097 = vmatmul.msk.f32.gmra.mxu3 %vm69_vm0, %v4234_v24 }
  0xa2   : > { %3118 = vmatmul.msk.f32.gmra.mxu0 %vm69_vm0, %v4208_v13 }
  0xa3   : > { %3140 = vmatmul.msk.f32.gmra.mxu1 %vm69_vm0, %v3127_v55 }
  0xa8   : > { %3076 = vmatmul.msk.f32.gmra.mxu2 %vm69_vm0, %v3126_v56 }
  0xa9   : > { %3098 = vmatmul.msk.f32.gmra.mxu3 %vm69_vm0, %v3085_v60 }
  0xaa   : > { %3119 = vmatmul.msk.f32.gmra.mxu0 %vm69_vm0, %v4231_v45 }
  0xab   : > { %3141 = vmatmul.msk.f32.gmra.mxu1 %vm69_vm0, %v3128_v22 }
  0xb0   : > { %3077 = vmatmul.msk.f32.gmra.mxu2 %vm69_vm0, %v3127_v55 }
  0xb1   : > { %3099 = vmatmul.msk.f32.gmra.mxu3 %vm69_vm0, %v3086_v57 }
  0xb2   : > { %3120 = vmatmul.msk.f32.gmra.mxu0 %vm69_vm0, %v3107_v1 }
  0xb3   : > { %3142 = vmatmul.msk.f32.gmra.mxu1 %vm69_vm0, %v3129_v61 }
  0xb8   : > { %3078 = vmatmul.msk.f32.gmra.mxu2 %vm69_vm0, %v3128_v22 }
  0xb9   : > { %3100 = vmatmul.msk.f32.gmra.mxu3 %vm69_vm0, %v3087_v0 }
  0xba   : > { %3121 = vmatmul.msk.f32.gmra.mxu0 %vm69_vm0, %v3108_v47 }
  0xbb   : > { %3143 = vmatmul.msk.f32.gmra.mxu1 %vm69_vm0, %v3130_v3 }
  0xc0   : > { %3158 = vmatmul.msk.f32.vlgmr.msra.gmra.mxu2 %vm69_vm0, %v4167_v15 }
  0xc1   : > { %3180 = vmatmul.msk.f32.vlgmr.msra.gmra.mxu3 %vm69_vm0, %v4164_v58 }
  0xc2   : > { %3122 = vmatmul.msk.f32.gmra.mxu0 %vm69_vm0, %v3109_v59 }
  0xc3   : > { %3144 = vmatmul.msk.f32.gmra.mxu1 %vm69_vm0, %v3131_v4 }
  0xc8   : > { %3159 = vmatmul.msk.f32.gmra.mxu2 %vm69_vm0, %v4211_v38 }
  0xc9   : > { %3181 = vmatmul.msk.f32.gmra.mxu3 %vm69_vm0, %v4208_v13 }
  0xca   : > { %3202 = vmatmul.msk.f32.vlgmr.msra.gmra.mxu0 %vm69_vm0, %v3126_v56 }
  0xd0   : > { %3160 = vmatmul.msk.f32.gmra.mxu2 %vm69_vm0, %v4234_v24 }
  0xd1   : > { %3182 = vmatmul.msk.f32.gmra.mxu3 %vm69_vm0, %v4231_v45 }
  0xd2   : > { %3203 = vmatmul.msk.f32.gmra.mxu0 %vm69_vm0, %v3127_v55 }
  0xd7   : > { %v478_v58 = vpop.f32.mrf.mxu0 }
  0xd8   : > { %3161 = vmatmul.msk.f32.gmra.mxu2 %vm69_vm0, %v3085_v60  ;;  %v549_v20 = vpop.f32.mrf.mxu1 }
  0xd9   : > { %3183 = vmatmul.msk.f32.gmra.mxu3 %vm69_vm0, %v3107_v1  ;;  %v550_v12 = vadd.f32 %v549_v20, %v478_v58  ;;  %v3197_v1 = vld [vmem:[%s4123_s1 + $0x79] sm:$0xff] }
  0xda   : > { %3204 = vmatmul.msk.f32.gmra.mxu0 %vm69_vm0, %v3128_v22 }
  0xdb   : > { %v493_v15 = vpop.f32.mrf.mxu2 }
  0xdc   : > { %v564_v16 = vpop.f32.mrf.mxu3 }
  0xdd   : > { %v4348_v2 = vadd.f32 %v564_v16, %v493_v15 }
  0xdf   : > { %v481_v14 = vpop.f32.mrf.mxu0 }
  0xe0   : > { %3162 = vmatmul.msk.f32.gmra.mxu2 %vm69_vm0, %v3086_v57  ;;  %v552_v42 = vpop.f32.mrf.mxu1 }
  0xe1   : > { %3184 = vmatmul.msk.f32.gmra.mxu3 %vm69_vm0, %v3108_v47  ;;  %v553_v44 = vadd.f32 %v552_v42, %v481_v14 }
  0xe2   : > { %3205 = vmatmul.msk.f32.gmra.mxu0 %vm69_vm0, %v3129_v61 }
  0xe3   : > { %v496_v23 = vpop.f32.mrf.mxu2 }
  0xe4   : > { %v567_v5 = vpop.f32.mrf.mxu3 }
  0xe5   : > { %v4353_v53 = vadd.f32 %v567_v5, %v496_v23 }
  0xe7   : > { %v484_v17 = vpop.f32.mrf.mxu0 }
  0xe8   : > { %3163 = vmatmul.msk.f32.gmra.mxu2 %vm69_vm0, %v3087_v0  ;;  %v555_v56 = vpop.f32.mrf.mxu1 }
  0xe9   : > { %3185 = vmatmul.msk.f32.gmra.mxu3 %vm69_vm0, %v3109_v59  ;;  %v556_v0 = vadd.f32 %v555_v56, %v484_v17 }
  0xea   : > { %3206 = vmatmul.msk.f32.gmra.mxu0 %vm69_vm0, %v3130_v3 }
  0xeb   : > { %v499_v41 = vpop.f32.mrf.mxu2 }
  0xec   : > { %v570_v13 = vpop.f32.mrf.mxu3 }
  0xed   : > { %v4364_v38 = vadd.f32 %v570_v13, %v499_v41 }
  0xef   : > { %v487_v8 = vpop.f32.mrf.mxu0 }
  0xf0   : > { %3164 = vmatmul.msk.f32.gmra.mxu2 %vm69_vm0, %v3151_v49 }
  0xf1   : > { %3186 = vmatmul.msk.f32.gmra.mxu3 %vm69_vm0, %v3173_v63 }
  0xf2   : > { %3207 = vmatmul.msk.f32.gmra.mxu0 %vm69_vm0, %v3131_v4  ;;  %v558_v4 = vpop.f32.mrf.mxu1 }
  0xf3   : > { %v502_v39 = vpop.f32.mrf.mxu2  ;;  %v559_v14 = vadd.f32 %v558_v4, %v487_v8 }
  0xf4   : > { %v573_v45 = vpop.f32.mrf.mxu3 }
  0xf5   : > { %v4373_v24 = vadd.f32 %v573_v45, %v502_v39 }
  0xf7   : > { %v490_v21 = vpop.f32.mrf.mxu0 }
  0xf8   : > { %3165 = vmatmul.msk.f32.gmra.mxu2 %vm69_vm0, %v3152_v18 }
  0xf9   : > { %3187 = vmatmul.msk.f32.gmra.mxu3 %vm69_vm0, %v3174_v6 }
  0xfa   : > { %3208 = vmatmul.msk.f32.gmra.mxu0 %vm69_vm0, %v3195_v52  ;;  %v561_v13 = vpop.f32.mrf.mxu1 }
  0xfb   : > { %v636_v7 = vpop.f32.mrf.mxu2  ;;  %v562_v20 = vadd.f32 %v561_v13, %v490_v21 }
  0xfc   : > { %v732_v19 = vpop.f32.mrf.mxu3  ;;  %v663_v43 = vadd.f32 %v636_v7, %v550_v12 }
  0xfe   : > { %v759_v48 = vadd.f32 %v732_v19, %v663_v43 }
  0xff   : > { %v828_v50 = vpop.f32.mrf.mxu0 }
 0x100   : > { %v4384_v26 = vadd.f32 %v828_v50, %v759_v48  ;;  %3166 = vmatmul.msk.f32.gmra.mxu2 %vm69_vm0, %v3153_v9 }
 0x101   : > { %3188 = vmatmul.msk.f32.gmra.mxu3 %vm69_vm0, %v3175_v10 }
 0x102   : > { %3209 = vmatmul.msk.f32.gmra.mxu0 %vm69_vm0, %v3196_v54  ;;  %v924_v21 = vpop.f32.mrf.mxu1 }
 0x103   : > { %v639_v62 = vpop.f32.mrf.mxu2  ;;  %v951_v4 = vadd.f32 %v924_v21, %v4384_v26 }
 0x104   : > { %v735_v55 = vpop.f32.mrf.mxu3  ;;  %v664_v60 = vadd.f32 %v639_v62, %v553_v44 }
 0x106   : > { %v760_v22 = vadd.f32 %v735_v55, %v664_v60 }
 0x107   : > { %v831_v57 = vpop.f32.mrf.mxu0 }
 0x108   : > { %v856_v61 = vadd.f32 %v831_v57, %v760_v22 }
 0x10a   : > { %3210 = vmatmul.msk.f32.gmra.mxu0 %vm69_vm0, %v3197_v1 }
 0x10b   : > { %v642_v47 = vpop.f32.mrf.mxu2 }
 0x10c   : > { %v738_v3 = vpop.f32.mrf.mxu3  ;;  %v665_v59 = vadd.f32 %v642_v47, %v556_v0 }
 0x10e   : > { %v761_v58 = vadd.f32 %v738_v3, %v665_v59 }
 0x10f   : > { %v834_v15 = vpop.f32.mrf.mxu0 }
 0x110   : > { %v857_v16 = vadd.f32 %v834_v15, %v761_v58 }
 0x113   : > { %v645_v23 = vpop.f32.mrf.mxu2 }
 0x114   : > { %v741_v5 = vpop.f32.mrf.mxu3  ;;  %v666_v37 = vadd.f32 %v645_v23, %v559_v14 }
 0x116   : > { %v762_v41 = vadd.f32 %v741_v5, %v666_v37  ;;  %v4409_v5 = vperm.slane %v3776_v11, 0 }
 0x117   : > { %v837_v49 = vpop.f32.mrf.mxu0 }
 0x118   : > { %v4391_v63 = vadd.f32 %v837_v49, %v762_v41 }
 0x11b   : > { %v648_v17 = vpop.f32.mrf.mxu2 }
 0x11c   : > { %v744_v39 = vpop.f32.mrf.mxu3  ;;  %v667_v45 = vadd.f32 %v648_v17, %v562_v20 }
 0x11e   : > { %v763_v18 = vadd.f32 %v744_v39, %v667_v45 }
 0x11f   : > { %v840_v6 = vpop.f32.mrf.mxu0 }
 0x120   : > { %v4393_v52 = vadd.f32 %v840_v6, %v763_v18 }
 0x123   : > { %v651_v42 = vpop.f32.mrf.mxu2 }
 0x124   : > { %v747_v12 = vpop.f32.mrf.mxu3  ;;  %v668_v8 = vadd.f32 %v651_v42, %v4348_v2  ;;  %v927_v2 = vpop.f32.mrf.mxu1 }
 0x125   : > { %v952_v13 = vadd.f32 %v927_v2, %v856_v61 }
 0x126   : > { %v764_v7 = vadd.f32 %v747_v12, %v668_v8 }
 0x127   : > { %v843_v19 = vpop.f32.mrf.mxu0 }
 0x128   : > { %v4396_v43 = vadd.f32 %v843_v19, %v764_v7 }
 0x12b   : > { %v654_v9 = vpop.f32.mrf.mxu2 }
 0x12c   : > { %v750_v10 = vpop.f32.mrf.mxu3  ;;  %v669_v48 = vadd.f32 %v654_v9, %v4353_v53  ;;  %v930_v58 = vpop.f32.mrf.mxu1 }
 0x12d   : > { %v953_v42 = vadd.f32 %v930_v58, %v857_v16 }
 0x12e   : > { %v765_v50 = vadd.f32 %v750_v10, %v669_v48 }
 0x12f   : > { %v846_v54 = vpop.f32.mrf.mxu0 }
 0x130   : > { %v4399_v44 = vadd.f32 %v846_v54, %v765_v50 }
 0x133   : > { %v657_v56 = vpop.f32.mrf.mxu2 }
 0x134   : > { %v753_v62 = vpop.f32.mrf.mxu3  ;;  %v670_v55 = vadd.f32 %v657_v56, %v4364_v38  ;;  %v933_v17 = vpop.f32.mrf.mxu1 }
 0x135   : > { %v954_v50 = vadd.f32 %v933_v17, %v4391_v63 }
 0x136   : > { %v766_v60 = vadd.f32 %v753_v62, %v670_v55 }
 0x137   : > { %v849_v22 = vpop.f32.mrf.mxu0 }
 0x138   : > { %v4402_v57 = vadd.f32 %v849_v22, %v766_v60 }
 0x13b   : > { %v660_v1 = vpop.f32.mrf.mxu2 }
 0x13c   : > { %v756_v0 = vpop.f32.mrf.mxu3  ;;  %v671_v47 = vadd.f32 %v660_v1, %v4373_v24  ;;  %v936_v9 = vpop.f32.mrf.mxu1 }
 0x13e   : > { %v767_v3 = vadd.f32 %v756_v0, %v671_v47  ;;  %v955_v0 = vadd.f32 %v936_v9, %v4393_v52 }
 0x13f   : > { %v852_v53 = vpop.f32.mrf.mxu0 }
 0x140   : > { %v4405_v59 = vadd.f32 %v852_v53, %v767_v3 }
 0x143   : > { %v1020_v15 = vpop.f32.mrf.mxu2 }
 0x144   : > { %v1116_v14 = vpop.f32.mrf.mxu3  ;;  %v1047_v23 = vadd.f32 %v1020_v15, %v951_v4  ;;  %v939_v2 = vpop.f32.mrf.mxu1 }
 0x146   : > { %v1143_v38 = vadd.f32 %v1116_v14, %v1047_v23  ;;  %v956_v23 = vadd.f32 %v939_v2, %v4396_v43 }
 0x147   : > { %v1212_v37 = vpop.f32.mrf.mxu0 }
 0x148   : > { %v1239_v41 = vadd.f32 %v1212_v37, %v1143_v38 }
 0x14a   : > { %v4412_v49 = vadd.f32 %v4409_v5, %v1239_v41 }
 0x14b   : > { %v1023_v24 = vpop.f32.mrf.mxu2 }
 0x14c   : > { %v1119_v20 = vpop.f32.mrf.mxu3  ;;  %v1260_v26 = vmul.f32 %v4412_v49, %v4412_v49  ;;  %v1048_v39 = vadd.f32 %v1023_v24, %v952_v13  ;;  %v942_v38 = vpop.f32.mrf.mxu1 }
 0x14e   : > { %v1144_v45 = vadd.f32 %v1119_v20, %v1048_v39  ;;  %3215 = vmatmul.msk.f32.vlgmr.msra.gmra.mxu1 %vm69_vm0, %v1260_v26  ;;  %v957_v39 = vadd.f32 %v942_v38, %v4399_v44 }
 0x14f   : > { %v1215_v18 = vpop.f32.mrf.mxu0 }
 0x150   : > { %v1240_v6 = vadd.f32 %v1215_v18, %v1144_v45 }
 0x152   : > { %v4418_v12 = vadd.f32 %v4409_v5, %v1240_v6 }
 0x153   : > { %v1026_v61 = vpop.f32.mrf.mxu2 }
 0x154   : > { %v1122_v8 = vpop.f32.mrf.mxu3  ;;  %v1049_v7 = vadd.f32 %v1026_v61, %v953_v42  ;;  %v1261_v19 = vmul.f32 %v4418_v12, %v4418_v12  ;;  %v945_v61 = vpop.f32.mrf.mxu1 }
 0x155   : > { %v958_v9 = vadd.f32 %v945_v61, %v4402_v57 }
 0x156   : > { %v1145_v10 = vadd.f32 %v1122_v8, %v1049_v7  ;;  %3216 = vmatmul.msk.f32.gmra.mxu1 %vm69_vm0, %v1261_v19 }
 0x157   : > { %v1218_v48 = vpop.f32.mrf.mxu0 }
 0x158   : > { %v1241_v21 = vadd.f32 %v1218_v48, %v1145_v10 }
 0x15a   : > { %v4425_v54 = vadd.f32 %v4409_v5, %v1241_v21 }
 0x15b   : > { %v1029_v16 = vpop.f32.mrf.mxu2 }
 0x15c   : > { %v1125_v56 = vpop.f32.mrf.mxu3  ;;  %v1050_v62 = vadd.f32 %v1029_v16, %v954_v50  ;;  %v1262_v55 = vmul.f32 %v4425_v54, %v4425_v54 }
 0x15e   : > { %v1146_v60 = vadd.f32 %v1125_v56, %v1050_v62  ;;  %3217 = vmatmul.msk.f32.gmra.mxu1 %vm69_vm0, %v1262_v55  ;;  %v948_v56 = vpop.f32.mrf.mxu1 }
 0x15f   : > { %v1221_v22 = vpop.f32.mrf.mxu0 }
 0x160   : > { %v1242_v1 = vadd.f32 %v1221_v22, %v1146_v60  ;;  %v959_v60 = vadd.f32 %v948_v56, %v4405_v59 }
 0x162   : > { %v4432_v47 = vadd.f32 %v4409_v5, %v1242_v1 }
 0x163   : > { %v1032_v63 = vpop.f32.mrf.mxu2 }
 0x164   : > { %v1128_v3 = vpop.f32.mrf.mxu3  ;;  %v1051_v53 = vadd.f32 %v1032_v63, %v955_v0  ;;  %v1263_v4 = vmul.f32 %v4432_v47, %v4432_v47 }
 0x166   : > { %v1147_v58 = vadd.f32 %v1128_v3, %v1051_v53  ;;  %3218 = vmatmul.msk.f32.gmra.mxu1 %vm69_vm0, %v1263_v4 }
 0x167   : > { %v1224_v15 = vpop.f32.mrf.mxu0 }
 0x168   : > { %v1243_v14 = vadd.f32 %v1224_v15, %v1147_v58 }
 0x16a   : > { %v4439_v37 = vadd.f32 %v4409_v5, %v1243_v14 }
 0x16b   : > { %v1035_v52 = vpop.f32.mrf.mxu2 }
 0x16c   : > { %v1131_v41 = vpop.f32.mrf.mxu3  ;;  %v1052_v13 = vadd.f32 %v1035_v52, %v956_v23  ;;  %v1264_v24 = vmul.f32 %v4439_v37, %v4439_v37 }
 0x16e   : > { %v1148_v20 = vadd.f32 %v1131_v41, %v1052_v13  ;;  %3219 = vmatmul.msk.f32.gmra.mxu1 %vm69_vm0, %v1264_v24 }
 0x16f   : > { %v1227_v17 = vpop.f32.mrf.mxu0 }
 0x170   : > { %v1244_v26 = vadd.f32 %v1227_v17, %v1148_v20 }
 0x172   : > { %v4446_v45 = vadd.f32 %v4409_v5, %v1244_v26 }
 0x173   : > { %v1038_v43 = vpop.f32.mrf.mxu2 }
 0x174   : > { %v1134_v18 = vpop.f32.mrf.mxu3  ;;  %v1053_v6 = vadd.f32 %v1038_v43, %v957_v39  ;;  %v1265_v42 = vmul.f32 %v4446_v45, %v4446_v45 }
 0x176   : > { %v1149_v8 = vadd.f32 %v1134_v18, %v1053_v6  ;;  %3220 = vmatmul.msk.f32.gmra.mxu1 %vm69_vm0, %v1265_v42 }
 0x177   : > { %v1230_v7 = vpop.f32.mrf.mxu0 }
 0x178   : > { %v1245_v19 = vadd.f32 %v1230_v7, %v1149_v8 }
 0x17a   : > { %v4453_v10 = vadd.f32 %v4409_v5, %v1245_v19 }
 0x17b   : > { %v1041_v44 = vpop.f32.mrf.mxu2 }
 0x17c   : > { %v1137_v48 = vpop.f32.mrf.mxu3  ;;  %v1054_v21 = vadd.f32 %v1041_v44, %v958_v9  ;;  %v1266_v50 = vmul.f32 %v4453_v10, %v4453_v10 }
 0x17e   : > { %v1150_v16 = vadd.f32 %v1137_v48, %v1054_v21  ;;  %3221 = vmatmul.msk.f32.gmra.mxu1 %vm69_vm0, %v1266_v50 }
 0x17f   : > { %v1233_v62 = vpop.f32.mrf.mxu0 }
 0x180   : > { %v1246_v55 = vadd.f32 %v1233_v62, %v1150_v16 }
 0x182   : > { %v4460_v22 = vadd.f32 %v4409_v5, %v1246_v55 }
 0x183   : > { %v1044_v57 = vpop.f32.mrf.mxu2 }
 0x184   : > { %v1140_v2 = vpop.f32.mrf.mxu3  ;;  %v1055_v1 = vadd.f32 %v1044_v57, %v959_v60  ;;  %v1267_v0 = vmul.f32 %v4460_v22, %v4460_v22 }
 0x186   : > { %v1151_v63 = vadd.f32 %v1140_v2, %v1055_v1  ;;  %3222 = vmatmul.msk.f32.gmra.mxu1 %vm69_vm0, %v1267_v0 }
 0x187   : > { %v1236_v3 = vpop.f32.mrf.mxu0 }
 0x188   : > { %v1247_v53 = vadd.f32 %v1236_v3, %v1151_v63 }
 0x18a   : > { %v4466_v4 = vadd.f32 %v4409_v5, %v1247_v53 }
 0x18c   : > { %v1268_v59 = vmul.f32 %v4466_v4, %v4466_v4 }
 0x18e   : > { %3223 = vmatmul.msk.f32.gmra.mxu1 %vm69_vm0, %v1268_v59 }
 0x1cb   : > { %v1313_v58 = vpop.f32.mrf.mxu1 }
 0x1cc   : > { %v1340_v15 = vmul.f32 2e-05, %v1313_v58 }
 0x1ce   : > { %v1349_v14 = vadd.f32 1.0, %v1340_v15 }
 0x1d0   : > { %3581 = vlog2.f32 %v1349_v14 }
 0x1d3   : > { %v1316_v23 = vpop.f32.mrf.mxu1 }
 0x1d4   : > { %v1341_v38 = vmul.f32 2e-05, %v1316_v23 }
 0x1d6   : > { %v3582_v52 = vpop.eup %3581  ;;  %v1350_v41 = vadd.f32 1.0, %v1341_v38 }
 0x1d7   : > { %v1359_v13 = vmul.f32 0.6931472, %v3582_v52 }
 0x1d8   : > { %3583 = vlog2.f32 %v1350_v41 }
 0x1d9   : > { %v1376_v24 = vmul.f32 -0.75, %v1359_v13 }
 0x1db   : > { %v1385_v20 = vmul.f32 1.442695, %v1376_v24  ;;  %v1319_v17 = vpop.f32.mrf.mxu1 }
 0x1dc   : > { %v1342_v26 = vmul.f32 2e-05, %v1319_v17 }
 0x1dd   : > { %3585 = vpow2.f32 %v1385_v20 }
 0x1de   : > { %v3584_v39 = vpop.eup %3583  ;;  %v1351_v43 = vadd.f32 1.0, %v1342_v26 }
 0x1df   : > { %v1361_v18 = vmul.f32 0.6931472, %v3584_v39 }
 0x1e0   : > { %3587 = vlog2.f32 %v1351_v43 }
 0x1e1   : > { %v1377_v6 = vmul.f32 -0.75, %v1361_v18 }
 0x1e3   : > { %v3586_v42 = vpop.eup %3585  ;;  %v1387_v61 = vmul.f32 1.442695, %v1377_v6  ;;  %v1322_v8 = vpop.f32.mrf.mxu1 }
 0x1e4   : > { %v1403_v7 = vmul.f32 %v3586_v42, %v4412_v49  ;;  %v1343_v19 = vmul.f32 2e-05, %v1322_v8 }
 0x1e5   : > { %3589 = vpow2.f32 %v1387_v61 }
 0x1e6   : > { %v3588_v9 = vpop.eup %3587  ;;  %1413 = vst.msk [vmem:[%s4476_s27] sm:$0xff] %vm69_vm0, %v1403_v7  ;;  %v1352_v44 = vadd.f32 1.0, %v1343_v19 }
 0x1e7   : > { %v1363_v48 = vmul.f32 0.6931472, %v3588_v9 }
 0x1e8   : > { %3591 = vlog2.f32 %v1352_v44 }
 0x1e9   : > { %v1378_v21 = vmul.f32 -0.75, %v1363_v48 }
 0x1eb   : > { %v3590_v50 = vpop.eup %3589  ;;  %v1389_v16 = vmul.f32 1.442695, %v1378_v21  ;;  %v1325_v56 = vpop.f32.mrf.mxu1 }
 0x1ec   : > { %v1404_v62 = vmul.f32 %v3590_v50, %v4418_v12  ;;  %v1344_v55 = vmul.f32 2e-05, %v1325_v56 }
 0x1ed   : > { %3593 = vpow2.f32 %v1389_v16 }
 0x1ee   : > { %v3592_v60 = vpop.eup %3591  ;;  %1414 = vst.msk [vmem:[%s4476_s27 + $0x8] sm:$0xff] %vm69_vm0, %v1404_v62  ;;  %v1353_v49 = vadd.f32 1.0, %v1344_v55 }
 0x1ef   : > { %v1365_v57 = vmul.f32 0.6931472, %v3592_v60 }
 0x1f0   : > { %3595 = vlog2.f32 %v1353_v49 }
 0x1f1   : > { %v1379_v2 = vmul.f32 -0.75, %v1365_v57 }
 0x1f3   : > { %v3594_v1 = vpop.eup %3593  ;;  %v1391_v0 = vmul.f32 1.442695, %v1379_v2  ;;  %v1328_v63 = vpop.f32.mrf.mxu1 }
 0x1f4   : > { %v1405_v3 = vmul.f32 %v3594_v1, %v4425_v54  ;;  %v1345_v53 = vmul.f32 2e-05, %v1328_v63 }
 0x1f5   : > { %3597 = vpow2.f32 %v1391_v0 }
 0x1f6   : > { %v3596_v59 = vpop.eup %3595  ;;  %1415 = vst.msk [vmem:[%s4476_s27 + $0x10] sm:$0xff] %vm69_vm0, %v1405_v3  ;;  %v1354_v12 = vadd.f32 1.0, %v1345_v53 }
 0x1f7   : > { %v1367_v58 = vmul.f32 0.6931472, %v3596_v59 }
 0x1f8   : > { %3599 = vlog2.f32 %v1354_v12 }
 0x1f9   : > { %v1380_v15 = vmul.f32 -0.75, %v1367_v58 }
 0x1fb   : > { %v3598_v14 = vpop.eup %3597  ;;  %v1393_v23 = vmul.f32 1.442695, %v1380_v15  ;;  %v1331_v38 = vpop.f32.mrf.mxu1 }
 0x1fc   : > { %v1406_v52 = vmul.f32 %v3598_v14, %v4432_v47  ;;  %v1346_v41 = vmul.f32 2e-05, %v1331_v38 }
 0x1fd   : > { %3601 = vpow2.f32 %v1393_v23 }
 0x1fe   : > { %v3600_v13 = vpop.eup %3599  ;;  %1416 = vst.msk [vmem:[%s4476_s27 + $0x18] sm:$0xff] %vm69_vm0, %v1406_v52  ;;  %v1355_v54 = vadd.f32 1.0, %v1346_v41 }
 0x1ff   : > { %v1369_v24 = vmul.f32 0.6931472, %v3600_v13 }
 0x200   : > { %3603 = vlog2.f32 %v1355_v54 }
 0x201   : > { %v1381_v20 = vmul.f32 -0.75, %v1369_v24 }
 0x203   : > { %v3602_v17 = vpop.eup %3601  ;;  %v1395_v26 = vmul.f32 1.442695, %v1381_v20  ;;  %v1334_v39 = vpop.f32.mrf.mxu1 }
 0x204   : > { %v1407_v43 = vmul.f32 %v3602_v17, %v4439_v37  ;;  %v1347_v18 = vmul.f32 2e-05, %v1334_v39 }
 0x205   : > { %3605 = vpow2.f32 %v1395_v26 }
 0x206   : > { %v3604_v6 = vpop.eup %3603  ;;  %1417 = vst.msk [vmem:[%s4476_s27 + $0x20] sm:$0xff] %vm69_vm0, %v1407_v43  ;;  %v1356_v47 = vadd.f32 1.0, %v1347_v18 }
 0x207   : > { %v1371_v42 = vmul.f32 0.6931472, %v3604_v6 }
 0x208   : > { %3607 = vlog2.f32 %v1356_v47 }
 0x209   : > { %v1382_v61 = vmul.f32 -0.75, %v1371_v42 }
 0x20b   : > { %v3606_v8 = vpop.eup %3605  ;;  %v1397_v7 = vmul.f32 1.442695, %v1382_v61  ;;  %v1337_v19 = vpop.f32.mrf.mxu1 }
 0x20c   : > { %v1408_v9 = vmul.f32 %v3606_v8, %v4446_v45  ;;  %v1348_v44 = vmul.f32 2e-05, %v1337_v19 }
 0x20d   : > { %3609 = vpow2.f32 %v1397_v7 }
 0x20e   : > { %v3608_v48 = vpop.eup %3607  ;;  %1418 = vst.msk [vmem:[%s4476_s27 + $0x28] sm:$0xff] %vm69_vm0, %v1408_v9  ;;  %v1357_v37 = vadd.f32 1.0, %v1348_v44 }
 0x20f   : > { %v1373_v21 = vmul.f32 0.6931472, %v3608_v48 }
 0x210   : > { %3611 = vlog2.f32 %v1357_v37 }
 0x211   : > { %v1383_v50 = vmul.f32 -0.75, %v1373_v21 }
 0x213   : > { %v3610_v16 = vpop.eup %3609  ;;  %v1399_v56 = vmul.f32 1.442695, %v1383_v50 }
 0x214   : > { %v1409_v62 = vmul.f32 %v3610_v16, %v4453_v10 }
 0x215   : > { %3613 = vpow2.f32 %v1399_v56 }
 0x216   : > { %v3612_v55 = vpop.eup %3611  ;;  %1419 = vst.msk [vmem:[%s4476_s27 + $0x30] sm:$0xff] %vm69_vm0, %v1409_v62 }
 0x217   : > { %v1375_v45 = vmul.f32 0.6931472, %v3612_v55 }
 0x219   : > { %v1384_v60 = vmul.f32 -0.75, %v1375_v45 }
 0x21b   : > { %v3614_v49 = vpop.eup %3613  ;;  %v1401_v57 = vmul.f32 1.442695, %v1384_v60 }
 0x21c   : > { %v1410_v2 = vmul.f32 %v3614_v49, %v4460_v22 }
 0x21d   : > { %3615 = vpow2.f32 %v1401_v57 }
 0x21e   : > { %1420 = vst.msk [vmem:[%s4476_s27 + $0x38] sm:$0xff] %vm69_vm0, %v1410_v2 }
 0x222   :  { %400 = sbr.rel (!%p398_p1) target bundleno = 80 (0x50), region = 141 }
 0x223   : > { %v3616_v1 = vpop.eup %3615 }
 0x224   : > { %v1411_v0 = vmul.f32 %v3616_v1, %v4466_v4 }
 0x226   : > { %1421 = vst.msk [vmem:[%s4476_s27 + $0x40] sm:$0xff] %vm69_vm0, %v1411_v0 }
 0x227 LB: > { %s4514_s28 = smul.u32 72, %s3679_s14  ;;  %s1427_s14 = sadd.s32 1, %s3679_s14   ;;  %s3679_s14 = sphi %s4508_s14, %s1427_s14  }
 0x228   : > { %p1424_p2 = scmp.ge.s32.totalorder %s1427_s14, 6  }
 0x229   : > { %s4520_s7 = scalar_lea.vmem %s5185_s0, %s4514_s28  ;;  %s4640_s9 = scalar_lea.vmem %s5188_s5, %s4514_s28 }
 0x22a   : > { %v3224_v11 = vld [vmem:[%s4520_s7 + $0x1f7] sm:$0xff]  ;;  %v3251_v53 = vld [vmem:[%s4520_s7 + $0x20f] sm:$0xff]  ;;  %v4534_v14 = vld [vmem:[%s4520_s7 + $0x227] sm:$0xff]  ;;  %s4673_s10 = scalar_lea.vmem [#allocation2], %s4514_s28  ;;  %s4771_s11 = smov (%p1424_p2), 0  }
 0x22b   : > { %v3233_v10 = vld [vmem:[%s4520_s7 + $0x1f8] sm:$0xff]  ;;  %v1442_v4 = vmul.f32 %v3224_v11, %v3807_v30  ;;  %v3260_v59 = vld [vmem:[%s4520_s7 + $0x210] sm:$0xff]  ;;  %v1526_v12 = vmul.f32 %v3251_v53, %v3816_v33  ;;  %v1619_v52 = vmul.f32 %v4534_v14, %v3831_v36  ;;  %v4540_v41 = vld [vmem:[%s4520_s7 + $0x228] sm:$0xff]  ;;  %v1445_v24 = vmul.f32 %v3251_v53, %v3807_v30 }
 0x22c   : > { %v3242_v22 = vld [vmem:[%s4520_s7 + $0x1f9] sm:$0xff]  ;;  %v1464_v63 = vmul.f32 %v3233_v10, %v3810_v31  ;;  %v1557_v58 = vmul.f32 %v3260_v59, %v3819_v34  ;;  %v3269_v15 = vld [vmem:[%s4520_s7 + $0x211] sm:$0xff]  ;;  %v4547_v20 = vmul.f32 %v4540_v41, %v3837_v40  ;;  %v4550_v17 = vld [vmem:[%s4520_s7 + $0x229] sm:$0xff]  ;;  %v1467_v18 = vmul.f32 %v3260_v59, %v3810_v31 }
 0x22d   : > { %v1495_v3 = vmul.f32 %v3242_v22, %v3813_v32  ;;  %v1588_v38 = vmul.f32 %v3269_v15, %v3828_v35  ;;  %v3225_v13 = vld [vmem:[%s4520_s7 + $0x1ff] sm:$0xff]  ;;  %v4558_v47 = vmul.f32 %v4550_v17, %v3845_v46  ;;  %v3252_v61 = vld [vmem:[%s4520_s7 + $0x217] sm:$0xff]  ;;  %v1498_v19 = vmul.f32 %v3269_v15, %v3813_v32  ;;  %v4569_v21 = vld [vmem:[%s4520_s7 + $0x22f] sm:$0xff] }
 0x22e   : > { %v1473_v23 = vadd.f32 %v1464_v63, %v1442_v4  ;;  %v3234_v54 = vld [vmem:[%s4520_s7 + $0x200] sm:$0xff]  ;;  %v1443_v26 = vmul.f32 %v3225_v13, %v3807_v30  ;;  %v3261_v8 = vld [vmem:[%s4520_s7 + $0x218] sm:$0xff]  ;;  %v1527_v44 = vmul.f32 %v3252_v61, %v3816_v33  ;;  %v1620_v56 = vmul.f32 %v4569_v21, %v3831_v36  ;;  %v4575_v62 = vld [vmem:[%s4520_s7 + $0x230] sm:$0xff] }
 0x22f   : > { %v1465_v39 = vmul.f32 %v3234_v54, %v3810_v31  ;;  %v3243_v43 = vld [vmem:[%s4520_s7 + $0x201] sm:$0xff]  ;;  %v3270_v7 = vld [vmem:[%s4520_s7 + $0x219] sm:$0xff]  ;;  %v1558_v48 = vmul.f32 %v3261_v8, %v3819_v34  ;;  %v3244_v60 = vld [vmem:[%s4520_s7 + $0x209] sm:$0xff]  ;;  %v1476_v49 = vadd.f32 %v1467_v18, %v1445_v24  ;;  %v1651_v2 = vmul.f32 %v4575_v62, %v3837_v40 }
 0x230   : > { %v1504_v6 = vadd.f32 %v1495_v3, %v1473_v23  ;;  %v1496_v42 = vmul.f32 %v3243_v43, %v3813_v32  ;;  %v1589_v37 = vmul.f32 %v3270_v7, %v3828_v35  ;;  %v3226_v50 = vld [vmem:[%s4520_s7 + $0x207] sm:$0xff]  ;;  %v4583_v1 = vld [vmem:[%s4520_s7 + $0x231] sm:$0xff]  ;;  %v1497_v11 = vmul.f32 %v3244_v60, %v3813_v32  ;;  %v3253_v10 = vld [vmem:[%s4520_s7 + $0x21f] sm:$0xff] }
 0x231   : > { %v1474_v9 = vadd.f32 %v1465_v39, %v1443_v26  ;;  %v1444_v55 = vmul.f32 %v3226_v50, %v3807_v30  ;;  %v3235_v45 = vld [vmem:[%s4520_s7 + $0x208] sm:$0xff]  ;;  %v3262_v22 = vld [vmem:[%s4520_s7 + $0x220] sm:$0xff]  ;;  %v1682_v63 = vmul.f32 %v4583_v1, %v3845_v46  ;;  %v1528_v3 = vmul.f32 %v3253_v10, %v3816_v33 }
 0x232   : > { %v1535_v16 = vadd.f32 %v1526_v12, %v1504_v6  ;;  %v1466_v0 = vmul.f32 %v3235_v45, %v3810_v31  ;;  %v1559_v53 = vmul.f32 %v3262_v22, %v3819_v34  ;;  %v3271_v59 = vld [vmem:[%s4520_s7 + $0x221] sm:$0xff]  ;;  %v4595_v12 = vld [vmem:[%s4520_s7 + $0x237] sm:$0xff]  ;;  %v1507_v39 = vadd.f32 %v1498_v19, %v1476_v49 }
 0x233   : > { %v1505_v57 = vadd.f32 %v1496_v42, %v1474_v9  ;;  %v1590_v13 = vmul.f32 %v3271_v59, %v3828_v35  ;;  %v1621_v54 = vmul.f32 %v4595_v12, %v3831_v36  ;;  %v4604_v26 = vld [vmem:[%s4520_s7 + $0x239] sm:$0xff]  ;;  %v1529_v43 = vmul.f32 %v4534_v14, %v3816_v33 }
 0x234   : > { %v1566_v4 = vadd.f32 %v1557_v58, %v1535_v16  ;;  %v1475_v23 = vadd.f32 %v1466_v0, %v1444_v55  ;;  %v4601_v58 = vld [vmem:[%s4520_s7 + $0x238] sm:$0xff]  ;;  %v1560_v18 = vmul.f32 %v4540_v41, %v3819_v34  ;;  %v1591_v19 = vmul.f32 %v4550_v17, %v3828_v35  ;;  %v4622_v60 = vld [vmem:[%s4520_s7 + $0x240] sm:$0xff] }
 0x235   : > { %v1536_v15 = vadd.f32 %v1527_v44, %v1505_v57  ;;  %v1652_v9 = vmul.f32 %v4601_v58, %v3837_v40  ;;  %v4615_v44 = vld [vmem:[%s4520_s7 + $0x23f] sm:$0xff]  ;;  %v1538_v16 = vadd.f32 %v1529_v43, %v1507_v39  ;;  %v1446_v49 = vmul.f32 %v3252_v61, %v3807_v30 }
 0x236   : > { %v1597_v24 = vadd.f32 %v1588_v38, %v1566_v4  ;;  %v1506_v42 = vadd.f32 %v1497_v11, %v1475_v23  ;;  %v1683_v38 = vmul.f32 %v4604_v26, %v3845_v46  ;;  %v1622_v55 = vmul.f32 %v4615_v44, %v3831_v36 }
 0x237   : > { %v1567_v6 = vadd.f32 %v1558_v48, %v1536_v15  ;;  %v1468_v57 = vmul.f32 %v3261_v8, %v3810_v31  ;;  %v1569_v11 = vadd.f32 %v1560_v18, %v1538_v16  ;;  %v1499_v4 = vmul.f32 %v3270_v7, %v3813_v32  ;;  %v1721_v16 = vld [vmem:[%s4640_s9] sm:$0xff] }
 0x238   : > { %v1628_v50 = vadd.f32 %v1619_v52, %v1597_v24  ;;  %v1537_v45 = vadd.f32 %v1528_v3, %v1506_v42  ;;  %v1653_v52 = vmul.f32 %v4622_v60, %v3837_v40  ;;  %v4631_v24 = vld [vmem:[%s4520_s7 + $0x241] sm:$0xff]  ;;  %v1530_v3 = vmul.f32 %v4569_v21, %v3816_v33 }
 0x239   : > { %v1598_v48 = vadd.f32 %v1589_v37, %v1567_v6  ;;  %v1477_v37 = vadd.f32 %v1468_v57, %v1446_v49  ;;  %v1684_v8 = vmul.f32 %v4631_v24, %v3845_v46  ;;  %v1561_v7 = vmul.f32 %v4575_v62, %v3819_v34 }
 0x23a   : > { %v1659_v0 = vadd.f32 %v4547_v20, %v1628_v50  ;;  %v1568_v23 = vadd.f32 %v1559_v53, %v1537_v45  ;;  %v1600_v20 = vadd.f32 %v1591_v19, %v1569_v11  ;;  %v1592_v43 = vmul.f32 %v4583_v1, %v3828_v35 }
 0x23b   : > { %v1629_v15 = vadd.f32 %v1620_v56, %v1598_v48  ;;  %v1508_v39 = vadd.f32 %v1499_v4, %v1477_v37  ;;  %v1447_v50 = vmul.f32 %v3253_v10, %v3807_v30  ;;  %v1469_v48 = vmul.f32 %v3262_v22, %v3810_v31  ;;  %v4662_v4 = vld [vmem:[%s4520_s7 + $0x248] sm:$0xff] }
 0x23c   : > { %v1690_v61 = vadd.f32 %v4558_v47, %v1659_v0  ;;  %v1599_v53 = vadd.f32 %v1590_v13, %v1568_v23  ;;  %v4649_v47 = vld [vmem:[%s4520_s7 + $0x247] sm:$0xff]  ;;  %v1631_v6 = vadd.f32 %v1622_v55, %v1600_v20  ;;  %v1500_v57 = vmul.f32 %v3271_v59, %v3813_v32 }
 0x23d   : > { %v1660_v56 = vadd.f32 %v1651_v2, %v1629_v15  ;;  %v1623_v42 = vmul.f32 %v4649_v47, %v3831_v36  ;;  %v1539_v13 = vadd.f32 %v1530_v3, %v1508_v39  ;;  %v1531_v55 = vmul.f32 %v4595_v12, %v3816_v33  ;;  %v1722_v15 = vld [vmem:[%s4640_s9 + $0x8] sm:$0xff] }
 0x23e   : > { %v1702_v18 = vadd.f32 %v1690_v61, %v3854_v51  ;;  %v1630_v2 = vadd.f32 %v1621_v54, %v1599_v53  ;;  %v1662_v49 = vadd.f32 %v1653_v52, %v1631_v6  ;;  %v1654_v52 = vmul.f32 %v4662_v4, %v3837_v40  ;;  %v1724_v53 = vld [vmem:[%s4640_s9 + $0x18] sm:$0xff] }
 0x23f   : > { %v1691_v19 = vadd.f32 %v1682_v63, %v1660_v56  ;;  %v1570_v10 = vadd.f32 %v1561_v7, %v1539_v13  ;;  %v1478_v63 = vadd.f32 %v1469_v48, %v1447_v50  ;;  %v1562_v59 = vmul.f32 %v4601_v58, %v3819_v34  ;;  %v3283_v50 = vld [vmem:[%s4520_s7 + $0x24f] sm:$0xff] }
 0x240   : > { %v1711_v45 = vmax.f32 %v1702_v18, 0.0  ;;  %v1661_v11 = vadd.f32 %v1652_v9, %v1630_v2  ;;  %v1693_v22 = vadd.f32 %v1684_v8, %v1662_v49  ;;  %v4670_v9 = vld [vmem:[%s4520_s7 + $0x249] sm:$0xff]  ;;  %v1593_v7 = vmul.f32 %v4604_v26, %v3828_v35 }
 0x241   : > { %v1703_v0 = vadd.f32 %v1691_v19, %v3854_v51  ;;  %v1601_v3 = vadd.f32 %v1592_v43, %v1570_v10  ;;  %v1509_v61 = vadd.f32 %v1500_v57, %v1478_v63  ;;  %v1685_v8 = vmul.f32 %v4670_v9, %v3845_v46  ;;  %v1723_v18 = vld [vmem:[%s4640_s9 + $0x10] sm:$0xff] }
 0x242   : > { %v1730_v54 = vmul.f32 %v1721_v16, %v1711_v45  ;;  %v1692_v37 = vadd.f32 %v1683_v38, %v1661_v11  ;;  %v1705_v20 = vadd.f32 %v1693_v22, %v3854_v51  ;;  %v1448_v16 = vmul.f32 %v4534_v14, %v3807_v30  ;;  %v3292_v57 = vld [vmem:[%s4520_s7 + $0x250] sm:$0xff] }
 0x243   : > { %v1712_v23 = vmax.f32 %v1703_v0, 0.0  ;;  %v1632_v39 = vadd.f32 %v1623_v42, %v1601_v3  ;;  %v1540_v43 = vadd.f32 %v1531_v55, %v1509_v61  ;;  %v1470_v19 = vmul.f32 %v4540_v41, %v3810_v31  ;;  %v3301_v10 = vld [vmem:[%s4520_s7 + $0x251] sm:$0xff]  ;;  %v1725_v3 = vld [vmem:[%s4640_s9 + $0x20] sm:$0xff] }
 0x244   : > { %3305 = vst.msk [vmem:[%s4673_s10 + $0x20] sm:$0xff] %vm69_vm0, %v1730_v54  ;;  %v1704_v56 = vadd.f32 %v1692_v37, %v3854_v51  ;;  %v1714_v6 = vmax.f32 %v1705_v20, 0.0  ;;  %v1501_v2 = vmul.f32 %v4550_v17, %v3813_v32  ;;  %v1624_v45 = vmul.f32 %v3283_v50, %v3831_v36 }
 0x245   : > { %v1731_v38 = vmul.f32 %v1722_v15, %v1712_v23  ;;  %v1663_v48 = vadd.f32 %v1654_v52, %v1632_v39  ;;  %v1571_v42 = vadd.f32 %v1562_v59, %v1540_v43  ;;  %v1479_v14 = vadd.f32 %v1470_v19, %v1448_v16  ;;  %v3284_v59 = vld [vmem:[%s4520_s7 + $0x257] sm:$0xff] }
 0x246   : > { %v1713_v13 = vmax.f32 %v1704_v56, 0.0  ;;  %v1733_v49 = vmul.f32 %v1724_v53, %v1714_v6  ;;  %v1532_v55 = vmul.f32 %v4615_v44, %v3816_v33  ;;  %v1655_v17 = vmul.f32 %v3292_v57, %v3837_v40  ;;  %v3302_v43 = vld [vmem:[%s4520_s7 + $0x259] sm:$0xff] }
 0x247   : > { %3306 = vst.msk [vmem:[%s4673_s10 + $0x28] sm:$0xff] %vm69_vm0, %v1731_v38  ;;  %v1694_v0 = vadd.f32 %v1685_v8, %v1663_v48  ;;  %v1602_v11 = vadd.f32 %v1593_v7, %v1571_v42  ;;  %v1686_v63 = vmul.f32 %v3301_v10, %v3845_v46  ;;  %v1510_v54 = vadd.f32 %v1501_v2, %v1479_v14  ;;  %v3293_v8 = vld [vmem:[%s4520_s7 + $0x258] sm:$0xff]  ;;  %v3294_v48 = vld [vmem:[%s4520_s7 + $0x260] sm:$0xff] }
 0x248   : > { %v1732_v41 = vmul.f32 %v1723_v18, %v1713_v13  ;;  %3308 = vst.msk [vmem:[%s4673_s10 + $0x38] sm:$0xff] %vm69_vm0, %v1733_v49  ;;  %v1563_v15 = vmul.f32 %v4622_v60, %v3819_v34  ;;  %v1449_v22 = vmul.f32 %v4569_v21, %v3807_v30  ;;  %v1471_v23 = vmul.f32 %v4575_v62, %v3810_v31  ;;  %v3285_v6 = vld [vmem:[%s4520_s7 + $0x25f] sm:$0xff] }
 0x249   : > { %v1706_v44 = vadd.f32 %v1694_v0, %v3854_v51  ;;  %v1633_v52 = vadd.f32 %v1624_v45, %v1602_v11  ;;  %v1502_v37 = vmul.f32 %v4583_v1, %v3813_v32  ;;  %v1541_v61 = vadd.f32 %v1532_v55, %v1510_v54  ;;  %v1726_v45 = vld [vmem:[%s4640_s9 + $0x28] sm:$0xff] }
 0x24a   : > { %3307 = vst.msk [vmem:[%s4673_s10 + $0x30] sm:$0xff] %vm69_vm0, %v1732_v41  ;;  %v1594_v60 = vmul.f32 %v4631_v24, %v3828_v35  ;;  %v1480_v7 = vadd.f32 %v1471_v23, %v1449_v22  ;;  %v1533_v38 = vmul.f32 %v4649_v47, %v3816_v33  ;;  %v1625_v62 = vmul.f32 %v3284_v59, %v3831_v36  ;;  %v3295_v59 = vld [vmem:[%s4520_s7 + $0x268] sm:$0xff] }
 0x24b   : > { %v1715_v21 = vmax.f32 %v1706_v44, 0.0  ;;  %v1664_v20 = vadd.f32 %v1655_v17, %v1633_v52  ;;  %v1572_v56 = vadd.f32 %v1563_v15, %v1541_v61  ;;  %v1564_v1 = vmul.f32 %v4662_v4, %v3819_v34 }
 0x24c   : > { %v1450_v53 = vmul.f32 %v4595_v12, %v3807_v30  ;;  %v1511_v18 = vadd.f32 %v1502_v37, %v1480_v7  ;;  %v1472_v16 = vmul.f32 %v4601_v58, %v3810_v31  ;;  %v1656_v19 = vmul.f32 %v3293_v8, %v3837_v40 }
 0x24d   : > { %v1734_v39 = vmul.f32 %v1725_v3, %v1715_v21  ;;  %v1695_v24 = vadd.f32 %v1686_v63, %v1664_v20  ;;  %v1603_v47 = vadd.f32 %v1594_v60, %v1572_v56  ;;  %v1595_v2 = vmul.f32 %v4670_v9, %v3828_v35  ;;  %v3303_v63 = vld [vmem:[%s4520_s7 + $0x261] sm:$0xff]  ;;  %v3304_v60 = vld [vmem:[%s4520_s7 + $0x269] sm:$0xff] }
 0x24e   : > { %v1503_v4 = vmul.f32 %v4604_v26, %v3813_v32  ;;  %v1542_v13 = vadd.f32 %v1533_v38, %v1511_v18  ;;  %v1481_v42 = vadd.f32 %v1472_v16, %v1450_v53  ;;  %v1534_v58 = vmul.f32 %v3283_v50, %v3816_v33  ;;  %v3286_v50 = vld [vmem:[%s4520_s7 + $0x267] sm:$0xff]  ;;  %v1727_v21 = vld [vmem:[%s4640_s9 + $0x30] sm:$0xff] }
 0x24f   : > { %3309 = vst.msk [vmem:[%s4673_s10 + $0x40] sm:$0xff] %vm69_vm0, %v1734_v39  ;;  %v1707_v12 = vadd.f32 %v1695_v24, %v3854_v51  ;;  %v1634_v49 = vadd.f32 %v1625_v62, %v1603_v47  ;;  %v1687_v14 = vmul.f32 %v3302_v43, %v3845_v46  ;;  %v1626_v9 = vmul.f32 %v3285_v6, %v3831_v36  ;;  %v1728_v24 = vld [vmem:[%s4640_s9 + $0x38] sm:$0xff]  ;;  %v1729_v47 = vld [vmem:[%s4640_s9 + $0x40] sm:$0xff] }
 0x250   : > { %v1573_v55 = vadd.f32 %v1564_v1, %v1542_v13  ;;  %v1512_v41 = vadd.f32 %v1503_v4, %v1481_v42  ;;  %v1565_v0 = vmul.f32 %v3292_v57, %v3819_v34  ;;  %v1657_v17 = vmul.f32 %v3294_v48, %v3837_v40 }
 0x251   : > { %v1716_v26 = vmax.f32 %v1707_v12, 0.0  ;;  %v1665_v11 = vadd.f32 %v1656_v19, %v1634_v49  ;;  %v1596_v44 = vmul.f32 %v3301_v10, %v3828_v35  ;;  %v1688_v37 = vmul.f32 %v3303_v63, %v3845_v46 }
 0x252   : > { %v1604_v15 = vadd.f32 %v1595_v2, %v1573_v55  ;;  %v1543_v22 = vadd.f32 %v1534_v58, %v1512_v41  ;;  %v1627_v3 = vmul.f32 %v3286_v50, %v3831_v36  ;;  %v1658_v10 = vmul.f32 %v3295_v59, %v3837_v40 }
 0x253   : > { %v1735_v54 = vmul.f32 %v1726_v45, %v1716_v26  ;;  %v1696_v52 = vadd.f32 %v1687_v14, %v1665_v11  ;;  %v1689_v62 = vmul.f32 %v3304_v60, %v3845_v46 }
 0x254   : > { %v1635_v23 = vadd.f32 %v1626_v9, %v1604_v15  ;;  %v1574_v57 = vadd.f32 %v1565_v0, %v1543_v22 }
 0x255   : > { %3310 = vst.msk [vmem:[%s4673_s10 + $0x48] sm:$0xff] %vm69_vm0, %v1735_v54  ;;  %v1708_v61 = vadd.f32 %v1696_v52, %v3854_v51 }
 0x256   : > { %v1666_v20 = vadd.f32 %v1657_v17, %v1635_v23  ;;  %v1605_v8 = vadd.f32 %v1596_v44, %v1574_v57 }
 0x257   : > { %v1717_v7 = vmax.f32 %v1708_v61, 0.0 }
 0x258   : > { %v1697_v38 = vadd.f32 %v1688_v37, %v1666_v20  ;;  %v1636_v56 = vadd.f32 %v1627_v3, %v1605_v8 }
 0x259   : > { %v1736_v1 = vmul.f32 %v1727_v21, %v1717_v7 }
 0x25a   : > { %v1709_v53 = vadd.f32 %v1697_v38, %v3854_v51  ;;  %v1667_v39 = vadd.f32 %v1658_v10, %v1636_v56 }
 0x25b   : > { %3311 = vst.msk [vmem:[%s4673_s10 + $0x50] sm:$0xff] %vm69_vm0, %v1736_v1 }
 0x25c   : > { %v1718_v43 = vmax.f32 %v1709_v53, 0.0  ;;  %v1698_v18 = vadd.f32 %v1689_v62, %v1667_v39 }
 0x25e   : > { %v1737_v6 = vmul.f32 %v1728_v24, %v1718_v43  ;;  %v1710_v16 = vadd.f32 %v1698_v18, %v3854_v51 }
 0x260   : > { %3312 = vst.msk [vmem:[%s4673_s10 + $0x58] sm:$0xff] %vm69_vm0, %v1737_v6  ;;  %v1719_v19 = vmax.f32 %v1710_v16, 0.0  ;;  %1426 = sbr.rel (!%p1424_p2) target bundleno = 551 (0x227), region = 152 }
 0x262   : > { %v1738_v2 = vmul.f32 %v1729_v47, %v1719_v19 }
 0x264   : > { %3313 = vst.msk [vmem:[%s4673_s10 + $0x60] sm:$0xff] %vm69_vm0, %v1738_v2 }
 0x265 LB: > { %v3335_v4 = vld [vmem:[%s5187_s3 + $0x38] sm:$0xff]  ;;  %v3334_v13 = vld [vmem:[%s5187_s3 + $0x30] sm:$0xff]  ;;  %v3333_v31 = vld [vmem:[%s5187_s3 + $0x28] sm:$0xff]  ;;  %s2873_s21 = smul.u32 72, %s3683_s11  ;;  %s1754_s11 = sadd.s32 1, %s3683_s11   ;;  %s3683_s11 = sphi %s4771_s11, %s1754_s11  }
 0x266   : > { %v1770_v12 = vld [vmem:[%s5187_s3 + $0x18] sm:$0xff]  ;;  %3538 = vmatpush.msra.mxu2 %v3335_v4  ;;  %v1769_v30 = vld [vmem:[%s5187_s3 + $0x10] sm:$0xff]  ;;  %1826 = vmatpush.msra.mxu0 %v3335_v4  ;;  %v1768_v32 = vld [vmem:[%s5187_s3 + $0x8] sm:$0xff]  ;;  %p1751_p3 = scmp.ge.s32.totalorder %s1754_s11, 6  }
 0x267   : > { %3542 = vmatpush.msra.mxu3 %v1770_v12  ;;  %1897 = vmatpush.msra.mxu1 %v1770_v12  ;;  %v3332_v33 = vld [vmem:[%s5187_s3 + $0x20] sm:$0xff]  ;;  %s4803_s26 = scalar_lea.vmem [#allocation2], %s2873_s21  ;;  %v3366_v40 = vld [vmem:[%s5187_s3 + $0x58] sm:$0xff]  ;;  %v3365_v58 = vld [vmem:[%s5187_s3 + $0x50] sm:$0xff]  ;;  %s5153_s7 = scalar_lea.vmem %s5189_s6, %s2873_s21 }
 0x268   : > { %3539 = vmatpush.msra.mxu2 %v3334_v13  ;;  %1827 = vmatpush.msra.mxu0 %v3334_v13  ;;  %v1767_v34 = vld [vmem:[%s5187_s3] sm:$0xff]  ;;  %v3388_v48 = vld [vmem:[%s5187_s3 + $0x78] sm:$0xff]  ;;  %v3387_v45 = vld [vmem:[%s5187_s3 + $0x70] sm:$0xff] }
 0x269   : > { %3543 = vmatpush.msra.mxu3 %v1769_v30  ;;  %1898 = vmatpush.msra.mxu1 %v1769_v30  ;;  %v3410_v42 = vld [vmem:[%s5187_s3 + $0x98] sm:$0xff]  ;;  %v3409_v49 = vld [vmem:[%s5187_s3 + $0x90] sm:$0xff]  ;;  %v3364_v14 = vld [vmem:[%s5187_s3 + $0x48] sm:$0xff] }
 0x26a   : > { %3540 = vmatpush.msra.mxu2 %v3333_v31  ;;  %1828 = vmatpush.msra.mxu0 %v3333_v31  ;;  %v3386_v9 = vld [vmem:[%s5187_s3 + $0x68] sm:$0xff]  ;;  %v3432_v41 = vld [vmem:[%s5187_s3 + $0xb8] sm:$0xff]  ;;  %v3363_v11 = vld [vmem:[%s5187_s3 + $0x40] sm:$0xff] }
 0x26b   : > { %3544 = vmatpush.msra.mxu3 %v1768_v32  ;;  %v4806_v35 = vld [vmem:[%s4803_s26 + $0x30] sm:$0xff]  ;;  %1899 = vmatpush.msra.mxu1 %v1768_v32  ;;  %v3323_v46 = vld [vmem:[%s4803_s26 + $0x8] sm:$0xff]  ;;  %v4844_v26 = vld [vmem:[%s4803_s26 + $0x38] sm:$0xff] }
 0x26c   : > { %v4809_v36 = vld [vmem:[%s4803_s26 + $0x2f] sm:$0xff]  ;;  %3541 = vmatpush.msra.mxu2 %v3332_v33  ;;  %v3314_v51 = vld [vmem:[%s4803_s26 + $0x7] sm:$0xff]  ;;  %1829 = vmatpush.msra.mxu0 %v3332_v33  ;;  %v4847_v55 = vld [vmem:[%s4803_s26 + $0x37] sm:$0xff] }
 0x26d   : > { %3545 = vmatpush.msra.mxu3 %v1767_v34  ;;  %3341 = vmatmul.msk.f32.vlgmr.msra.gmra.mxu2 %vm69_vm0, %v4806_v35  ;;  %v3408_v0 = vld [vmem:[%s5187_s3 + $0x88] sm:$0xff]  ;;  %v3324_v17 = vld [vmem:[%s4803_s26 + $0x10] sm:$0xff]  ;;  %v3385_v63 = vld [vmem:[%s5187_s3 + $0x60] sm:$0xff] }
 0x26e   : > { %3350 = vmatmul.msk.f32.vlgmr.msra.gmra.mxu3 %vm69_vm0, %v4809_v36  ;;  %1984 = vmatpush.msrb.mxu2 %v3366_v40  ;;  %v3315_v50 = vld [vmem:[%s4803_s26 + $0xf] sm:$0xff]  ;;  %v3407_v54 = vld [vmem:[%s5187_s3 + $0x80] sm:$0xff]  ;;  %v3454_v15 = vld [vmem:[%s5187_s3 + $0xd8] sm:$0xff] }
 0x26f   : > { %1900 = vmatpush.msra.mxu1 %v1767_v34  ;;  %3336 = vmatmul.msk.f32.vlgmr.msra.gmra.mxu0 %vm69_vm0, %v3323_v46  ;;  %v3476_v22 = vld [vmem:[%s5187_s3 + $0xf8] sm:$0xff]  ;;  %v3431_v44 = vld [vmem:[%s5187_s3 + $0xb0] sm:$0xff]  ;;  %v3430_v59 = vld [vmem:[%s5187_s3 + $0xa8] sm:$0xff] }
 0x270   : > { %3345 = vmatmul.msk.f32.vlgmr.msra.gmra.mxu1 %vm69_vm0, %v3314_v51  ;;  %2080 = vmatpush.msrb.mxu3 %v3388_v48  ;;  %v3498_v52 = vld [vmem:[%s5187_s3 + $0x118] sm:$0xff]  ;;  %v4888_v23 = vld [vmem:[%s4803_s26 + $0x40] sm:$0xff]  ;;  %v3453_v60 = vld [vmem:[%s5187_s3 + $0xd0] sm:$0xff] }
 0x271   : > { %2176 = vmatpush.msrb.mxu0 %v3410_v42  ;;  %1985 = vmatpush.msrb.mxu2 %v3365_v58  ;;  %v4891_v37 = vld [vmem:[%s4803_s26 + $0x3f] sm:$0xff]  ;;  %v3316_v61 = vld [vmem:[%s4803_s26 + $0x17] sm:$0xff]  ;;  %v4911_v20 = vld [vmem:[%s4803_s26 + $0x48] sm:$0xff] }
 0x272   : > { %2081 = vmatpush.msrb.mxu3 %v3387_v45  ;;  %2272 = vmatpush.msrb.mxu1 %v3432_v41  ;;  %v3429_v57 = vld [vmem:[%s5187_s3 + $0xa0] sm:$0xff]  ;;  %v3325_v3 = vld [vmem:[%s4803_s26 + $0x18] sm:$0xff]  ;;  %v3475_v21 = vld [vmem:[%s5187_s3 + $0xf0] sm:$0xff]  ;;  %v3687_v41 = vmov 1.0  }
 0x273   : > { %2177 = vmatpush.msrb.mxu0 %v3409_v49  ;;  %1986 = vmatpush.msrb.mxu2 %v3364_v14  ;;  %v4914_v8 = vld [vmem:[%s4803_s26 + $0x47] sm:$0xff]  ;;  %v3317_v7 = vld [vmem:[%s4803_s26 + $0x1f] sm:$0xff]  ;;  %v3497_v38 = vld [vmem:[%s5187_s3 + $0x110] sm:$0xff] }
 0x274   : > { %2082 = vmatpush.msrb.mxu3 %v3386_v9  ;;  %2273 = vmatpush.msrb.mxu1 %v3431_v44  ;;  %v3326_v10 = vld [vmem:[%s4803_s26 + $0x20] sm:$0xff]  ;;  %v3354_v56 = vld [vmem:[%s4803_s26 + $0x9] sm:$0xff]  ;;  %v3355_v24 = vld [vmem:[%s4803_s26 + $0x11] sm:$0xff] }
 0x275   : > { %3342 = vmatmul.msk.f32.gmra.mxu2 %vm69_vm0, %v4844_v26  ;;  %2178 = vmatpush.msrb.mxu0 %v3408_v0  ;;  %v3327_v62 = vld [vmem:[%s4803_s26 + $0x28] sm:$0xff]  ;;  %v3356_v6 = vld [vmem:[%s4803_s26 + $0x19] sm:$0xff]  ;;  %v3422_v19 = vld [vmem:[%s4803_s26 + $0x31] sm:$0xff] }
 0x276   : > { %3351 = vmatmul.msk.f32.gmra.mxu3 %vm69_vm0, %v4847_v55  ;;  %1987 = vmatpush.msrb.mxu2 %v3363_v11  ;;  %v3318_v1 = vld [vmem:[%s4803_s26 + $0x27] sm:$0xff]  ;;  %v3423_v4 = vld [vmem:[%s4803_s26 + $0x39] sm:$0xff]  ;;  %v3382_v30 = vld [vmem:[%s4803_s26 + $0x4f] sm:$0xff] }
 0x277   : > { %3337 = vmatmul.msk.f32.gmra.mxu0 %vm69_vm0, %v3324_v17  ;;  %2083 = vmatpush.msrb.mxu3 %v3385_v63  ;;  %v3452_v53 = vld [vmem:[%s5187_s3 + $0xc8] sm:$0xff]  ;;  %v3451_v47 = vld [vmem:[%s5187_s3 + $0xc0] sm:$0xff]  ;;  %v3383_v32 = vld [vmem:[%s4803_s26 + $0x57] sm:$0xff] }
 0x278   : > { %3346 = vmatmul.msk.f32.gmra.mxu1 %vm69_vm0, %v3315_v50  ;;  %2179 = vmatpush.msrb.mxu0 %v3407_v54  ;;  %v3474_v39 = vld [vmem:[%s5187_s3 + $0xe8] sm:$0xff]  ;;  %v3473_v2 = vld [vmem:[%s5187_s3 + $0xe0] sm:$0xff]  ;;  %v3404_v33 = vld [vmem:[%s4803_s26 + $0x50] sm:$0xff] }
 0x279   : > { %2368 = vmatpush.msra.mxu2 %v3454_v15  ;;  %2464 = vmatpush.msra.mxu3 %v3476_v22  ;;  %v3420_v43 = vld [vmem:[%s4803_s26 + $0x21] sm:$0xff]  ;;  %v3421_v16 = vld [vmem:[%s4803_s26 + $0x29] sm:$0xff]  ;;  %v3426_v34 = vld [vmem:[%s4803_s26 + $0x51] sm:$0xff] }
 0x27a   : > { %2560 = vmatpush.msra.mxu0 %v3498_v52  ;;  %2274 = vmatpush.msrb.mxu1 %v3430_v59  ;;  %v3496_v18 = vld [vmem:[%s5187_s3 + $0x108] sm:$0xff]  ;;  %v3495_v12 = vld [vmem:[%s5187_s3 + $0x100] sm:$0xff] }
 0x27b   : > { %2369 = vmatpush.msra.mxu2 %v3453_v60  ;;  %2465 = vmatpush.msra.mxu3 %v3475_v21  ;;  %v3424_v13 = vld [vmem:[%s4803_s26 + $0x41] sm:$0xff]  ;;  %v3425_v31 = vld [vmem:[%s4803_s26 + $0x49] sm:$0xff]  ;;  %v3427_v40 = vld [vmem:[%s4803_s26 + $0x59] sm:$0xff] }
 0x27c   : > { %2275 = vmatpush.msrb.mxu1 %v3429_v57  ;;  %2561 = vmatpush.msra.mxu0 %v3497_v38  ;;  %v3406_v46 = vld [vmem:[%s4803_s26 + $0x60] sm:$0xff]  ;;  %v3470_v50 = vld [vmem:[%s4803_s26 + $0x68] sm:$0xff] }
 0x27d   : > { %3343 = vmatmul.msk.f32.gmra.mxu2 %vm69_vm0, %v4888_v23  ;;  %2466 = vmatpush.msra.mxu3 %v3474_v39  ;;  %v3428_v51 = vld [vmem:[%s4803_s26 + $0x61] sm:$0xff]  ;;  %v3449_v59 = vld [vmem:[%s4803_s26 + $0x6f] sm:$0xff] }
 0x27e   : > { %3352 = vmatmul.msk.f32.gmra.mxu3 %vm69_vm0, %v4891_v37  ;;  %2370 = vmatpush.msra.mxu2 %v3452_v53  ;;  %v3448_v63 = vld [vmem:[%s4803_s26 + $0x67] sm:$0xff] }
 0x27f   : > { %3338 = vmatmul.msk.f32.gmra.mxu0 %vm69_vm0, %v3325_v3  ;;  %2467 = vmatpush.msra.mxu3 %v3473_v2  ;;  %v3492_v57 = vld [vmem:[%s4803_s26 + $0x69] sm:$0xff] }
 0x280   : > { %3347 = vmatmul.msk.f32.gmra.mxu1 %vm69_vm0, %v3316_v61  ;;  %2562 = vmatpush.msra.mxu0 %v3496_v18 }
 0x281   : > { %2371 = vmatpush.msra.mxu2 %v3451_v47  ;;  %3508 = vmatpush.msk.msra.mxu1 %vm60_vm8, %v3687_v41 }
 0x282   : > { %2563 = vmatpush.msra.mxu0 %v3495_v12 }
 0x283   : > { %3509 = vmatpush.msk.msra.mxu1 %vm59_vm7, %v3687_v41 }
 0x285   : > { %3344 = vmatmul.msk.f32.gmra.mxu2 %vm69_vm0, %v4911_v20  ;;  %3510 = vmatpush.msk.msra.mxu1 %vm58_vm6, %v3687_v41 }
 0x286   : > { %3353 = vmatmul.msk.f32.gmra.mxu3 %vm69_vm0, %v4914_v8 }
 0x287   : > { %3339 = vmatmul.msk.f32.gmra.mxu0 %vm69_vm0, %v3326_v10  ;;  %3511 = vmatpush.msk.msra.mxu1 %vm57_vm5, %v3687_v41 }
 0x288   : > { %3348 = vmatmul.msk.f32.gmra.mxu1 %vm69_vm0, %v3317_v7 }
 0x28d   : > { %3367 = vmatmul.msk.f32.vlgmr.msrb.gmra.mxu2 %vm69_vm0, %v3354_v56  ;;  %v3493_v56 = vld [vmem:[%s4803_s26 + $0x71] sm:$0xff] }
 0x28e   : > { %3389 = vmatmul.msk.f32.vlgmr.msrb.gmra.mxu3 %vm69_vm0, %v3317_v7 }
 0x28f   : > { %3340 = vmatmul.msk.f32.gmra.mxu0 %vm69_vm0, %v3327_v62 }
 0x290   : > { %3349 = vmatmul.msk.f32.gmra.mxu1 %vm69_vm0, %v3318_v1 }
 0x295   : > { %3368 = vmatmul.msk.f32.gmra.mxu2 %vm69_vm0, %v3355_v24 }
 0x296   : > { %3390 = vmatmul.msk.f32.gmra.mxu3 %vm69_vm0, %v3318_v1 }
 0x297   : > { %3411 = vmatmul.msk.f32.vlgmr.msrb.gmra.mxu0 %vm69_vm0, %v3326_v10  ;;  %v3472_v10 = vld [vmem:[%s4803_s26 + $0x78] sm:$0xff] }
 0x298   : > { %3433 = vmatmul.msk.f32.vlgmr.msrb.gmra.mxu1 %vm69_vm0, %v3420_v43 }
 0x29d   : > { %3369 = vmatmul.msk.f32.gmra.mxu2 %vm69_vm0, %v3356_v6 }
 0x29e   : > { %3391 = vmatmul.msk.f32.gmra.mxu3 %vm69_vm0, %v4809_v36  ;;  %v3405_v36 = vld [vmem:[%s4803_s26 + $0x58] sm:$0xff] }
 0x29f   : > { %3412 = vmatmul.msk.f32.gmra.mxu0 %vm69_vm0, %v3327_v62 }
 0x2a0   : > { %3434 = vmatmul.msk.f32.gmra.mxu1 %vm69_vm0, %v3421_v16 }
 0x2a5   : > { %3370 = vmatmul.msk.f32.gmra.mxu2 %vm69_vm0, %v3420_v43 }
 0x2a6   : > { %3392 = vmatmul.msk.f32.gmra.mxu3 %vm69_vm0, %v4847_v55 }
 0x2a7   : > { %3413 = vmatmul.msk.f32.gmra.mxu0 %vm69_vm0, %v4806_v35  ;;  %v3384_v35 = vld [vmem:[%s4803_s26 + $0x5f] sm:$0xff] }
 0x2a8   : > { %3435 = vmatmul.msk.f32.gmra.mxu1 %vm69_vm0, %v3422_v19 }
 0x2ad   : > { %3371 = vmatmul.msk.f32.gmra.mxu2 %vm69_vm0, %v3421_v16  ;;  %v3494_v16 = vld [vmem:[%s4803_s26 + $0x79] sm:$0xff] }
 0x2ae   : > { %3393 = vmatmul.msk.f32.gmra.mxu3 %vm69_vm0, %v4891_v37 }
 0x2af   : > { %3414 = vmatmul.msk.f32.gmra.mxu0 %vm69_vm0, %v4844_v26 }
 0x2b0   : > { %3436 = vmatmul.msk.f32.gmra.mxu1 %vm69_vm0, %v3423_v4 }
 0x2b5   : > { %3372 = vmatmul.msk.f32.gmra.mxu2 %vm69_vm0, %v3422_v19 }
 0x2b6   : > { %3394 = vmatmul.msk.f32.gmra.mxu3 %vm69_vm0, %v4914_v8 }
 0x2b7   : > { %3415 = vmatmul.msk.f32.gmra.mxu0 %vm69_vm0, %v4888_v23 }
 0x2b8   : > { %3437 = vmatmul.msk.f32.gmra.mxu1 %vm69_vm0, %v3424_v13 }
 0x2bd   : > { %3373 = vmatmul.msk.f32.gmra.mxu2 %vm69_vm0, %v3423_v4 }
 0x2be   : > { %3395 = vmatmul.msk.f32.gmra.mxu3 %vm69_vm0, %v3382_v30 }
 0x2bf   : > { %3416 = vmatmul.msk.f32.gmra.mxu0 %vm69_vm0, %v4911_v20 }
 0x2c0   : > { %3438 = vmatmul.msk.f32.gmra.mxu1 %vm69_vm0, %v3425_v31 }
 0x2c5   : > { %3374 = vmatmul.msk.f32.gmra.mxu2 %vm69_vm0, %v3424_v13 }
 0x2c6   : > { %3396 = vmatmul.msk.f32.gmra.mxu3 %vm69_vm0, %v3383_v32 }
 0x2c7   : > { %3417 = vmatmul.msk.f32.gmra.mxu0 %vm69_vm0, %v3404_v33 }
 0x2c8   : > { %3439 = vmatmul.msk.f32.gmra.mxu1 %vm69_vm0, %v3426_v34 }
 0x2cd   : > { %3375 = vmatmul.msk.f32.gmra.mxu2 %vm69_vm0, %v3425_v31 }
 0x2ce   : > { %3397 = vmatmul.msk.f32.gmra.mxu3 %vm69_vm0, %v3384_v35 }
 0x2cf   : > { %3418 = vmatmul.msk.f32.gmra.mxu0 %vm69_vm0, %v3405_v36 }
 0x2d0   : > { %3440 = vmatmul.msk.f32.gmra.mxu1 %vm69_vm0, %v3427_v40 }
 0x2d5   : > { %3455 = vmatmul.msk.f32.vlgmr.msra.gmra.mxu2 %vm69_vm0, %v4847_v55 }
 0x2d6   : > { %3477 = vmatmul.msk.f32.vlgmr.msra.gmra.mxu3 %vm69_vm0, %v4844_v26 }
 0x2d7   : > { %3419 = vmatmul.msk.f32.gmra.mxu0 %vm69_vm0, %v3406_v46 }
 0x2d8   : > { %3441 = vmatmul.msk.f32.gmra.mxu1 %vm69_vm0, %v3428_v51 }
 0x2dd   : > { %3456 = vmatmul.msk.f32.gmra.mxu2 %vm69_vm0, %v4891_v37 }
 0x2de   : > { %3478 = vmatmul.msk.f32.gmra.mxu3 %vm69_vm0, %v4888_v23  ;;  %v3471_v23 = vld [vmem:[%s4803_s26 + $0x70] sm:$0xff] }
 0x2df   : > { %3499 = vmatmul.msk.f32.vlgmr.msra.gmra.mxu0 %vm69_vm0, %v3423_v4 }
 0x2e5   : > { %3457 = vmatmul.msk.f32.gmra.mxu2 %vm69_vm0, %v4914_v8  ;;  %v3450_v8 = vld [vmem:[%s4803_s26 + $0x77] sm:$0xff] }
 0x2e6   : > { %3479 = vmatmul.msk.f32.gmra.mxu3 %vm69_vm0, %v4911_v20 }
 0x2e7   : > { %3500 = vmatmul.msk.f32.gmra.mxu0 %vm69_vm0, %v3424_v13 }
 0x2ec   : > { %v1831_v48 = vpop.f32.mrf.mxu0 }
 0x2ed   : > { %3458 = vmatmul.msk.f32.gmra.mxu2 %vm69_vm0, %v3382_v30  ;;  %v1902_v54 = vpop.f32.mrf.mxu1 }
 0x2ee   : > { %3480 = vmatmul.msk.f32.gmra.mxu3 %vm69_vm0, %v3404_v33  ;;  %v1903_v61 = vadd.f32 %v1902_v54, %v1831_v48 }
 0x2ef   : > { %3501 = vmatmul.msk.f32.gmra.mxu0 %vm69_vm0, %v3425_v31 }
 0x2f0   : > { %v1846_v42 = vpop.f32.mrf.mxu2 }
 0x2f1   : > { %v1917_v58 = vpop.f32.mrf.mxu3 }
 0x2f2   : > { %v5028_v45 = vadd.f32 %v1917_v58, %v1846_v42 }
 0x2f4   : > { %v1834_v49 = vpop.f32.mrf.mxu0 }
 0x2f5   : > { %3459 = vmatmul.msk.f32.gmra.mxu2 %vm69_vm0, %v3383_v32  ;;  %v1905_v3 = vpop.f32.mrf.mxu1 }
 0x2f6   : > { %3481 = vmatmul.msk.f32.gmra.mxu3 %vm69_vm0, %v3405_v36  ;;  %v1906_v1 = vadd.f32 %v1905_v3, %v1834_v49 }
 0x2f7   : > { %3502 = vmatmul.msk.f32.gmra.mxu0 %vm69_vm0, %v3426_v34 }
 0x2f8   : > { %v1849_v14 = vpop.f32.mrf.mxu2 }
 0x2f9   : > { %v1920_v9 = vpop.f32.mrf.mxu3 }
 0x2fa   : > { %v5033_v26 = vadd.f32 %v1920_v9, %v1849_v14 }
 0x2fc   : > { %v1837_v55 = vpop.f32.mrf.mxu0 }
 0x2fd   : > { %3460 = vmatmul.msk.f32.gmra.mxu2 %vm69_vm0, %v3384_v35  ;;  %v1908_v53 = vpop.f32.mrf.mxu1 }
 0x2fe   : > { %3482 = vmatmul.msk.f32.gmra.mxu3 %vm69_vm0, %v3406_v46  ;;  %v1909_v19 = vadd.f32 %v1908_v53, %v1837_v55 }
 0x2ff   : > { %3503 = vmatmul.msk.f32.gmra.mxu0 %vm69_vm0, %v3427_v40 }
 0x300   : > { %v1852_v0 = vpop.f32.mrf.mxu2 }
 0x301   : > { %v1923_v11 = vpop.f32.mrf.mxu3 }
 0x302   : > { %v5044_v17 = vadd.f32 %v1923_v11, %v1852_v0 }
 0x304   : > { %v1840_v15 = vpop.f32.mrf.mxu0 }
 0x305   : > { %3461 = vmatmul.msk.f32.gmra.mxu2 %vm69_vm0, %v3448_v63  ;;  %v1911_v13 = vpop.f32.mrf.mxu1 }
 0x306   : > { %3483 = vmatmul.msk.f32.gmra.mxu3 %vm69_vm0, %v3470_v50  ;;  %v1912_v33 = vadd.f32 %v1911_v13, %v1840_v15 }
 0x307   : > { %3504 = vmatmul.msk.f32.gmra.mxu0 %vm69_vm0, %v3428_v51 }
 0x308   : > { %v1855_v22 = vpop.f32.mrf.mxu2 }
 0x309   : > { %v1926_v44 = vpop.f32.mrf.mxu3 }
 0x30a   : > { %v5053_v52 = vadd.f32 %v1926_v44, %v1855_v22 }
 0x30c   : > { %v1843_v37 = vpop.f32.mrf.mxu0 }
 0x30d   : > { %3462 = vmatmul.msk.f32.gmra.mxu2 %vm69_vm0, %v3449_v59  ;;  %v1914_v46 = vpop.f32.mrf.mxu1 }
 0x30e   : > { %3484 = vmatmul.msk.f32.gmra.mxu3 %vm69_vm0, %v3471_v23  ;;  %v1915_v42 = vadd.f32 %v1914_v46, %v1843_v37 }
 0x30f   : > { %3505 = vmatmul.msk.f32.gmra.mxu0 %vm69_vm0, %v3492_v57 }
 0x310   : > { %v1989_v60 = vpop.f32.mrf.mxu2 }
 0x311   : > { %v2085_v21 = vpop.f32.mrf.mxu3  ;;  %v2016_v20 = vadd.f32 %v1989_v60, %v1903_v61 }
 0x313   : > { %v2112_v7 = vadd.f32 %v2085_v21, %v2016_v20 }
 0x314   : > { %v2181_v38 = vpop.f32.mrf.mxu0 }
 0x315   : > { %v5064_v62 = vadd.f32 %v2181_v38, %v2112_v7  ;;  %3463 = vmatmul.msk.f32.gmra.mxu2 %vm69_vm0, %v3450_v8  ;;  %v2277_v23 = vpop.f32.mrf.mxu1 }
 0x316   : > { %3485 = vmatmul.msk.f32.gmra.mxu3 %vm69_vm0, %v3472_v10 }
 0x317   : > { %3506 = vmatmul.msk.f32.gmra.mxu0 %vm69_vm0, %v3493_v56 }
 0x318   : > { %v1992_v39 = vpop.f32.mrf.mxu2 }
 0x319   : > { %v2088_v24 = vpop.f32.mrf.mxu3  ;;  %v2017_v43 = vadd.f32 %v1992_v39, %v1906_v1  ;;  %v2304_v39 = vadd.f32 %v2277_v23, %v5064_v62 }
 0x31b   : > { %v2113_v18 = vadd.f32 %v2088_v24, %v2017_v43 }
 0x31c   : > { %v2184_v6 = vpop.f32.mrf.mxu0 }
 0x31d   : > { %v2209_v47 = vadd.f32 %v2184_v6, %v2113_v18 }
 0x31f   : > { %3507 = vmatmul.msk.f32.gmra.mxu0 %vm69_vm0, %v3494_v16 }
 0x320   : > { %v1995_v2 = vpop.f32.mrf.mxu2 }
 0x321   : > { %v2091_v4 = vpop.f32.mrf.mxu3  ;;  %v2018_v12 = vadd.f32 %v1995_v2, %v1909_v19 }
 0x323   : > { %v2114_v30 = vadd.f32 %v2091_v4, %v2018_v12 }
 0x324   : > { %v2187_v31 = vpop.f32.mrf.mxu0 }
 0x325   : > { %v2210_v32 = vadd.f32 %v2187_v31, %v2114_v30 }
 0x328   : > { %v1998_v34 = vpop.f32.mrf.mxu2 }
 0x329   : > { %v2094_v35 = vpop.f32.mrf.mxu3  ;;  %v2019_v36 = vadd.f32 %v1998_v34, %v1912_v33 }
 0x32b   : > { %v2115_v40 = vadd.f32 %v2094_v35, %v2019_v36 }
 0x32c   : > { %v2190_v51 = vpop.f32.mrf.mxu0 }
 0x32d   : > { %v5071_v48 = vadd.f32 %v2190_v51, %v2115_v40 }
 0x330   : > { %v2001_v58 = vpop.f32.mrf.mxu2 }
 0x331   : > { %v2097_v49 = vpop.f32.mrf.mxu3  ;;  %v2020_v14 = vadd.f32 %v2001_v58, %v1915_v42 }
 0x333   : > { %v2116_v9 = vadd.f32 %v2097_v49, %v2020_v14 }
 0x334   : > { %v2193_v55 = vpop.f32.mrf.mxu0 }
 0x335   : > { %v5073_v41 = vadd.f32 %v2193_v55, %v2116_v9 }
 0x338   : > { %v2004_v0 = vpop.f32.mrf.mxu2 }
 0x339   : > { %v2100_v11 = vpop.f32.mrf.mxu3  ;;  %v2021_v63 = vadd.f32 %v2004_v0, %v5028_v45  ;;  %v2280_v45 = vpop.f32.mrf.mxu1 }
 0x33a   : > { %v2305_v2 = vadd.f32 %v2280_v45, %v2209_v47 }
 0x33b   : > { %v2117_v50 = vadd.f32 %v2100_v11, %v2021_v63 }
 0x33c   : > { %v2196_v54 = vpop.f32.mrf.mxu0 }
 0x33d   : > { %v5076_v15 = vadd.f32 %v2196_v54, %v2117_v50 }
 0x340   : > { %v2007_v22 = vpop.f32.mrf.mxu2 }
 0x341   : > { %v2103_v44 = vpop.f32.mrf.mxu3  ;;  %v2022_v59 = vadd.f32 %v2007_v22, %v5033_v26  ;;  %v2283_v24 = vpop.f32.mrf.mxu1 }
 0x342   : > { %v2306_v35 = vadd.f32 %v2283_v24, %v2210_v32 }
 0x343   : > { %v2118_v37 = vadd.f32 %v2103_v44, %v2022_v59 }
 0x344   : > { %v2199_v57 = vpop.f32.mrf.mxu0 }
 0x345   : > { %v5079_v3 = vadd.f32 %v2199_v57, %v2118_v37 }
 0x348   : > { %v2010_v61 = vpop.f32.mrf.mxu2 }
 0x349   : > { %v2106_v60 = vpop.f32.mrf.mxu3  ;;  %v2023_v21 = vadd.f32 %v2010_v61, %v5044_v17 }
 0x34b   : > { %v2119_v20 = vadd.f32 %v2106_v60, %v2023_v21 }
 0x34c   : > { %v2202_v8 = vpop.f32.mrf.mxu0 }
 0x34d   : > { %v5082_v10 = vadd.f32 %v2202_v8, %v2119_v20 }
 0x350   : > { %v2013_v7 = vpop.f32.mrf.mxu2 }
 0x351   : > { %v2109_v38 = vpop.f32.mrf.mxu3  ;;  %v2024_v56 = vadd.f32 %v2013_v7, %v5053_v52  ;;  %v2286_v52 = vpop.f32.mrf.mxu1 }
 0x352   : > { %v2307_v9 = vadd.f32 %v2286_v52, %v5071_v48 }
 0x353   : > { %v2120_v1 = vadd.f32 %v2109_v38, %v2024_v56 }
 0x354   : > { %v2205_v26 = vpop.f32.mrf.mxu0 }
 0x355   : > { %v5085_v53 = vadd.f32 %v2205_v26, %v2120_v1 }
 0x358   : > { %v2373_v43 = vpop.f32.mrf.mxu2 }
 0x359   : > { %v2469_v18 = vpop.f32.mrf.mxu3  ;;  %v2400_v6 = vadd.f32 %v2373_v43, %v2304_v39  ;;  %v2289_v42 = vpop.f32.mrf.mxu1 }
 0x35a   : > { %v2308_v59 = vadd.f32 %v2289_v42, %v5073_v41 }
 0x35b   : > { %v2496_v17 = vadd.f32 %v2469_v18, %v2400_v6 }
 0x35c   : > { %v2565_v16 = vpop.f32.mrf.mxu0 }
 0x35d   : > { %v2592_v19 = vadd.f32 %v2565_v16, %v2496_v17 }
 0x35f   : > { %v5089_v4 = vadd.f32 %v2592_v19, %v4409_v5 }
 0x360   : > { %v2376_v12 = vpop.f32.mrf.mxu2 }
 0x361   : > { %v2472_v13 = vpop.f32.mrf.mxu3  ;;  %v2613_v30 = vmul.f32 %v5089_v4, %v5089_v4  ;;  %v2401_v31 = vadd.f32 %v2376_v12, %v2305_v2  ;;  %v2292_v22 = vpop.f32.mrf.mxu1 }
 0x362   : > { %v2309_v8 = vadd.f32 %v2292_v22, %v5076_v15 }
 0x363   : > { %v2497_v33 = vadd.f32 %v2472_v13, %v2401_v31  ;;  %3512 = vmatmul.msk.f32.vlgmr.msra.gmra.mxu1 %vm69_vm0, %v2613_v30 }
 0x364   : > { %v2568_v62 = vpop.f32.mrf.mxu0 }
 0x365   : > { %v2593_v34 = vadd.f32 %v2568_v62, %v2497_v33 }
 0x367   : > { %v5095_v36 = vadd.f32 %v2593_v34, %v4409_v5 }
 0x368   : > { %v2379_v47 = vpop.f32.mrf.mxu2 }
 0x369   : > { %v2475_v40 = vpop.f32.mrf.mxu3  ;;  %v2402_v46 = vadd.f32 %v2379_v47, %v2306_v35  ;;  %v2614_v51 = vmul.f32 %v5095_v36, %v5095_v36  ;;  %v2295_v45 = vpop.f32.mrf.mxu1 }
 0x36a   : > { %v2310_v43 = vadd.f32 %v2295_v45, %v5079_v3 }
 0x36b   : > { %v2498_v58 = vadd.f32 %v2475_v40, %v2402_v46  ;;  %3513 = vmatmul.msk.f32.gmra.mxu1 %vm69_vm0, %v2614_v51 }
 0x36c   : > { %v2571_v49 = vpop.f32.mrf.mxu0 }
 0x36d   : > { %v2594_v14 = vadd.f32 %v2571_v49, %v2498_v58 }
 0x36f   : > { %v5102_v55 = vadd.f32 %v2594_v14, %v4409_v5 }
 0x370   : > { %v2382_v32 = vpop.f32.mrf.mxu2 }
 0x371   : > { %v2478_v0 = vpop.f32.mrf.mxu3  ;;  %v2403_v11 = vadd.f32 %v2382_v32, %v2307_v9  ;;  %v2615_v63 = vmul.f32 %v5102_v55, %v5102_v55  ;;  %v2298_v19 = vpop.f32.mrf.mxu1 }
 0x372   : > { %v2311_v52 = vadd.f32 %v2298_v19, %v5082_v10 }
 0x373   : > { %v2499_v50 = vadd.f32 %v2478_v0, %v2403_v11  ;;  %3514 = vmatmul.msk.f32.gmra.mxu1 %vm69_vm0, %v2615_v63 }
 0x374   : > { %v2574_v54 = vpop.f32.mrf.mxu0 }
 0x375   : > { %v2595_v44 = vadd.f32 %v2574_v54, %v2499_v50 }
 0x377   : > { %v5109_v23 = vadd.f32 %v2595_v44, %v4409_v5 }
 0x378   : > { %v2385_v48 = vpop.f32.mrf.mxu2 }
 0x379   : > { %v2481_v37 = vpop.f32.mrf.mxu3  ;;  %v2404_v57 = vadd.f32 %v2385_v48, %v2308_v59  ;;  %v2616_v61 = vmul.f32 %v5109_v23, %v5109_v23  ;;  %v2301_v35 = vpop.f32.mrf.mxu1 }
 0x37a   : > { %v2312_v46 = vadd.f32 %v2301_v35, %v5085_v53 }
 0x37b   : > { %v2500_v60 = vadd.f32 %v2481_v37, %v2404_v57  ;;  %3515 = vmatmul.msk.f32.gmra.mxu1 %vm69_vm0, %v2616_v61 }
 0x37c   : > { %v2577_v21 = vpop.f32.mrf.mxu0 }
 0x37d   : > { %v2596_v20 = vadd.f32 %v2577_v21, %v2500_v60 }
 0x37f   : > { %v5116_v7 = vadd.f32 %v2596_v20, %v4409_v5 }
 0x380   : > { %v2388_v41 = vpop.f32.mrf.mxu2 }
 0x381   : > { %v2484_v38 = vpop.f32.mrf.mxu3  ;;  %v2405_v56 = vadd.f32 %v2388_v41, %v2309_v8  ;;  %v2617_v1 = vmul.f32 %v5116_v7, %v5116_v7 }
 0x383   : > { %v2501_v26 = vadd.f32 %v2484_v38, %v2405_v56  ;;  %3516 = vmatmul.msk.f32.gmra.mxu1 %vm69_vm0, %v2617_v1 }
 0x384   : > { %v2580_v39 = vpop.f32.mrf.mxu0 }
 0x385   : > { %v2597_v24 = vadd.f32 %v2580_v39, %v2501_v26 }
 0x387   : > { %v5123_v18 = vadd.f32 %v2597_v24, %v4409_v5 }
 0x388   : > { %v2391_v15 = vpop.f32.mrf.mxu2 }
 0x389   : > { %v2487_v6 = vpop.f32.mrf.mxu3  ;;  %v2406_v17 = vadd.f32 %v2391_v15, %v2310_v43  ;;  %v2618_v16 = vmul.f32 %v5123_v18, %v5123_v18 }
 0x38b   : > { %v2502_v2 = vadd.f32 %v2487_v6, %v2406_v17  ;;  %3517 = vmatmul.msk.f32.gmra.mxu1 %vm69_vm0, %v2618_v16 }
 0x38c   : > { %v2583_v12 = vpop.f32.mrf.mxu0 }
 0x38d   : > { %v2598_v13 = vadd.f32 %v2583_v12, %v2502_v2 }
 0x38f   : > { %v5130_v30 = vadd.f32 %v2598_v13, %v4409_v5 }
 0x390   : > { %v2394_v3 = vpop.f32.mrf.mxu2 }
 0x391   : > { %v2490_v31 = vpop.f32.mrf.mxu3  ;;  %v2407_v33 = vadd.f32 %v2394_v3, %v2311_v52  ;;  %v2619_v62 = vmul.f32 %v5130_v30, %v5130_v30 }
 0x393   : > { %v2503_v34 = vadd.f32 %v2490_v31, %v2407_v33  ;;  %3518 = vmatmul.msk.f32.gmra.mxu1 %vm69_vm0, %v2619_v62 }
 0x394   : > { %v2586_v47 = vpop.f32.mrf.mxu0 }
 0x395   : > { %v2599_v40 = vadd.f32 %v2586_v47, %v2503_v34 }
 0x397   : > { %v5137_v51 = vadd.f32 %v2599_v40, %v4409_v5 }
 0x398   : > { %v2397_v10 = vpop.f32.mrf.mxu2 }
 0x399   : > { %v2493_v42 = vpop.f32.mrf.mxu3  ;;  %v2408_v58 = vadd.f32 %v2397_v10, %v2312_v46  ;;  %v2620_v49 = vmul.f32 %v5137_v51, %v5137_v51 }
 0x39b   : > { %v2504_v14 = vadd.f32 %v2493_v42, %v2408_v58  ;;  %3519 = vmatmul.msk.f32.gmra.mxu1 %vm69_vm0, %v2620_v49 }
 0x39c   : > { %v2589_v9 = vpop.f32.mrf.mxu0 }
 0x39d   : > { %v2600_v32 = vadd.f32 %v2589_v9, %v2504_v14 }
 0x39f   : > { %v5143_v0 = vadd.f32 %v2600_v32, %v4409_v5 }
 0x3a1   : > { %v2621_v53 = vmul.f32 %v5143_v0, %v5143_v0 }
 0x3a3   : > { %3520 = vmatmul.msk.f32.gmra.mxu1 %vm69_vm0, %v2621_v53 }
 0x3e0   : > { %v2666_v11 = vpop.f32.mrf.mxu1 }
 0x3e1   : > { %v2693_v63 = vmul.f32 2e-05, %v2666_v11 }
 0x3e3   : > { %v2702_v50 = vadd.f32 1.0, %v2693_v63 }
 0x3e5   : > { %3617 = vlog2.f32 %v2702_v50 }
 0x3e8   : > { %v2669_v54 = vpop.f32.mrf.mxu1 }
 0x3e9   : > { %v2694_v22 = vmul.f32 2e-05, %v2669_v54 }
 0x3eb   : > { %v3618_v44 = vpop.eup %3617  ;;  %v2703_v59 = vadd.f32 1.0, %v2694_v22 }
 0x3ec   : > { %v2712_v48 = vmul.f32 0.6931472, %v3618_v44 }
 0x3ed   : > { %3619 = vlog2.f32 %v2703_v59 }
 0x3ee   : > { %v2729_v37 = vmul.f32 -0.75, %v2712_v48 }
 0x3f0   : > { %v2738_v57 = vmul.f32 1.442695, %v2729_v37  ;;  %v2672_v61 = vpop.f32.mrf.mxu1 }
 0x3f1   : > { %v2695_v60 = vmul.f32 2e-05, %v2672_v61 }
 0x3f2   : > { %3621 = vpow2.f32 %v2738_v57 }
 0x3f3   : > { %v3620_v21 = vpop.eup %3619  ;;  %v2704_v20 = vadd.f32 1.0, %v2695_v60 }
 0x3f4   : > { %v2714_v8 = vmul.f32 0.6931472, %v3620_v21 }
 0x3f5   : > { %3623 = vlog2.f32 %v2704_v20 }
 0x3f6   : > { %v2730_v45 = vmul.f32 -0.75, %v2714_v8 }
 0x3f8   : > { %v3622_v41 = vpop.eup %3621  ;;  %v2740_v38 = vmul.f32 1.442695, %v2730_v45  ;;  %v2675_v56 = vpop.f32.mrf.mxu1 }
 0x3f9   : > { %v2756_v1 = vmul.f32 %v3622_v41, %v5089_v4  ;;  %v2696_v26 = vmul.f32 2e-05, %v2675_v56 }
 0x3fa   : > { %3625 = vpow2.f32 %v2740_v38 }
 0x3fb   : > { %v3624_v39 = vpop.eup %3623  ;;  %3521 = vst.msk [vmem:[%s5153_s7 + $0x1b0] sm:$0xff] %vm69_vm0, %v2756_v1  ;;  %v2705_v24 = vadd.f32 1.0, %v2696_v26 }
 0x3fc   : > { %v2716_v43 = vmul.f32 0.6931472, %v3624_v39 }
 0x3fd   : > { %3627 = vlog2.f32 %v2705_v24 }
 0x3fe   : > { %v2731_v15 = vmul.f32 -0.75, %v2716_v43 }
 0x400   : > { %v3626_v6 = vpop.eup %3625  ;;  %v2742_v17 = vmul.f32 1.442695, %v2731_v15  ;;  %v2678_v16 = vpop.f32.mrf.mxu1 }
 0x401   : > { %v2757_v19 = vmul.f32 %v3626_v6, %v5095_v36  ;;  %v2697_v2 = vmul.f32 2e-05, %v2678_v16 }
 0x402   : > { %3629 = vpow2.f32 %v2742_v17 }
 0x403   : > { %v3628_v12 = vpop.eup %3627  ;;  %3522 = vst.msk [vmem:[%s5153_s7 + $0x1b8] sm:$0xff] %vm69_vm0, %v2757_v19  ;;  %v2706_v4 = vadd.f32 1.0, %v2697_v2 }
 0x404   : > { %v2718_v13 = vmul.f32 0.6931472, %v3628_v12 }
 0x405   : > { %3631 = vlog2.f32 %v2706_v4 }
 0x406   : > { %v2732_v52 = vmul.f32 -0.75, %v2718_v13 }
 0x408   : > { %v3630_v3 = vpop.eup %3629  ;;  %v2744_v31 = vmul.f32 1.442695, %v2732_v52  ;;  %v2681_v33 = vpop.f32.mrf.mxu1 }
 0x409   : > { %v2758_v62 = vmul.f32 %v3630_v3, %v5102_v55  ;;  %v2698_v34 = vmul.f32 2e-05, %v2681_v33 }
 0x40a   : > { %3633 = vpow2.f32 %v2744_v31 }
 0x40b   : > { %v3632_v35 = vpop.eup %3631  ;;  %3523 = vst.msk [vmem:[%s5153_s7 + $0x1c0] sm:$0xff] %vm69_vm0, %v2758_v62  ;;  %v2707_v36 = vadd.f32 1.0, %v2698_v34 }
 0x40c   : > { %v2720_v47 = vmul.f32 0.6931472, %v3632_v35 }
 0x40d   : > { %3635 = vlog2.f32 %v2707_v36 }
 0x40e   : > { %v2733_v40 = vmul.f32 -0.75, %v2720_v47 }
 0x410   : > { %v3634_v46 = vpop.eup %3633  ;;  %v2746_v10 = vmul.f32 1.442695, %v2733_v40  ;;  %v2684_v42 = vpop.f32.mrf.mxu1 }
 0x411   : > { %v2759_v58 = vmul.f32 %v3634_v46, %v5109_v23  ;;  %v2699_v49 = vmul.f32 2e-05, %v2684_v42 }
 0x412   : > { %3637 = vpow2.f32 %v2746_v10 }
 0x413   : > { %v3636_v14 = vpop.eup %3635  ;;  %3524 = vst.msk [vmem:[%s5153_s7 + $0x1c8] sm:$0xff] %vm69_vm0, %v2759_v58  ;;  %v2708_v55 = vadd.f32 1.0, %v2699_v49 }
 0x414   : > { %v2722_v9 = vmul.f32 0.6931472, %v3636_v14 }
 0x415   : > { %3639 = vlog2.f32 %v2708_v55 }
 0x416   : > { %v2734_v32 = vmul.f32 -0.75, %v2722_v9 }
 0x418   : > { %v3638_v53 = vpop.eup %3637  ;;  %v2748_v11 = vmul.f32 1.442695, %v2734_v32  ;;  %v2687_v63 = vpop.f32.mrf.mxu1 }
 0x419   : > { %v2760_v50 = vmul.f32 %v3638_v53, %v5116_v7  ;;  %v2700_v54 = vmul.f32 2e-05, %v2687_v63 }
 0x41a   : > { %3641 = vpow2.f32 %v2748_v11 }
 0x41b   : > { %v3640_v22 = vpop.eup %3639  ;;  %3525 = vst.msk [vmem:[%s5153_s7 + $0x1d0] sm:$0xff] %vm69_vm0, %v2760_v50  ;;  %v2709_v23 = vadd.f32 1.0, %v2700_v54 }
 0x41c   : > { %v2724_v44 = vmul.f32 0.6931472, %v3640_v22 }
 0x41d   : > { %3643 = vlog2.f32 %v2709_v23 }
 0x41e   : > { %v2735_v59 = vmul.f32 -0.75, %v2724_v44 }
 0x420   : > { %v3642_v48 = vpop.eup %3641  ;;  %v2750_v37 = vmul.f32 1.442695, %v2735_v59  ;;  %v2690_v57 = vpop.f32.mrf.mxu1 }
 0x421   : > { %v2761_v61 = vmul.f32 %v3642_v48, %v5123_v18  ;;  %v2701_v60 = vmul.f32 2e-05, %v2690_v57 }
 0x422   : > { %3645 = vpow2.f32 %v2750_v37 }
 0x423   : > { %v3644_v21 = vpop.eup %3643  ;;  %3526 = vst.msk [vmem:[%s5153_s7 + $0x1d8] sm:$0xff] %vm69_vm0, %v2761_v61  ;;  %v2710_v7 = vadd.f32 1.0, %v2701_v60 }
 0x424   : > { %v2726_v20 = vmul.f32 0.6931472, %v3644_v21 }
 0x425   : > { %3647 = vlog2.f32 %v2710_v7 }
 0x426   : > { %v2736_v8 = vmul.f32 -0.75, %v2726_v20 }
 0x428   : > { %v3646_v45 = vpop.eup %3645  ;;  %v2752_v41 = vmul.f32 1.442695, %v2736_v8 }
 0x429   : > { %v2762_v38 = vmul.f32 %v3646_v45, %v5130_v30 }
 0x42a   : > { %3649 = vpow2.f32 %v2752_v41 }
 0x42b   : > { %v3648_v56 = vpop.eup %3647  ;;  %3527 = vst.msk [vmem:[%s5153_s7 + $0x1e0] sm:$0xff] %vm69_vm0, %v2762_v38 }
 0x42c   : > { %v2728_v18 = vmul.f32 0.6931472, %v3648_v56 }
 0x42e   : > { %v2737_v1 = vmul.f32 -0.75, %v2728_v18 }
 0x430   : > { %v3650_v26 = vpop.eup %3649  ;;  %v2754_v39 = vmul.f32 1.442695, %v2737_v1 }
 0x431   : > { %v2763_v24 = vmul.f32 %v3650_v26, %v5137_v51 }
 0x432   : > { %3651 = vpow2.f32 %v2754_v39 }
 0x433   : > { %3528 = vst.msk [vmem:[%s5153_s7 + $0x1e8] sm:$0xff] %vm69_vm0, %v2763_v24 }
 0x437   :  { %1753 = sbr.rel (!%p1751_p3) target bundleno = 613 (0x265), region = 163 }
 0x438   : > { %v3652_v43 = vpop.eup %3651 }
 0x439   : > { %v2764_v15 = vmul.f32 %v3652_v43, %v5143_v0 }
 0x43b   : > { %3529 = vst.msk [vmem:[%s5153_s7 + $0x1f0] sm:$0xff] %vm69_vm0, %v2764_v15 }

</bundles_post_ra>
